<compile_context>
chip_gen: v6e
topology: v6e:2x2x1
jax: 0.10.0
libtpu: 0.0.40
codegen_flags: <defaults>
</compile_context>

<pallas_src>
import math

import numpy as np
import jax
import jax.numpy as jnp
from jax import lax
from jax.experimental import pallas as pl
from jax.experimental.pallas import tpu as pltpu


_VMEM_LIMIT = 32 * 1024 * 1024      # >= v5e default (16 MiB), == v6e/v7x default
_N_BINS = 10 * 10 * 10              # dimH * dimS * dimV in FAME.getSeg
_N_BINS_PAD = 1024                  # lane-padded color-bin count (= 8 * 128)
_NVB = 1024                         # value-quantile bins for thresholds (= 8 * 128)


def _pick_tile(total, max_tile):
    """Largest tile <= max_tile that divides `total` and is a multiple of 128
    (falls back to `total` when it is small); guards against silently picking
    the whole (huge) extent when H*W has no 128-multiple divisor."""
    if total <= max_tile:
        return total
    best = None
    t = 128
    while t <= max_tile:
        if total % t == 0:
            best = t
        t += 128
    if best is None:
        assert total <= 16384, (
            "H*W must be divisible by 128 (or small) so the streaming kernels "
            "can tile it; got H*W = %d" % total)
        return total
    return best


def _gauss_reflect_matrix(n, ksize, sigma):
    """Dense (n, n) operator applying a 1-D Gaussian blur with PyTorch 'reflect'
    padding (boundary handling folded into the matrix, so no host pad)."""
    p = ksize // 2
    assert p <= n - 1, "reflect padding requires pad <= n-1"
    xs = np.arange(ksize, dtype=np.float64) - p
    k1 = np.exp(-(xs ** 2) / (2.0 * float(sigma) ** 2))
    k1 = k1 / k1.sum()                      # kornia get_gaussian_kernel1d (normalized)
    a = np.zeros((n, n), dtype=np.float64)
    for o in range(n):
        for j in range(ksize):
            src = o + j - p
            if src < 0:
                src = -src
            elif src >= n:
                src = 2 * (n - 1) - src
            a[o, src] += k1[j]
    return a.astype(np.float32)


# ----------------------------------------------------------------------------
# Kernels
# ----------------------------------------------------------------------------
def make_diff_cmap_kernel(eps_hsv):
    """Fused: temporal-difference energy + kornia rgb_to_hsv + FAME quantization.
    Both consume the full video, so one pass over HBM serves both outputs."""
    two_pi = 2.0 * math.pi

    def kernel(v_ref, diff_ref, cmap_ref):
        # v_ref: (1, C, T, hw) ; diff_ref: (1, 1, hw) f32 ; cmap_ref: (1, 1, hw) i32
        v = v_ref[0].astype(jnp.float32)                 # (C, T, hw)

        # ---- |v[:, t] - v[:, t+1]|.sum(C).mean(T-1) -----------------------
        d = jnp.abs(v[:, :-1, :] - v[:, 1:, :])          # (C, T-1, hw)
        diff_ref[0] = jnp.mean(jnp.sum(d, axis=0), axis=0, keepdims=True)

        # ---- kornia rgb_to_hsv on the T-mean image (H in radians [0, 2pi)) -
        img = jnp.mean(v, axis=1)                        # (C, hw)
        r, g, b = img[0:1], img[1:2], img[2:3]           # (1, hw) each
        maxc = jnp.maximum(jnp.maximum(r, g), b)
        minc = jnp.minimum(jnp.minimum(r, g), b)
        delta = maxc - minc
        val = maxc
        sat = delta / (maxc + eps_hsv)
        deltac = jnp.where(delta == 0.0, jnp.ones_like(delta), delta)
        rc, gc, bc = maxc - r, maxc - g, maxc - b
        h1 = (bc - gc) / deltac
        h2 = ((rc - bc) + 2.0 * deltac) / deltac
        h3 = ((gc - rc) + 4.0 * deltac) / deltac
        h = jnp.where(maxc == r, h1, jnp.where(maxc == g, h2, h3))
        h = jnp.mod(h / 6.0, 1.0)                        # hue fraction in [0, 1)
        hue = two_pi * h                                 # kornia hue (radians)

        # ---- FAME.getSeg quantization.  NOTE: FAME multiplies the *radian*
        # hue by 2*pi again (torch.cos(img_h * 2*pi) with img_h in [0, 2pi));
        # i.e. cos(4*pi^2*h).  Reproduced verbatim for fidelity.
        ang = hue * two_pi
        hx = (sat * jnp.cos(ang) + 1.0) / 2.0
        hy = (sat * jnp.sin(ang) + 1.0) / 2.0
        hq = jnp.round(hx * 9.0 + 1.0)
        sq = jnp.round(hy * 9.0 + 1.0)
        vq = jnp.round(val * 9.0 + 1.0)
        cmap = hq + (sq - 1.0) * 10.0 + (vq - 1.0) * 100.0
        cmap_ref[0] = cmap.astype(jnp.int32)

    return kernel


def make_gauss_norm_kernel(eps):
    """Gaussian blur (reflect) as two bf16 MXU matmuls + per-image min/max norm.
    bf16 operands avoid multi-pass f32 MXU; the Gaussian weights are smooth and
    sum to 1, so the precision impact on the (subsequently normalized) mask is
    negligible.  The norm itself stays f32."""
    def kernel(x_ref, ah_ref, awt_ref, o_ref):
        # x_ref: (1, H, W) ; ah_ref: (H, H) bf16 ; awt_ref: (W, W) bf16 (= A_w^T)
        x = x_ref[0].astype(jnp.bfloat16)
        y = jnp.dot(ah_ref[...], x, preferred_element_type=jnp.float32)       # rows
        y = jnp.dot(y.astype(jnp.bfloat16), awt_ref[...],
                    preferred_element_type=jnp.float32)                       # cols
        # norm_batch: x -= min ; x /= (max(x) + eps)
        y = y - jnp.min(y, keepdims=True)
        inv = 1.0 / (jnp.max(y, keepdims=True) + eps)
        o_ref[0] = y * inv

    return kernel


def value_hist_kernel(m_ref, hist_ref):
    """1024-bin value histogram of a [0,1) mask, accumulated over HW chunks.
    The bin index is factorized into (hi = bin>>7, lo = bin&127) one-hots and
    the pixel reduction is a single NT MXU matmul -> lane-dense (8, 128)
    accumulator (no XLU lane reductions, no lane-sparse stores)."""
    @pl.when(pl.program_id(1) == 0)
    def _():
        hist_ref[...] = jnp.zeros_like(hist_ref)

    m = m_ref[0]                                         # (1, hw) f32
    hw = m.shape[-1]
    vbin = jnp.clip(jnp.floor(m * _NVB), 0.0, _NVB - 1.0).astype(jnp.int32)
    hi = jnp.right_shift(vbin, 7)                        # [0, 7]
    lo = jnp.bitwise_and(vbin, 127)                      # [0, 127]
    oh_hi = (hi == lax.broadcasted_iota(jnp.int32, (8, hw), 0)).astype(jnp.bfloat16)
    oh_lo = (lo == lax.broadcasted_iota(jnp.int32, (128, hw), 0)).astype(jnp.bfloat16)
    cnt = lax.dot_general(oh_hi, oh_lo, (((1,), (1,)), ((), ())),
                          preferred_element_type=jnp.float32)        # (8, 128)
    hist_ref[0] += cnt                                   # exact integer counts in f32


def color_hist_kernel(cm_ref, m_ref, thr_ref, hist_ref):
    """Mask-weighted 1000-bin color histograms over ALL pixels:
       fg weight = (mask value-bin >= thr_fg), bg weight = (value-bin <= thr_bg).
    Replaces top_k + gather + padded-sample bincount.  Factorized one-hot
    (hi/lo) + one NT MXU matmul per chunk; lane-dense (16, 128) accumulator
    (rows 0..7 = fg hist laid out hi*128+lo, rows 8..15 = bg hist)."""
    @pl.when(pl.program_id(1) == 0)
    def _():
        hist_ref[...] = jnp.zeros_like(hist_ref)

    b = pl.program_id(0)
    cm = cm_ref[0]                                       # (1, hw) i32 in [1, 1000]
    m = m_ref[0]                                         # (1, hw) f32
    hw = cm.shape[-1]
    vbin = jnp.clip(jnp.floor(m * _NVB), 0.0, _NVB - 1.0).astype(jnp.int32)
    w_fg = (vbin >= thr_ref[b, 0]).astype(jnp.bfloat16)  # (1, hw)
    w_bg = (vbin <= thr_ref[b, 1]).astype(jnp.bfloat16)
    chi = jnp.right_shift(cm, 7)                         # [0, 7]
    clo = jnp.bitwise_and(cm, 127)                       # [0, 127]
    oh_hi = (chi == lax.broadcasted_iota(jnp.int32, (8, hw), 0)).astype(jnp.bfloat16)
    oh_lo = (clo == lax.broadcasted_iota(jnp.int32, (128, hw), 0)).astype(jnp.bfloat16)
    lhs = jnp.concatenate([oh_hi * w_fg, oh_hi * w_bg], axis=0)      # (16, hw) bf16
    cnt = lax.dot_general(lhs, oh_lo, (((1,), (1,)), ((), ())),
                          preferred_element_type=jnp.float32)        # (16, 128)
    hist_ref[0] += cnt                                   # exact integer counts in f32


def refine_kernel(cm_ref, hist_ref, inv_ref, o_ref):
    """pr_fg = hist_fg[cmap]/(sum_fg+eps) ; pr_bg = (hist_bg[cmap]+1)/(sum_bg+1000+eps)
    refine = pr_fg/(pr_fg+pr_bg).  Gather = bf16 one-hot + bf16 MXU matmul.
    The integer counts travel EXACTLY through bf16 via a base-256 3-digit split
    (rows 0..2 fg digits, 3..5 bg digits), recombined in f32 here."""
    b = pl.program_id(0)
    cm = cm_ref[0]                                       # (1, hw)
    hw = cm.shape[-1]
    bins = lax.broadcasted_iota(jnp.int32, (_N_BINS_PAD, hw), 0)
    onehot = (cm == bins).astype(jnp.bfloat16)           # (1024, hw) bf16
    parts = jnp.dot(hist_ref[0], onehot,
                    preferred_element_type=jnp.float32)  # (8, hw) exact (one-hot rows)
    cnt_fg = parts[0:1] * 65536.0 + parts[1:2] * 256.0 + parts[2:3]
    cnt_bg = parts[3:4] * 65536.0 + parts[4:5] * 256.0 + parts[5:6]
    pr_fg = cnt_fg * inv_ref[b, 0]
    pr_bg = (cnt_bg + 1.0) * inv_ref[b, 1]
    o_ref[0] = pr_fg / (pr_bg + pr_fg)


def fuse_kernel(perm_ref, vp_ref, v_ref, m2_ref, thr_ref, o_ref):
    """o = v[perm]*(1-m) + v*m, rewritten as vp + m*(v - vp); the binary mask is
    built in-kernel from the per-image threshold (top beta*H*W pixels)."""
    del perm_ref                                         # only used by the index_map
    b = pl.program_id(0)
    m = (m2_ref[0] >= thr_ref[b]).astype(jnp.float32)    # (1, hw): 1 -> keep original
    vp = vp_ref[0].astype(jnp.float32)                   # (C, T, hw) permuted clip
    v = v_ref[0].astype(jnp.float32)                     # (C, T, hw) original clip
    o_ref[0] = (vp + m * (v - vp)).astype(o_ref.dtype)


# ----------------------------------------------------------------------------
# Small XLA glue helpers (all O(B * 1024))
# ----------------------------------------------------------------------------
def _topk_bin_threshold(vhist, k):
    """Largest value-bin j such that count(bin >= j) >= k (per image)."""
    cc = jnp.cumsum(vhist[:, ::-1], axis=1)[:, ::-1]     # cc[j] = count(bin >= j)
    j = jnp.sum((cc >= k).astype(jnp.int32), axis=1) - 1
    return jnp.maximum(j, 0).astype(jnp.int32)


def _bottomk_bin_threshold(vhist, k):
    """Smallest value-bin j such that count(bin <= j) >= k (per image)."""
    cl = jnp.cumsum(vhist, axis=1)                       # cl[j] = count(bin <= j)
    j = jnp.sum((cl < k).astype(jnp.int32), axis=1)
    return jnp.minimum(j, _NVB - 1).astype(jnp.int32)


def _split_base256(c):
    """Split integer-valued f32 counts (< 2**24) into three bf16-exact digits."""
    a = jnp.floor(c / 65536.0)
    r = c - a * 65536.0
    b = jnp.floor(r / 256.0)
    d = r - b * 256.0
    return a, b, d


# ----------------------------------------------------------------------------
# Forward wrapper
# ----------------------------------------------------------------------------
def fame_forward(video, perm_key, crop_size=None, beta=0.5, eps=1e-8,
                 stream_dtype=None):
    B, C, T, H, W = video.shape
    assert C == 3, "rgb_to_hsv requires 3 channels"
    HW = H * W
    crop_size = H if crop_size is None else crop_size
    ksize = int(0.1 * crop_size) // 2 * 2 + 1
    sigma = ksize / 3.0

    vf = video.reshape(B, C, T, HW)
    # TODO(synk): stream_dtype=jnp.bfloat16 halves the HBM traffic of the two
    # video-streaming kernels (big win on v5e/v6e) but slightly perturbs the
    # fused output values -- off by default to preserve module semantics.
    if stream_dtype is not None and stream_dtype != vf.dtype:
        vf = vf.astype(stream_dtype)

    hw_tile = _pick_tile(HW, 4096)      # video-streaming kernels (diff/cmap, fuse)
    n_hw = HW // hw_tile
    hw_tile_h = _pick_tile(HW, 2048)    # value/color histogram kernels
    n_hw_h = HW // hw_tile_h
    hw_tile_r = _pick_tile(HW, 2048)    # refine kernel (bounds the one-hot)
    n_hw_r = HW // hw_tile_r

    # --- 1) fused temporal-diff + color map (one pass over the video) --------
    im_diff, cmap = pl.pallas_call(
        make_diff_cmap_kernel(1e-8),
        out_shape=(jax.ShapeDtypeStruct((B, 1, HW), jnp.float32),
                   jax.ShapeDtypeStruct((B, 1, HW), jnp.int32)),
        grid=(B, n_hw),
        in_specs=[pl.BlockSpec((1, C, T, hw_tile), lambda b, h: (b, 0, 0, h))],
        out_specs=(pl.BlockSpec((1, 1, hw_tile), lambda b, h: (b, 0, h)),
                   pl.BlockSpec((1, 1, hw_tile), lambda b, h: (b, 0, h))),
        compiler_params=pltpu.CompilerParams(
            dimension_semantics=("parallel", "parallel"),
            vmem_limit_bytes=_VMEM_LIMIT),
    )(vf)

    # --- 2) Gaussian blur (reflect) + per-image min/max norm ------------------
    a_h = jnp.asarray(_gauss_reflect_matrix(H, ksize, sigma)).astype(jnp.bfloat16)
    a_wt = jnp.asarray(_gauss_reflect_matrix(W, ksize, sigma).T).astype(jnp.bfloat16)
    gauss_kernel = make_gauss_norm_kernel(eps)

    def gauss_norm(x_bhw):
        return pl.pallas_call(
            gauss_kernel,
            out_shape=jax.ShapeDtypeStruct((B, H, W), jnp.float32),
            grid=(B,),
            in_specs=[pl.BlockSpec((1, H, W), lambda b: (b, 0, 0)),
                      pl.BlockSpec((H, H), lambda b: (0, 0)),
                      pl.BlockSpec((W, W), lambda b: (0, 0))],
            out_specs=pl.BlockSpec((1, H, W), lambda b: (b, 0, 0)),
            compiler_params=pltpu.CompilerParams(
                dimension_semantics=("parallel",),
                vmem_limit_bytes=_VMEM_LIMIT),
        )(x_bhw, a_h, a_wt)

    mask1 = gauss_norm(im_diff.reshape(B, H, W)).reshape(B, 1, HW)

    def value_hist(mask_b1hw):
        return pl.pallas_call(
            value_hist_kernel,
            out_shape=jax.ShapeDtypeStruct((B, 8, 128), jnp.float32),
            grid=(B, n_hw_h),
            in_specs=[pl.BlockSpec((1, 1, hw_tile_h), lambda b, c: (b, 0, c))],
            out_specs=pl.BlockSpec((1, 8, 128), lambda b, c: (b, 0, 0)),
            compiler_params=pltpu.CompilerParams(
                dimension_semantics=("parallel", "arbitrary"),
                vmem_limit_bytes=_VMEM_LIMIT),
        )(mask_b1hw)

    # --- 3) per-image fg/bg thresholds from the mask's value CDF --------------
    # Replaces lax.top_k(mask1, 0.5*HW) / top_k(-mask1, 0.1*HW).
    # TODO(synk): bin-granularity / ties can select slightly more than kf / kb
    #             pixels vs torch's exact top-k index sets; the histogram is
    #             normalized by the ACTUAL selected count, so the formula stays
    #             consistent with the torch reference.
    kf = int(0.5 * H * W)
    kb = int(0.1 * H * W)
    vh1 = value_hist(mask1).reshape(B, _NVB)
    thr_bins = jnp.stack([_topk_bin_threshold(vh1, kf),
                          _bottomk_bin_threshold(vh1, kb)], axis=1)   # (B, 2) i32

    # --- 4) mask-weighted 1000-bin color histograms over all pixels -----------
    hist2d = pl.pallas_call(
        color_hist_kernel,
        out_shape=jax.ShapeDtypeStruct((B, 16, 128), jnp.float32),
        grid_spec=pltpu.PrefetchScalarGridSpec(
            num_scalar_prefetch=0,
            grid=(B, n_hw_h),
            in_specs=[pl.BlockSpec((1, 1, hw_tile_h), lambda b, c: (b, 0, c)),
                      pl.BlockSpec((1, 1, hw_tile_h), lambda b, c: (b, 0, c)),
                      pl.BlockSpec(memory_space=pltpu.MemorySpace.SMEM)],
            out_specs=pl.BlockSpec((1, 16, 128), lambda b, c: (b, 0, 0))),
        compiler_params=pltpu.CompilerParams(
            dimension_semantics=("parallel", "arbitrary"),
            vmem_limit_bytes=_VMEM_LIMIT),
    )(cmap, mask1, thr_bins)

    fg = hist2d[:, 0:8, :].reshape(B, _N_BINS_PAD)      # index = hi*128 + lo = color
    bg = hist2d[:, 8:16, :].reshape(B, _N_BINS_PAD)
    sum_fg = jnp.sum(fg, axis=1)
    sum_bg = jnp.sum(bg, axis=1)
    inv_norm = jnp.stack([1.0 / (sum_fg + eps),
                          1.0 / (sum_bg + float(_N_BINS) + eps)],
                         axis=1).astype(jnp.float32)                  # (B, 2)
    fa, fbd, fc = _split_base256(fg)
    ba, bbd, bc = _split_base256(bg)
    zeros = jnp.zeros_like(fg)
    hist8 = jnp.stack([fa, fbd, fc, ba, bbd, bc, zeros, zeros],
                      axis=1).astype(jnp.bfloat16)                    # (B, 8, 1024)

    # --- 5) per-pixel probability gather -> refined mask ----------------------
    refine = pl.pallas_call(
        refine_kernel,
        out_shape=jax.ShapeDtypeStruct((B, 1, HW), jnp.float32),
        grid_spec=pltpu.PrefetchScalarGridSpec(
            num_scalar_prefetch=0,
            grid=(B, n_hw_r),
            in_specs=[pl.BlockSpec((1, 1, hw_tile_r), lambda b, h: (b, 0, h)),
                      pl.BlockSpec((1, 8, _N_BINS_PAD), lambda b, h: (b, 0, 0)),
                      pl.BlockSpec(memory_space=pltpu.MemorySpace.SMEM)],
            out_specs=pl.BlockSpec((1, 1, hw_tile_r), lambda b, h: (b, 0, h))),
        compiler_params=pltpu.CompilerParams(
            dimension_semantics=("parallel", "parallel"),
            vmem_limit_bytes=_VMEM_LIMIT),
    )(cmap, hist8, inv_norm)

    # --- 6) second blur + norm -------------------------------------------------
    mask2 = gauss_norm(refine.reshape(B, H, W)).reshape(B, 1, HW)

    # --- 7) per-image threshold selecting the top beta*H*W pixels ---------------
    # TODO(synk): like the original >=-threshold, value-bin granularity / ties
    #             can select >= num_fg pixels vs torch's exact top_k+scatter.
    num_fg = int(beta * H * W)
    vh2 = value_hist(mask2).reshape(B, _NVB)
    j2 = _topk_bin_threshold(vh2, num_fg)
    thr2 = j2.astype(jnp.float32) / float(_NVB)          # mask2 >= thr2 <=> bin >= j2

    # --- 8) fusion with a random batch permutation (scalar-prefetch gather) -----
    perm = jax.random.permutation(perm_key, B).astype(jnp.int32)
    fused = pl.pallas_call(
        fuse_kernel,
        out_shape=jax.ShapeDtypeStruct((B, C, T, HW), video.dtype),
        grid_spec=pltpu.PrefetchScalarGridSpec(
            num_scalar_prefetch=1,
            grid=(B, n_hw),
            in_specs=[
                pl.BlockSpec((1, C, T, hw_tile), lambda b, h, p: (p[b], 0, 0, h)),
                pl.BlockSpec((1, C, T, hw_tile), lambda b, h, p: (b, 0, 0, h)),
                pl.BlockSpec((1, 1, hw_tile), lambda b, h, p: (b, 0, h)),
                pl.BlockSpec(memory_space=pltpu.MemorySpace.SMEM),
            ],
            out_specs=pl.BlockSpec((1, C, T, hw_tile), lambda b, h, p: (b, 0, 0, h)),
        ),
        compiler_params=pltpu.CompilerParams(
            dimension_semantics=("parallel", "parallel"),
            vmem_limit_bytes=_VMEM_LIMIT),
    )(perm, vf, vf, mask2, thr2)

    return fused.reshape(B, C, T, H, W)


# ----------------------------------------------------------------------------
if __name__ == "__main__":
    key = jax.random.PRNGKey(0)
    k_data, k_perm = jax.random.split(key)

    # small shapes: B=2, C=3 (RGB), T=4 frames, H=W=32, crop_size=32 -> 3x3 gauss
    B, C, T, H, W = 2, 3, 4, 32, 32
    video = jax.random.uniform(k_data, (B, C, T, H, W), dtype=jnp.float32)

    out = fame_forward(video, k_perm, crop_size=W, beta=0.5, eps=1e-8)
    out = jax.block_until_ready(out)

    assert out.shape == (B, C, T, H, W)
    assert bool(jnp.all(jnp.isfinite(out)))
    print("KERNEL_OK")
</pallas_src>

<mosaic_0001>
module attributes {stable_mosaic.version = 11 : i64} {
  func.func @kernel(%arg0: i32, %arg1: i32, %arg2: memref<1x3x4x1024xf32, #tpu.memory_space<vmem>>, %arg3: memref<1x1x1024xf32, #tpu.memory_space<vmem>>, %arg4: memref<1x1x1024xi32, #tpu.memory_space<vmem>>) attributes {dimension_semantics = [#tpu.dimension_semantics<parallel>, #tpu.dimension_semantics<parallel>], iteration_bounds = array<i64: 2, 1>, scalar_prefetch = 0 : i64, scratch_operands = 0 : i64, tpu.core_type = #tpu.core_type<tc>, window_params = [{transform_indices = @transform_0, window_bounds = array<i64: 1, 3, 4, 1024>}, {transform_indices = @transform_1, window_bounds = array<i64: 1, 1, 1024>}, {transform_indices = @transform_2, window_bounds = array<i64: 1, 1, 1024>}]} {
    %c0 = arith.constant 0 : index
    %c0_0 = arith.constant 0 : index
    %c0_1 = arith.constant 0 : index
    %c0_2 = arith.constant 0 : index
    %0 = vector.load %arg2[%c0, %c0_0, %c0_1, %c0_2] : memref<1x3x4x1024xf32, #tpu.memory_space<vmem>>, vector<1x3x4x1024xf32>
    %1 = vector.shape_cast %0 : vector<1x3x4x1024xf32> to vector<3x4x1024xf32>
    %2 = vector.extract_strided_slice %1 {offsets = [0, 0, 0], sizes = [3, 3, 1024], strides = [1, 1, 1]} : vector<3x4x1024xf32> to vector<3x3x1024xf32>
    %3 = vector.extract_strided_slice %1 {offsets = [0, 1, 0], sizes = [3, 3, 1024], strides = [1, 1, 1]} : vector<3x4x1024xf32> to vector<3x3x1024xf32>
    %4 = arith.subf %2, %3 : vector<3x3x1024xf32>
    %5 = math.absf %4 : vector<3x3x1024xf32>
    %cst = arith.constant dense<0.000000e+00> : vector<3x1024xf32>
    %6 = vector.multi_reduction <add>, %5, %cst [0] : vector<3x3x1024xf32> to vector<3x1024xf32>
    %cst_3 = arith.constant dense<0.000000e+00> : vector<1024xf32>
    %7 = vector.multi_reduction <add>, %6, %cst_3 [0] : vector<3x1024xf32> to vector<1024xf32>
    %8 = vector.shape_cast %7 : vector<1024xf32> to vector<1x1024xf32>
    %cst_4 = arith.constant 3.000000e+00 : f32
    %9 = vector.broadcast %cst_4 : f32 to vector<1x1024xf32>
    %10 = arith.divf %8, %9 : vector<1x1024xf32>
    %c0_5 = arith.constant 0 : index
    %c0_6 = arith.constant 0 : index
    %c0_7 = arith.constant 0 : index
    %11 = vector.load %arg3[%c0_5, %c0_6, %c0_7] : memref<1x1x1024xf32, #tpu.memory_space<vmem>>, vector<1x1x1024xf32>
    %12 = vector.shape_cast %11 : vector<1x1x1024xf32> to vector<1x1024xf32>
    %13 = vector.shape_cast %10 : vector<1x1024xf32> to vector<1x1x1024xf32>
    tpu.vector_store %arg3[%c0_5, %c0_6, %c0_7], %13 {strides = array<i32>} : memref<1x1x1024xf32, #tpu.memory_space<vmem>>, vector<1x1x1024xf32>,
    %cst_8 = arith.constant dense<0.000000e+00> : vector<3x1024xf32>
    %14 = vector.multi_reduction <add>, %1, %cst_8 [1] : vector<3x4x1024xf32> to vector<3x1024xf32>
    %cst_9 = arith.constant 4.000000e+00 : f32
    %15 = vector.broadcast %cst_9 : f32 to vector<3x1024xf32>
    %16 = arith.divf %14, %15 : vector<3x1024xf32>
    %17 = vector.extract_strided_slice %16 {offsets = [0, 0], sizes = [1, 1024], strides = [1, 1]} : vector<3x1024xf32> to vector<1x1024xf32>
    %18 = vector.extract_strided_slice %16 {offsets = [1, 0], sizes = [1, 1024], strides = [1, 1]} : vector<3x1024xf32> to vector<1x1024xf32>
    %19 = vector.extract_strided_slice %16 {offsets = [2, 0], sizes = [1, 1024], strides = [1, 1]} : vector<3x1024xf32> to vector<1x1024xf32>
    %20 = arith.maximumf %17, %18 : vector<1x1024xf32>
    %21 = arith.maximumf %20, %19 : vector<1x1024xf32>
    %22 = arith.minimumf %17, %18 : vector<1x1024xf32>
    %23 = arith.minimumf %22, %19 : vector<1x1024xf32>
    %24 = arith.subf %21, %23 : vector<1x1024xf32>
    %cst_10 = arith.constant 9.99999993E-9 : f32
    %25 = vector.broadcast %cst_10 : f32 to vector<1x1024xf32>
    %26 = arith.addf %21, %25 : vector<1x1024xf32>
    %27 = arith.divf %24, %26 : vector<1x1024xf32>
    %cst_11 = arith.constant 0.000000e+00 : f32
    %28 = vector.broadcast %cst_11 : f32 to vector<1x1024xf32>
    %29 = arith.cmpf oeq, %24, %28 : vector<1x1024xf32>
    %cst_12 = arith.constant 1.000000e+00 : f32
    %30 = vector.broadcast %cst_12 : f32 to vector<1x1024xf32>
    %31 = arith.select %29, %30, %24 : vector<1x1024xi1>, vector<1x1024xf32>
    %32 = arith.subf %21, %17 : vector<1x1024xf32>
    %33 = arith.subf %21, %18 : vector<1x1024xf32>
    %34 = arith.subf %21, %19 : vector<1x1024xf32>
    %35 = arith.subf %34, %33 : vector<1x1024xf32>
    %36 = arith.divf %35, %31 : vector<1x1024xf32>
    %37 = arith.subf %32, %34 : vector<1x1024xf32>
    %cst_13 = arith.constant 2.000000e+00 : f32
    %38 = vector.broadcast %cst_13 : f32 to vector<1x1024xf32>
    %39 = arith.mulf %38, %31 : vector<1x1024xf32>
    %40 = arith.addf %37, %39 : vector<1x1024xf32>
    %41 = arith.divf %40, %31 : vector<1x1024xf32>
    %42 = arith.subf %33, %32 : vector<1x1024xf32>
    %cst_14 = arith.constant 4.000000e+00 : f32
    %43 = vector.broadcast %cst_14 : f32 to vector<1x1024xf32>
    %44 = arith.mulf %43, %31 : vector<1x1024xf32>
    %45 = arith.addf %42, %44 : vector<1x1024xf32>
    %46 = arith.divf %45, %31 : vector<1x1024xf32>
    %47 = arith.cmpf oeq, %21, %17 : vector<1x1024xf32>
    %48 = arith.cmpf oeq, %21, %18 : vector<1x1024xf32>
    %49 = arith.select %48, %41, %46 : vector<1x1024xi1>, vector<1x1024xf32>
    %50 = arith.select %47, %36, %49 : vector<1x1024xi1>, vector<1x1024xf32>
    %cst_15 = arith.constant 6.000000e+00 : f32
    %51 = vector.broadcast %cst_15 : f32 to vector<1x1024xf32>
    %52 = arith.divf %50, %51 : vector<1x1024xf32>
    %cst_16 = arith.constant 1.000000e+00 : f32
    %53 = vector.broadcast %cst_16 : f32 to vector<1x1024xf32>
    %54 = arith.remf %52, %53 : vector<1x1024xf32>
    %cst_17 = arith.constant 0.000000e+00 : f32
    %55 = vector.broadcast %cst_17 : f32 to vector<1x1024xf32>
    %56 = arith.cmpf one, %54, %55 : vector<1x1024xf32>
    %cst_18 = arith.constant 0.000000e+00 : f32
    %57 = vector.broadcast %cst_18 : f32 to vector<1x1024xf32>
    %58 = arith.cmpf olt, %54, %57 : vector<1x1024xf32>
    %cst_19 = arith.constant 0.000000e+00 : f32
    %59 = arith.cmpf olt, %cst_16, %cst_19 : f32
    %60 = vector.broadcast %59 : i1 to vector<1x1024xi1>
    %61 = vector.broadcast %60 : vector<1x1024xi1> to vector<1x1024xi1>
    %62 = arith.xori %58, %61 : vector<1x1024xi1>
    %63 = arith.andi %62, %56 : vector<1x1024xi1>
    %64 = vector.broadcast %cst_16 : f32 to vector<1x1024xf32>
    %65 = arith.addf %54, %64 : vector<1x1024xf32>
    %66 = arith.select %63, %65, %54 : vector<1x1024xi1>, vector<1x1024xf32>
    %cst_20 = arith.constant 6.28318548 : f32
    %67 = vector.broadcast %cst_20 : f32 to vector<1x1024xf32>
    %68 = arith.mulf %67, %66 : vector<1x1024xf32>
    %cst_21 = arith.constant 6.28318548 : f32
    %69 = vector.broadcast %cst_21 : f32 to vector<1x1024xf32>
    %70 = arith.mulf %68, %69 : vector<1x1024xf32>
    %71 = math.cos %70 : vector<1x1024xf32>
    %72 = arith.mulf %27, %71 : vector<1x1024xf32>
    %cst_22 = arith.constant 1.000000e+00 : f32
    %73 = vector.broadcast %cst_22 : f32 to vector<1x1024xf32>
    %74 = arith.addf %72, %73 : vector<1x1024xf32>
    %cst_23 = arith.constant 2.000000e+00 : f32
    %75 = vector.broadcast %cst_23 : f32 to vector<1x1024xf32>
    %76 = arith.divf %74, %75 : vector<1x1024xf32>
    %77 = math.sin %70 : vector<1x1024xf32>
    %78 = arith.mulf %27, %77 : vector<1x1024xf32>
    %cst_24 = arith.constant 1.000000e+00 : f32
    %79 = vector.broadcast %cst_24 : f32 to vector<1x1024xf32>
    %80 = arith.addf %78, %79 : vector<1x1024xf32>
    %cst_25 = arith.constant 2.000000e+00 : f32
    %81 = vector.broadcast %cst_25 : f32 to vector<1x1024xf32>
    %82 = arith.divf %80, %81 : vector<1x1024xf32>
    %cst_26 = arith.constant 9.000000e+00 : f32
    %83 = vector.broadcast %cst_26 : f32 to vector<1x1024xf32>
    %84 = arith.mulf %76, %83 : vector<1x1024xf32>
    %cst_27 = arith.constant 1.000000e+00 : f32
    %85 = vector.broadcast %cst_27 : f32 to vector<1x1024xf32>
    %86 = arith.addf %84, %85 : vector<1x1024xf32>
    %87 = math.roundeven %86 : vector<1x1024xf32>
    %cst_28 = arith.constant 9.000000e+00 : f32
    %88 = vector.broadcast %cst_28 : f32 to vector<1x1024xf32>
    %89 = arith.mulf %82, %88 : vector<1x1024xf32>
    %cst_29 = arith.constant 1.000000e+00 : f32
    %90 = vector.broadcast %cst_29 : f32 to vector<1x1024xf32>
    %91 = arith.addf %89, %90 : vector<1x1024xf32>
    %92 = math.roundeven %91 : vector<1x1024xf32>
    %cst_30 = arith.constant 9.000000e+00 : f32
    %93 = vector.broadcast %cst_30 : f32 to vector<1x1024xf32>
    %94 = arith.mulf %21, %93 : vector<1x1024xf32>
    %cst_31 = arith.constant 1.000000e+00 : f32
    %95 = vector.broadcast %cst_31 : f32 to vector<1x1024xf32>
    %96 = arith.addf %94, %95 : vector<1x1024xf32>
    %97 = math.roundeven %96 : vector<1x1024xf32>
    %cst_32 = arith.constant 1.000000e+00 : f32
    %98 = vector.broadcast %cst_32 : f32 to vector<1x1024xf32>
    %99 = arith.subf %92, %98 : vector<1x1024xf32>
    %cst_33 = arith.constant 1.000000e+01 : f32
    %100 = vector.broadcast %cst_33 : f32 to vector<1x1024xf32>
    %101 = arith.mulf %99, %100 : vector<1x1024xf32>
    %102 = arith.addf %87, %101 : vector<1x1024xf32>
    %cst_34 = arith.constant 1.000000e+00 : f32
    %103 = vector.broadcast %cst_34 : f32 to vector<1x1024xf32>
    %104 = arith.subf %97, %103 : vector<1x1024xf32>
    %cst_35 = arith.constant 1.000000e+02 : f32
    %105 = vector.broadcast %cst_35 : f32 to vector<1x1024xf32>
    %106 = arith.mulf %104, %105 : vector<1x1024xf32>
    %107 = arith.addf %102, %106 : vector<1x1024xf32>
    %108 = arith.fptosi %107 : vector<1x1024xf32> to vector<1x1024xi32>
    %c0_36 = arith.constant 0 : index
    %c0_37 = arith.constant 0 : index
    %c0_38 = arith.constant 0 : index
    %109 = vector.load %arg4[%c0_36, %c0_37, %c0_38] : memref<1x1x1024xi32, #tpu.memory_space<vmem>>, vector<1x1x1024xi32>
    %110 = vector.shape_cast %109 : vector<1x1x1024xi32> to vector<1x1024xi32>
    %111 = vector.shape_cast %108 : vector<1x1024xi32> to vector<1x1x1024xi32>
    tpu.vector_store %arg4[%c0_36, %c0_37, %c0_38], %111 {strides = array<i32>} : memref<1x1x1024xi32, #tpu.memory_space<vmem>>, vector<1x1x1024xi32>,
    return
  }
  func.func @transform_0(%arg0: i32, %arg1: i32) -> (i32, i32, i32, i32) {
    %c0_i32 = arith.constant 0 : i32
    %c0_i32_0 = arith.constant 0 : i32
    %c0_i32_1 = arith.constant 0 : i32
    return %arg0, %c0_i32, %c0_i32_0, %arg1 : i32, i32, i32, i32
  }
  func.func @transform_1(%arg0: i32, %arg1: i32) -> (i32, i32, i32) {
    %c0_i32 = arith.constant 0 : i32
    %c0_i32_0 = arith.constant 0 : i32
    return %arg0, %c0_i32, %arg1 : i32, i32, i32
  }
  func.func @transform_2(%arg0: i32, %arg1: i32) -> (i32, i32, i32) {
    %c0_i32 = arith.constant 0 : i32
    %c0_i32_0 = arith.constant 0 : i32
    return %arg0, %c0_i32, %arg1 : i32, i32, i32
  }
}

</mosaic_0001>

<bundles_post_ra>
// kernel: tpu_custom_call.1
= control target key start
LH: loop header
LB: loop body
LE: loop exit
PB: predicated region body
PF: predicated region fallthrough
CT: control target
= control target key end

     0   :  { %8 = vsyncpa [#allocation3], 0  ;;  %s6178_s0 = inlined_call_operand.hbm [shape: f32[2,3,4,1024], index: 0, kind: input, shape index: {}]   ;;  %s6179_s1 = inlined_call_operand.hbm [shape: f32[2,1,1024], index: 1, kind: output, shape index: {0}]   ;;  %s6180_s2 = inlined_call_operand.hbm [shape: s32[2,1,1024], index: 2, kind: output, shape index: {1}]  }
   0x1   :  { %10 = vsyncpa [#allocation3 + $0x1], 0 }
   0x2   :  { %11 = vsyncpa [#allocation4], 0 }
   0x3   :  { %13 = vsyncpa [#allocation4 + $0x1], 0 }
   0x4   :  { %14 = vsyncpa [#allocation7], 0 }
   0x5   :  { %16 = vsyncpa [#allocation7 + $0x1], 0  ;;  %s3780_s9 = smov 0   ;;  %s3782_s10 = smov 0  }
   0x6   :  { %s3784_s11 = smov 0   ;;  %s3786_s12 = smov 0  }
   0x7   :  { %s3788_s13 = smov 0   ;;  %s3790_s14 = smov 0  }
   0x8 LB: > { %s3108_s15 = sadd.s32 4294967295, %s3751_s14   ;;  %s3109_s16 = sadd.s32 4294967294, %s3751_s14   ;;  %s3751_s14 = sphi %s3790_s14, %s22_s14   ;;  %s3747_s13 = sphi %s3788_s13, %s6545_s13   ;;  %s3743_s12 = sphi %s3786_s12, %s6544_s12   ;;  %s3739_s11 = sphi %s3784_s11, %s6543_s11   ;;  %s3735_s10 = sphi %s3782_s10, %s6542_s10   ;;  %s3731_s9 = sphi %s3780_s9, %s6541_s9  }
   0x9   : > { %s34_s17 = sadd.s32 1, %s3747_s13  ;;  %s43_s18 = sadd.s32 1, %s3739_s11 }
   0xa   : > { %p36_p0 = scmp.ge.s32.totalorder %s34_s17, 2  ;;  %p50_p1 = scmp.ne.s32.totalorder %s3739_s11, %s3735_s10 }
   0xb   : > { %p51_p2 = scmp.eq.s32.totalorder %s3751_s14, 0  ;;  %p56_p3 = scmp.ne.s32.totalorder %s3735_s10, %s3731_s9 }
   0xc   : > { %s6547_s17 = smov (%p36_p0, %s34_s17), 0  ;;  %p57_p5 = scmp.eq.s32.totalorder %s3108_s15, 0 }
   0xd   : > { %p3821_p4 = por %p51_p2, %p50_p1  ;;  %s38_s20 = ssub.s32 %s3747_s13, %s6547_s17 }
   0xe   : > { %p82_p6 = scmp.eq.s32.totalorder %s3108_s15, 1  ;;  %p41_p7 = scmp.eq.s32.totalorder %s38_s20, 0 }
   0xf   : > { %p3827_p8 = por %p57_p5, %p56_p3  ;;  %p88_p10 = scmp.eq.s32.totalorder %s3109_s16, 1 }
  0x10   : > { %p3831_p9 = por %p82_p6, %p50_p1  ;;  %p3478_p13 = scmp.lt.s32.totalorder %s3751_s14, 2 }
  0x11   : > { %s3836_s23 = scalar_select %p41_p7, %s3739_s11, %s43_s18  }
  0x12   : > { %p3838_p11 = por %p88_p10, %p56_p3  ;;  %s136_s25 = sand.u32 1, %s3739_s11  }
  0x13   : > { %s3218_s26 = smul.u32 96, %s136_s25  ;;  %p3848_p0 = pnand %p3478_p13, %p3821_p4 }
  0x14   : > { %s3219_s27 = smul.u32 1536, %s3747_s13  ;;  %p3113_p1 = scmp.ge.s32.totalorder %s3751_s14, 1 }
  0x15   : > { %s140_s4 = scalar_lea.vmem [#allocation2], %s3218_s26  ;;  %s137_s6 = scalar_lea.sflag [#allocation3], %s136_s25 }
  0x16   : > { %s148_s3 = scalar_lea.hbm %s6178_s0, %s3219_s27  ;;  %s149_s5 = sshll.u32 %s140_s4, 4  ;;  %s150_s5 = int_to_ptr.vmem [resolvable:$true] %s149_s5 }
  0x17   : > { %p3615_p2 = pneg %p3848_p0  ;;  %s3626_s7 = scalar_lea.vmem %s150_s5, 1536 }
  0x18   : > { %p3627_p3 = scmp.ne.s32.totalorder %s150_s5, %s3626_s7  ;;  %s3753_s8 = smov [#allocation2]  }
  0x19   : > { %s3631_s15 = sshll.u32 %s3753_s8, 4  ;;  %s3632_s15 = int_to_ptr.vmem [resolvable:$false] %s3631_s15 }
  0x1a   : > { %p3629_p5 = pnand %p3627_p3, %p3615_p2  ;;  %s3633_s16 = scalar_lea.vmem %s3632_s15, 3072 }
  0x1b   : > { %p3634_p4 = scmp.lt.s32.totalorder %s150_s5, %s3632_s15  ;;  %p3635_p7 = scmp.lt.s32.totalorder %s3633_s16, %s3626_s7 }
  0x1c   : > { %p3630_p6 = pneg %p3629_p5 }
  0x1d   : > { %p3636_p10 = por %p3635_p7, %p3634_p4 }
  0x1f   : > { %p3637_p13 = pnand %p3636_p10, %p3630_p6 }
  0x21   : > { %3640 = shalt.err (!%p3637_p13)
}
  0x22   : > { %s3754_s18 = smov 512   ;;  %s3755_s19 = smov 32  }
  0x23   : > { %3470 = dma.hbm_to_vmem [thread:$0]  (!%p3848_p0), %s148_s3, 1536, %s150_s5, %s137_s6, %s3754_s18, %s3754_s18, %s3755_s19  }
  0x24   : > { %p157_p12 = scmp.lt.s32.totalorder %s3751_s14, 3 }
  0x26   : > { %p158_p2 = pnand %p3113_p1, %p157_p12 }
  0x28   : > { %161 = sbr.rel (%p158_p2) target bundleno = 579 (0x243), region = 24 }
  0x2d   : > { %s3864_s20 = sand.u32 1, %s3735_s10  }
  0x2e   : > { %s3220_s25 = smul.u32 96, %s3864_s20  ;;  %s164_s26 = scalar_lea.sflag [#allocation3], %s3864_s20 }
  0x30   : > { %s167_s27 = scalar_lea.vmem [#allocation2], %s3220_s25 }
  0x31   : > { %3718 = dma.done.wait (%p3827_p8), %s164_s26, 1536  }
  0x32   : > { %3720 = vsyncadd (%p3827_p8), %s164_s26, 4294965760  ;;  %v437_v0 = vlaneseq  ;;  %v3872_v1 = vld [vmem:[%s167_s27] sm:$0xff]  ;;  %v3874_v2 = vld [vmem:[%s167_s27 + $0x8] sm:$0xff]  ;;  %vm316_vm0 = vcmask 1042432   ;;  %v3756_v17 = vmov 1966171168  }
  0x33   : > { %v3876_v3 = vld [vmem:[%s167_s27 + $0x10] sm:$0xff]  ;;  %v3880_v5 = vld [vmem:[%s167_s27 + $0x18] sm:$0xff]  ;;  %v3882_v6 = vld [vmem:[%s167_s27 + $0x20] sm:$0xff]  ;;  %v3116_v8 = vrot.slane %v3872_v1, 9  ;;  %v3117_v9 = vrot.slane %v3874_v2, 9  ;;  %v3898_v18 = vunpack.c.l.s4 %v3756_v17  ;;  %vm505_vm1 = vcmask 1043456  }
  0x34   : > { %v3878_v4 = vshrl.u32 %v437_v0, 7  ;;  %v3884_v7 = vld [vmem:[%s167_s27 + $0x28] sm:$0xff]  ;;  %v3118_v10 = vrot.slane %v3876_v3, 9  ;;  %v3889_v11 = vld [vmem:[%s167_s27 + $0x30] sm:$0xff]  ;;  %v3891_v12 = vld [vmem:[%s167_s27 + $0x38] sm:$0xff]  ;;  %v3119_v14 = vrot.slane %v3880_v5, 9 }
  0x35   : > { %v3893_v13 = vld [vmem:[%s167_s27 + $0x40] sm:$0xff]  ;;  %v3120_v15 = vrot.slane %v3882_v6, 9  ;;  %v3121_v16 = vrot.slane %v3884_v7, 9  ;;  %v3900_v19 = vld [vmem:[%s167_s27 + $0x48] sm:$0xff]  ;;  %v3902_v20 = vld [vmem:[%s167_s27 + $0x50] sm:$0xff]  ;;  %v3122_v22 = vrot.slane %v3889_v11, 9  ;;  %v256_v25 = vsub.f32 %v3872_v1, %v3116_v8 }
  0x36   : > { %v3904_v21 = vld [vmem:[%s167_s27 + $0x58] sm:$0xff]  ;;  %v3123_v23 = vrot.slane %v3891_v12, 9  ;;  %v3124_v24 = vrot.slane %v3893_v13, 9  ;;  %v3125_v26 = vrot.slane %v3900_v19, 9  ;;  %v3126_v27 = vrot.slane %v3902_v20, 9  ;;  %s3114_s21 = sshll.u32 %s3864_s20, 3 }
  0x37   : > { %v3127_v28 = vrot.slane %v3904_v21, 9  ;;  %v257_v29 = vsub.f32 %v3874_v2, %v3117_v9  ;;  %v258_v30 = vsub.f32 %v3876_v3, %v3118_v10  ;;  %v259_v31 = vsub.f32 %v3880_v5, %v3119_v14  ;;  %s4000_s28 = scalar_lea.vmem [#allocation5], %s3114_s21  ;;  %s3216_s29 = sshll.u32 %s3743_s12, 7 }
  0x38   : > { %v260_v32 = vsub.f32 %v3882_v6, %v3120_v15  ;;  %v261_v33 = vsub.f32 %v3884_v7, %v3121_v16  ;;  %v262_v34 = vsub.f32 %v3889_v11, %v3122_v22  ;;  %v263_v35 = vsub.f32 %v3891_v12, %v3123_v23  ;;  %s2973_s30 = sshll.u32 %s4000_s28, 4  ;;  %s5474_s5 = scalar_lea.hbm %s6179_s1, %s3216_s29  ;;  %s5476_s30 = int_to_ptr.vmem [resolvable:$true] %s2973_s30 }
  0x39   : > { %v264_v36 = vsub.f32 %v3893_v13, %v3124_v24  ;;  %v265_v37 = vsub.f32 %v3900_v19, %v3125_v26  ;;  %v266_v38 = vsub.f32 %v3902_v20, %v3126_v27  ;;  %v267_v39 = vsub.f32 %v3904_v21, %v3127_v28  ;;  %s2952_s6 = scalar_lea.sflag [#allocation4], %s3864_s20  ;;  %s3641_s7 = scalar_lea.vmem %s5476_s30, 128 }
  0x3a   : > { %v268_v40 = vand.u32 2147483647, %v256_v25  ;;  %v269_v41 = vand.u32 2147483647, %v257_v29  ;;  %v270_v42 = vand.u32 2147483647, %v258_v30  ;;  %v436_v45 = vunpack.c.0.s8 %v3898_v18  ;;  %p3642_p8 = scmp.ne.s32.totalorder %s5476_s30, %s3641_s7 }
  0x3b   : > { %v271_v43 = vand.u32 2147483647, %v259_v31  ;;  %v272_v44 = vand.u32 2147483647, %v260_v32  ;;  %v273_v46 = vand.u32 2147483647, %v261_v33  ;;  %v483_v18 = vcombine.high %v3876_v3, %v3876_v3 }
  0x3c   : > { %v274_v47 = vand.u32 2147483647, %v262_v34  ;;  %v275_v48 = vand.u32 2147483647, %v263_v35  ;;  %v292_v49 = vcombine.high %v268_v40, %v268_v40  ;;  %v276_v50 = vand.u32 2147483647, %v264_v36  ;;  %p3643_p12 = pnand %p3642_p8, %p3831_p9 }
  0x3d   : > { %v277_v51 = vand.u32 2147483647, %v265_v37  ;;  %v278_v52 = vand.u32 2147483647, %v266_v38  ;;  %v293_v53 = vcombine.high %v269_v41, %v269_v41  ;;  %v279_v54 = vand.u32 2147483647, %v267_v39 }
  0x3e   : > { %v294_v55 = vcombine.high %v270_v42, %v270_v42  ;;  %v295_v56 = vcombine.high %v271_v43, %v271_v43  ;;  %v296_v57 = vcombine.high %v272_v44, %v272_v44  ;;  %v297_v58 = vcombine.high %v273_v46, %v273_v46  ;;  %p3644_p0 = pneg %p3643_p12  ;;  %s3763_s8 = smov [#allocation5]  }
  0x3f   : > { %v298_v59 = vcombine.high %v274_v47, %v274_v47  ;;  %v299_v60 = vcombine.high %v275_v48, %v275_v48  ;;  %v300_v61 = vcombine.high %v276_v50, %v276_v50  ;;  %v301_v62 = vcombine.high %v277_v51, %v277_v51  ;;  %s3645_s15 = sshll.u32 %s3763_s8, 4  ;;  %s3646_s15 = int_to_ptr.vmem [resolvable:$false] %s3645_s15 }
  0x40   : > { %v302_v63 = vcombine.high %v278_v52, %v278_v52  ;;  %v303_v0 = vcombine.high %v279_v54, %v279_v54  ;;  %v317_v8 = vsel %vm316_vm0, %v268_v40, 0.0  ;;  %v318_v9 = vsel %vm316_vm0, %v272_v44, 0.0  ;;  %s3647_s16 = scalar_lea.vmem %s3646_s15, 256  ;;  %p3648_p1 = scmp.lt.s32.totalorder %s5476_s30, %s3646_s15 }
  0x41   : > { %v320_v10 = vsel %vm316_vm0, %v276_v50, 0.0  ;;  %v322_v14 = vsel %vm316_vm0, %v292_v49, 0.0  ;;  %v323_v15 = vsel %vm316_vm0, %v296_v57, 0.0  ;;  %v319_v16 = vadd.f32 %v318_v9, %v317_v8  ;;  %p3649_p3 = scmp.lt.s32.totalorder %s3647_s16, %s3641_s7 }
  0x42   : > { %v324_v17 = vadd.f32 %v323_v15, %v322_v14  ;;  %v325_v22 = vsel %vm316_vm0, %v300_v61, 0.0  ;;  %v327_v23 = vsel %vm316_vm0, %v269_v41, 0.0  ;;  %v328_v24 = vsel %vm316_vm0, %v273_v46, 0.0 }
  0x43   : > { %v330_v25 = vsel %vm316_vm0, %v277_v51, 0.0  ;;  %v332_v26 = vsel %vm316_vm0, %v293_v53, 0.0  ;;  %v333_v27 = vsel %vm316_vm0, %v297_v58, 0.0  ;;  %v321_v28 = vadd.f32 %v320_v10, %v319_v16  ;;  %p3650_p5 = por %p3649_p3, %p3648_p1 }
  0x44   : > { %v326_v29 = vadd.f32 %v325_v22, %v324_v17  ;;  %v329_v30 = vadd.f32 %v328_v24, %v327_v23  ;;  %v334_v31 = vadd.f32 %v333_v27, %v332_v26  ;;  %v335_v32 = vsel %vm316_vm0, %v301_v62, 0.0 }
  0x45   : > { %v337_v33 = vsel %vm316_vm0, %v270_v42, 0.0  ;;  %v338_v34 = vsel %vm316_vm0, %v274_v47, 0.0  ;;  %v340_v35 = vsel %vm316_vm0, %v278_v52, 0.0  ;;  %v342_v39 = vsel %vm316_vm0, %v294_v55, 0.0  ;;  %p3651_p6 = pnand %p3650_p5, %p3644_p0 }
  0x46   : > { %v331_v36 = vadd.f32 %v330_v25, %v329_v30  ;;  %v336_v37 = vadd.f32 %v335_v32, %v334_v31  ;;  %v339_v38 = vadd.f32 %v338_v34, %v337_v33  ;;  %v343_v40 = vsel %vm316_vm0, %v298_v59, 0.0 }
  0x47   : > { %v345_v41 = vsel %vm316_vm0, %v302_v63, 0.0  ;;  %v347_v44 = vsel %vm316_vm0, %v271_v43, 0.0  ;;  %v348_v46 = vsel %vm316_vm0, %v275_v48, 0.0  ;;  %v344_v50 = vadd.f32 %v343_v40, %v342_v39 }
  0x48   : > { %v341_v49 = vadd.f32 %v340_v35, %v339_v38  ;;  %v349_v42 = vadd.f32 %v348_v46, %v347_v44  ;;  %v350_v47 = vsel %vm316_vm0, %v279_v54, 0.0  ;;  %v352_v51 = vsel %vm316_vm0, %v295_v56, 0.0 }
  0x49   : > { %v353_v52 = vsel %vm316_vm0, %v299_v60, 0.0  ;;  %v355_v53 = vsel %vm316_vm0, %v303_v0, 0.0  ;;  %v357_v55 = vsel %vm316_vm0, %v321_v28, 0.0  ;;  %v346_v57 = vadd.f32 %v345_v41, %v344_v50 }
  0x4a   : > { %v351_v58 = vadd.f32 %v350_v47, %v349_v42  ;;  %v354_v59 = vadd.f32 %v353_v52, %v352_v51  ;;  %v358_v61 = vrot.slane %v357_v55, 4  ;;  %v364_v43 = vsel %vm316_vm0, %v326_v29, 0.0 }
  0x4b   : > { %v371_v48 = vsel %vm316_vm0, %v331_v36, 0.0  ;;  %v378_v62 = vsel %vm316_vm0, %v336_v37, 0.0  ;;  %v385_v54 = vsel %vm316_vm0, %v341_v49, 0.0  ;;  %v365_v8 = vrot.slane %v364_v43, 4 }
  0x4c   : > { %v356_v63 = vadd.f32 %v355_v53, %v354_v59  ;;  %v359_v56 = vadd.f32 %v358_v61, %v357_v55  ;;  %v372_v60 = vrot.slane %v371_v48, 4  ;;  %v379_v9 = vrot.slane %v378_v62, 4 }
  0x4d   : > { %v386_v0 = vrot.slane %v385_v54, 4  ;;  %v392_v10 = vsel %vm316_vm0, %v346_v57, 0.0  ;;  %v399_v14 = vsel %vm316_vm0, %v351_v58, 0.0  ;;  %v366_v16 = vadd.f32 %v365_v8, %v364_v43 }
  0x4e   : > { %v360_v15 = vrot.slane %v359_v56, 2  ;;  %v373_v17 = vadd.f32 %v372_v60, %v371_v48  ;;  %v393_v22 = vrot.slane %v392_v10, 4  ;;  %v380_v23 = vadd.f32 %v379_v9, %v378_v62 }
  0x4f   : > { %v387_v24 = vadd.f32 %v386_v0, %v385_v54  ;;  %v400_v25 = vrot.slane %v399_v14, 4  ;;  %v406_v26 = vsel %vm316_vm0, %v356_v63, 0.0  ;;  %v367_v28 = vrot.slane %v366_v16, 2 }
  0x50   : > { %v361_v27 = vadd.f32 %v360_v15, %v359_v56  ;;  %v374_v29 = vrot.slane %v373_v17, 2  ;;  %v394_v30 = vadd.f32 %v393_v22, %v392_v10  ;;  %v381_v31 = vrot.slane %v380_v23, 2 }
  0x51   : > { %v388_v32 = vrot.slane %v387_v24, 2  ;;  %v401_v33 = vadd.f32 %v400_v25, %v399_v14  ;;  %v407_v34 = vrot.slane %v406_v26, 4  ;;  %v368_v36 = vadd.f32 %v367_v28, %v366_v16 }
  0x52   : > { %v362_v35 = vrot.slane %v361_v27, 1  ;;  %v375_v37 = vadd.f32 %v374_v29, %v373_v17  ;;  %v395_v38 = vrot.slane %v394_v30, 2  ;;  %v382_v39 = vadd.f32 %v381_v31, %v380_v23 }
  0x53   : > { %v389_v40 = vadd.f32 %v388_v32, %v387_v24  ;;  %v402_v41 = vrot.slane %v401_v33, 2  ;;  %v408_v44 = vadd.f32 %v407_v34, %v406_v26  ;;  %v369_v49 = vrot.slane %v368_v36, 1 }
  0x54   : > { %v363_v46 = vadd.f32 %v362_v35, %v361_v27  ;;  %v376_v50 = vrot.slane %v375_v37, 1  ;;  %v396_v42 = vadd.f32 %v395_v38, %v394_v30  ;;  %v383_v47 = vrot.slane %v382_v39, 1 }
  0x55   : > { %v390_v51 = vrot.slane %v389_v40, 1  ;;  %v403_v52 = vadd.f32 %v402_v41, %v401_v33  ;;  %v409_v53 = vrot.slane %v408_v44, 2  ;;  %v370_v55 = vadd.f32 %v369_v49, %v368_v36 }
  0x56   : > { %v377_v57 = vadd.f32 %v376_v50, %v375_v37  ;;  %v397_v58 = vrot.slane %v396_v42, 1  ;;  %v414_v59 = vmul.f32 0.33333334, %v363_v46  ;;  %v384_v61 = vadd.f32 %v383_v47, %v382_v39 }
  0x57   : > { %v391_v43 = vadd.f32 %v390_v51, %v389_v40  ;;  %v404_v48 = vrot.slane %v403_v52, 1  ;;  %v410_v62 = vadd.f32 %v409_v53, %v408_v44  ;;  %v415_v63 = vmul.f32 0.33333334, %v370_v55 }
  0x58   : > { %v398_v54 = vadd.f32 %v397_v58, %v396_v42  ;;  %v416_v56 = vmul.f32 0.33333334, %v377_v57  ;;  %v3960_v8 = vsub.s32 %v436_v45, %v3878_v4  ;;  %v417_v0 = vmul.f32 0.33333334, %v384_v61 }
  0x59   : > { %v405_v60 = vadd.f32 %v404_v48, %v403_v52  ;;  %v411_v9 = vrot.slane %v410_v62, 1  ;;  %v418_v10 = vmul.f32 0.33333334, %v391_v43  ;;  %v430_v15 = vcombine.low %v414_v59, %v415_v63 }
  0x5a   : > { %6290 = vst [vmem:[#allocation11_spill] sm:$0xff] %v3960_v8  ;;  %v419_v14 = vmul.f32 0.33333334, %v398_v54  ;;  %v481_v16 = vcombine.high %v3872_v1, %v3872_v1  ;;  %v431_v23 = vcombine.low %v416_v56, %v417_v0  ;;  %v482_v4 = vcombine.high %v3874_v2, %v3874_v2 }
  0x5b   : > { %v412_v17 = vadd.f32 %v411_v9, %v410_v62  ;;  %v420_v22 = vmul.f32 0.33333334, %v405_v60  ;;  %v440_v25 = vrot.slane %v430_v15, %v3960_v8  ;;  %v484_v27 = vcombine.high %v3880_v5, %v3880_v5 }
  0x5c   : > { %v432_v24 = vcombine.low %v418_v10, %v419_v14  ;;  %v447_v26 = vrot.slane %v431_v23, %v3960_v8  ;;  %v485_v28 = vcombine.high %v3882_v6, %v3882_v6  ;;  %v486_v30 = vcombine.high %v3884_v7, %v3884_v7 }
  0x5d   : > { %v421_v45 = vmul.f32 0.33333334, %v412_v17  ;;  %v506_v31 = vsel %vm505_vm1, %v3872_v1, 0.0  ;;  %v513_v32 = vsel %vm505_vm1, %v481_v16, 0.0  ;;  %v520_v37 = vsel %vm505_vm1, %v3874_v2, 0.0 }
  0x5e   : > { %v454_v29 = vrot.slane %v432_v24, %v3960_v8  ;;  %v462_v34 = vcombine.low %v440_v25, %v447_v26  ;;  %v507_v35 = vrot.slane %v506_v31, 4  ;;  %v514_v36 = vrot.slane %v513_v32, 4 }
  0x5f   : > { %v433_v33 = vcombine.low %v420_v22, %v421_v45  ;;  %v527_v38 = vsel %vm505_vm1, %v482_v4, 0.0  ;;  %v534_v39 = vsel %vm505_vm1, %v3876_v3, 0.0  ;;  %v541_v40 = vsel %vm505_vm1, %v483_v18, 0.0 }
  0x60   : > { %v470_v1 = vrot.slane %v462_v34, %v3960_v8  ;;  %v508_v44 = vadd.f32 %v507_v35, %v506_v31  ;;  %v515_v46 = vadd.f32 %v514_v36, %v513_v32  ;;  %v521_v49 = vrot.slane %v520_v37, 4 }
  0x61   : > { %v461_v41 = vrot.slane %v433_v33, %v3960_v8  ;;  %v528_v50 = vrot.slane %v527_v38, 4  ;;  %v535_v42 = vrot.slane %v534_v39, 4  ;;  %v542_v47 = vrot.slane %v541_v40, 4 }
  0x62   : > { %v509_v2 = vrot.slane %v508_v44, 2  ;;  %v516_v52 = vrot.slane %v515_v46, 2  ;;  %v548_v53 = vsel %vm505_vm1, %v3880_v5, 0.0  ;;  %v522_v3 = vadd.f32 %v521_v49, %v520_v37 }
  0x63   : > { %v463_v51 = vcombine.low %v454_v29, %v461_v41  ;;  %v529_v55 = vadd.f32 %v528_v50, %v527_v38  ;;  %v536_v57 = vadd.f32 %v535_v42, %v534_v39  ;;  %v543_v58 = vadd.f32 %v542_v47, %v541_v40 }
  0x64   : > { %v510_v61 = vadd.f32 %v509_v2, %v508_v44  ;;  %v3992_v43 = vadd.f32 %v516_v52, %v515_v46  ;;  %v549_v48 = vrot.slane %v548_v53, 4  ;;  %v523_v62 = vrot.slane %v522_v3, 2 }
  0x65   : > { %v477_v59 = vrot.slane %v463_v51, %v3960_v8  ;;  %v530_v54 = vrot.slane %v529_v55, 2  ;;  %v537_v63 = vrot.slane %v536_v57, 2  ;;  %v544_v56 = vrot.slane %v543_v58, 2 }
  0x66   : > { %v487_v9 = vcombine.high %v3889_v11, %v3889_v11  ;;  %v488_v5 = vcombine.high %v3891_v12, %v3891_v12  ;;  %v550_v0 = vadd.f32 %v549_v48, %v548_v53  ;;  %v511_v10 = vrot.slane %v510_v61, 1 }
  0x67   : > { %v478_v60 = vcombine.low %v470_v1, %v477_v59  ;;  %v524_v14 = vadd.f32 %v523_v62, %v522_v3  ;;  %v531_v15 = vadd.f32 %v530_v54, %v529_v55  ;;  %v538_v16 = vadd.f32 %v537_v63, %v536_v57 }
  0x68   : > { %v489_v17 = vcombine.high %v3893_v13, %v3893_v13  ;;  %v545_v22 = vadd.f32 %v544_v56, %v543_v58  ;;  %v551_v23 = vrot.slane %v550_v0, 2  ;;  %v555_v24 = vsel %vm505_vm1, %v484_v27, 0.0 }
  0x69   : > { %480 = vst [vmem:[%s4000_s28] sm:$0xff] %v478_v60  ;;  %v490_v25 = vcombine.high %v3900_v19, %v3900_v19  ;;  %v491_v4 = vcombine.high %v3902_v20, %v3902_v20  ;;  %v492_v18 = vcombine.high %v3904_v21, %v3904_v21  ;;  %v518_v45 = vrot.slane %v3992_v43, 1 }
  0x6a   : > { %v552_v26 = vadd.f32 %v551_v23, %v550_v0  ;;  %v556_v29 = vrot.slane %v555_v24, 4  ;;  %v562_v31 = vsel %vm505_vm1, %v3882_v6, 0.0  ;;  %v569_v32 = vsel %vm505_vm1, %v485_v28, 0.0 }
  0x6b   : > { %v4016_v33 = vadd.f32 %v511_v10, %v510_v61  ;;  %v525_v27 = vrot.slane %v524_v14, 1  ;;  %v532_v34 = vrot.slane %v531_v15, 1  ;;  %v539_v35 = vrot.slane %v538_v16, 1 }
  0x6c   : > { %v546_v36 = vrot.slane %v545_v22, 1  ;;  %v557_v37 = vadd.f32 %v556_v29, %v555_v24  ;;  %v563_v38 = vrot.slane %v562_v31, 4  ;;  %v570_v39 = vrot.slane %v569_v32, 4 }
  0x6d   : > { %v576_v40 = vsel %vm505_vm1, %v3884_v7, 0.0  ;;  %v583_v41 = vsel %vm505_vm1, %v486_v30, 0.0  ;;  %v590_v6 = vsel %vm505_vm1, %v3889_v11, 0.0  ;;  %v597_v28 = vsel %vm505_vm1, %v487_v9, 0.0 }
  0x6e   : > { %v553_v1 = vrot.slane %v552_v26, 1  ;;  %v558_v44 = vrot.slane %v557_v37, 2  ;;  %v564_v46 = vadd.f32 %v563_v38, %v562_v31  ;;  %v571_v49 = vadd.f32 %v570_v39, %v569_v32 }
  0x6f   : > { %v577_v50 = vrot.slane %v576_v40, 4  ;;  %v584_v42 = vrot.slane %v583_v41, 4  ;;  %v591_v47 = vrot.slane %v590_v6, 4  ;;  %v598_v51 = vrot.slane %v597_v28, 4 }
  0x70   : > { %v559_v2 = vadd.f32 %v558_v44, %v557_v37  ;;  %v565_v52 = vrot.slane %v564_v46, 2  ;;  %v572_v53 = vrot.slane %v571_v49, 2  ;;  %v604_v7 = vsel %vm505_vm1, %v3891_v12, 0.0 }
  0x71   : > { %v578_v30 = vadd.f32 %v577_v50, %v576_v40  ;;  %v585_v3 = vadd.f32 %v584_v42, %v583_v41  ;;  %v592_v55 = vadd.f32 %v591_v47, %v590_v6  ;;  %v599_v11 = vadd.f32 %v598_v51, %v597_v28 }
  0x72   : > { %v560_v57 = vrot.slane %v559_v2, 1  ;;  %v566_v58 = vadd.f32 %v565_v52, %v564_v46  ;;  %v573_v59 = vadd.f32 %v572_v53, %v571_v49  ;;  %v605_v61 = vrot.slane %v604_v7, 4 }
  0x73   : > { %v579_v48 = vrot.slane %v578_v30, 2  ;;  %v586_v62 = vrot.slane %v585_v3, 2  ;;  %v593_v54 = vrot.slane %v592_v55, 2  ;;  %v600_v63 = vrot.slane %v599_v11, 2 }
  0x74   : > { %v4030_v56 = vadd.f32 %v518_v45, %v3992_v43  ;;  %v4032_v60 = vadd.f32 %v525_v27, %v524_v14  ;;  %v4034_v9 = vadd.f32 %v532_v34, %v531_v15  ;;  %v606_v0 = vadd.f32 %v605_v61, %v604_v7 }
  0x75   : > { %v567_v10 = vrot.slane %v566_v58, 1  ;;  %v580_v23 = vadd.f32 %v579_v48, %v578_v30  ;;  %v587_v24 = vadd.f32 %v586_v62, %v585_v3  ;;  %v594_v29 = vadd.f32 %v593_v54, %v592_v55 }
  0x76   : > { %v4036_v31 = vadd.f32 %v539_v35, %v538_v16  ;;  %v601_v32 = vadd.f32 %v600_v63, %v599_v11  ;;  %v607_v37 = vrot.slane %v606_v0, 2  ;;  %v611_v38 = vsel %vm505_vm1, %v488_v5, 0.0 }
  0x77   : > { %v4042_v43 = vadd.f32 %v546_v36, %v545_v22  ;;  %v4044_v14 = vadd.f32 %v553_v1, %v552_v26  ;;  %v4046_v15 = vadd.f32 %v560_v57, %v559_v2  ;;  %v574_v45 = vrot.slane %v573_v59, 1 }
  0x78   : > { %v608_v27 = vadd.f32 %v607_v37, %v606_v0  ;;  %v612_v34 = vrot.slane %v611_v38, 4  ;;  %v618_v16 = vsel %vm505_vm1, %v3893_v13, 0.0  ;;  %v625_v35 = vsel %vm505_vm1, %v489_v17, 0.0 }
  0x79   : > { %v4054_v12 = vadd.f32 %v567_v10, %v566_v58  ;;  %v581_v5 = vrot.slane %v580_v23, 1  ;;  %v588_v22 = vrot.slane %v587_v24, 1  ;;  %v595_v36 = vrot.slane %v594_v29, 1 }
  0x7a   : > { %v602_v26 = vrot.slane %v601_v32, 1  ;;  %v613_v39 = vadd.f32 %v612_v34, %v611_v38  ;;  %v619_v40 = vrot.slane %v618_v16, 4  ;;  %v626_v41 = vrot.slane %v625_v35, 4 }
  0x7b   : > { %v632_v6 = vsel %vm505_vm1, %v3900_v19, 0.0  ;;  %v639_v28 = vsel %vm505_vm1, %v490_v25, 0.0  ;;  %v646_v13 = vsel %vm505_vm1, %v3902_v20, 0.0  ;;  %v653_v17 = vsel %vm505_vm1, %v491_v4, 0.0 }
  0x7c   : > { %v609_v1 = vrot.slane %v608_v27, 1  ;;  %v614_v44 = vrot.slane %v613_v39, 2  ;;  %v620_v46 = vadd.f32 %v619_v40, %v618_v16  ;;  %v627_v49 = vadd.f32 %v626_v41, %v625_v35 }
  0x7d   : > { %v633_v50 = vrot.slane %v632_v6, 4  ;;  %v640_v42 = vrot.slane %v639_v28, 4  ;;  %v647_v47 = vrot.slane %v646_v13, 4  ;;  %v654_v51 = vrot.slane %v653_v17, 4 }
  0x7e   : > { %v615_v2 = vadd.f32 %v614_v44, %v613_v39  ;;  %v621_v19 = vrot.slane %v620_v46, 2  ;;  %v628_v52 = vrot.slane %v627_v49, 2  ;;  %v660_v25 = vsel %vm505_vm1, %v3904_v21, 0.0 }
  0x7f   : > { %v634_v53 = vadd.f32 %v633_v50, %v632_v6  ;;  %v641_v7 = vadd.f32 %v640_v42, %v639_v28  ;;  %v648_v30 = vadd.f32 %v647_v47, %v646_v13  ;;  %v655_v20 = vadd.f32 %v654_v51, %v653_v17 }
  0x80   : > { %v616_v3 = vrot.slane %v615_v2, 1  ;;  %v622_v4 = vadd.f32 %v621_v19, %v620_v46  ;;  %v629_v55 = vadd.f32 %v628_v52, %v627_v49  ;;  %v661_v11 = vrot.slane %v660_v25, 4 }
  0x81   : > { %v635_v57 = vrot.slane %v634_v53, 2  ;;  %v642_v58 = vrot.slane %v641_v7, 2  ;;  %v649_v61 = vrot.slane %v648_v30, 2  ;;  %v656_v48 = vrot.slane %v655_v20, 2 }
  0x82   : > { %v575_v62 = vadd.f32 %v574_v45, %v573_v59  ;;  %v623_v54 = vrot.slane %v622_v4, 1  ;;  %v630_v63 = vrot.slane %v629_v55, 1  ;;  %v662_v0 = vadd.f32 %v661_v11, %v660_v25 }
  0x83   : > { %v636_v10 = vadd.f32 %v635_v57, %v634_v53  ;;  %v643_v37 = vadd.f32 %v642_v58, %v641_v7  ;;  %v650_v38 = vadd.f32 %v649_v61, %v648_v30  ;;  %v657_v34 = vadd.f32 %v656_v48, %v655_v20 }
  0x84   : > { %v582_v16 = vadd.f32 %v581_v5, %v580_v23  ;;  %v589_v35 = vadd.f32 %v588_v22, %v587_v24  ;;  %v663_v39 = vrot.slane %v662_v0, 2  ;;  %v667_v40 = vsel %vm505_vm1, %v492_v18, 0.0 }
  0x85   : > { %v596_v41 = vadd.f32 %v595_v36, %v594_v29  ;;  %v603_v6 = vadd.f32 %v602_v26, %v601_v32  ;;  %v610_v28 = vadd.f32 %v609_v1, %v608_v27  ;;  %v617_v13 = vadd.f32 %v616_v3, %v615_v2 }
  0x86   : > { %v624_v59 = vadd.f32 %v623_v54, %v622_v4  ;;  %v631_v45 = vadd.f32 %v630_v63, %v629_v55  ;;  %v664_v17 = vadd.f32 %v663_v39, %v662_v0  ;;  %v668_v44 = vrot.slane %v667_v40, 4 }
  0x87   : > { %v637_v46 = vrot.slane %v636_v10, 1  ;;  %v644_v49 = vrot.slane %v643_v37, 1  ;;  %v651_v50 = vrot.slane %v650_v38, 1  ;;  %v658_v42 = vrot.slane %v657_v34, 1 }
  0x88   : > { %v665_v23 = vrot.slane %v664_v17, 1  ;;  %v669_v24 = vadd.f32 %v668_v44, %v667_v40  ;;  %v4075_v5 = vmul.f32 0.25, %v4016_v33  ;;  %v4078_v21 = vmul.f32 0.25, %v4030_v56 }
  0x89   : > { %v4081_v18 = vmul.f32 0.25, %v4032_v60  ;;  %v4084_v29 = vmul.f32 0.25, %v4034_v9  ;;  %v4087_v32 = vmul.f32 0.25, %v4036_v31  ;;  %v4090_v27 = vmul.f32 0.25, %v4042_v43 }
  0x8a   : > { %v670_v22 = vrot.slane %v669_v24, 2  ;;  %v4093_v36 = vmul.f32 0.25, %v4044_v14  ;;  %v4096_v33 = vmul.f32 0.25, %v4046_v15  ;;  %v4099_v56 = vmul.f32 0.25, %v4054_v12 }
  0x8b   : > { %6291 = vst [vmem:[#allocation12_spill] sm:$0xff] %v4081_v18  ;;  %6292 = vst [vmem:[#allocation13_spill] sm:$0xff] %v4084_v29  ;;  %v4101_v60 = vmul.f32 0.25, %v575_v62  ;;  %v4103_v9 = vmul.f32 0.25, %v582_v16  ;;  %v4105_v26 = vmul.f32 0.25, %v589_v35  ;;  %v4107_v31 = vmul.f32 0.25, %v596_v41 }
  0x8c   : > { %6293 = vst [vmem:[#allocation14_spill] sm:$0xff] %v4087_v32  ;;  %6294 = vst [vmem:[#allocation15_spill] sm:$0xff] %v4090_v27  ;;  %v671_v43 = vadd.f32 %v670_v22, %v669_v24  ;;  %v4109_v1 = vmul.f32 0.25, %v603_v6  ;;  %v4111_v47 = vmul.f32 0.25, %v610_v28  ;;  %v4113_v14 = vmul.f32 0.25, %v617_v13 }
  0x8d   : > { %6295 = vst [vmem:[#allocation16_spill] sm:$0xff] %v4093_v36  ;;  %6296 = vst [vmem:[#allocation17_spill] sm:$0xff] %v4096_v33  ;;  %v638_v15 = vadd.f32 %v637_v46, %v636_v10  ;;  %v645_v51 = vadd.f32 %v644_v49, %v643_v37  ;;  %v652_v2 = vadd.f32 %v651_v50, %v650_v38  ;;  %v4115_v25 = vmul.f32 0.25, %v624_v59 }
  0x8e   : > { %6297 = vst [vmem:[#allocation18_spill] sm:$0xff] %v4099_v56  ;;  %6298 = vst [vmem:[#allocation19_spill] sm:$0xff] %v4101_v60  ;;  %v659_v12 = vadd.f32 %v658_v42, %v657_v34  ;;  %v666_v19 = vadd.f32 %v665_v23, %v664_v17  ;;  %v672_v52 = vrot.slane %v671_v43, 1  ;;  %v699_v53 = vmax.f32 %v4075_v5, %v4099_v56 }
  0x8f   : > { %6299 = vst [vmem:[#allocation20_spill] sm:$0xff] %v4103_v9  ;;  %6300 = vst [vmem:[#allocation21_spill] sm:$0xff] %v4105_v26  ;;  %v700_v7 = vmax.f32 %v4078_v21, %v4101_v60  ;;  %v701_v30 = vmax.f32 %v4081_v18, %v4103_v9  ;;  %v702_v20 = vmax.f32 %v4084_v29, %v4105_v26  ;;  %v4133_v58 = vmul.f32 0.25, %v631_v45 }
  0x90   : > { %6301 = vst [vmem:[#allocation22_spill] sm:$0xff] %v4107_v31  ;;  %6302 = vst [vmem:[#allocation23_spill] sm:$0xff] %v4109_v1  ;;  %v703_v3 = vmax.f32 %v4087_v32, %v4107_v31  ;;  %v673_v4 = vadd.f32 %v672_v52, %v671_v43  ;;  %v704_v55 = vmax.f32 %v4090_v27, %v4109_v1  ;;  %v4135_v61 = vmul.f32 0.25, %v638_v15 }
  0x91   : > { %6303 = vst [vmem:[#allocation24_spill] sm:$0xff] %v4111_v47  ;;  %6304 = vst [vmem:[#allocation25_spill] sm:$0xff] %v4113_v14  ;;  %v705_v11 = vmax.f32 %v4093_v36, %v4111_v47  ;;  %v706_v57 = vmax.f32 %v4096_v33, %v4113_v14  ;;  %v4137_v48 = vmul.f32 0.25, %v645_v51  ;;  %v4139_v62 = vmul.f32 0.25, %v652_v2 }
  0x92   : > { %v4141_v54 = vmul.f32 0.25, %v659_v12  ;;  %v4143_v63 = vmul.f32 0.25, %v666_v19  ;;  %v4146_v0 = vmax.f32 %v699_v53, %v4115_v25  ;;  %v715_v10 = vmin.f32 %v4075_v5, %v4099_v56 }
  0x93   : > { %v716_v37 = vmin.f32 %v4078_v21, %v4101_v60  ;;  %v717_v38 = vmin.f32 %v4081_v18, %v4103_v9  ;;  %v718_v34 = vmin.f32 %v4084_v29, %v4105_v26  ;;  %v4156_v16 = vmul.f32 0.25, %v673_v4 }
  0x94   : > { %6305 = vst [vmem:[#allocation26_spill] sm:$0xff] %v4146_v0  ;;  %v719_v35 = vmin.f32 %v4087_v32, %v4107_v31  ;;  %v720_v39 = vmin.f32 %v4090_v27, %v4109_v1  ;;  %v721_v40 = vmin.f32 %v4093_v36, %v4111_v47  ;;  %v4165_v41 = vmax.f32 %v700_v7, %v4133_v58 }
  0x95   : > { %v4168_v6 = vmax.f32 %v701_v30, %v4135_v61  ;;  %v4171_v28 = vmax.f32 %v702_v20, %v4137_v48  ;;  %v722_v13 = vmin.f32 %v4096_v33, %v4113_v14  ;;  %v4176_v59 = vmax.f32 %v703_v3, %v4139_v62 }
  0x96   : > { %6306 = vst [vmem:[#allocation27_spill] sm:$0xff] %v4165_v41  ;;  %v4179_v45 = vmax.f32 %v704_v55, %v4141_v54  ;;  %v723_v17 = vmin.f32 %v715_v10, %v4115_v25  ;;  %v724_v44 = vmin.f32 %v716_v37, %v4133_v58  ;;  %v725_v46 = vmin.f32 %v717_v38, %v4135_v61 }
  0x97   : > { %6307 = vst [vmem:[#allocation28_spill] sm:$0xff] %v4168_v6  ;;  %6308 = vst [vmem:[#allocation29_spill] sm:$0xff] %v4171_v28  ;;  %v726_v49 = vmin.f32 %v718_v34, %v4137_v48  ;;  %v727_v50 = vmin.f32 %v719_v35, %v4139_v62  ;;  %v728_v42 = vmin.f32 %v720_v39, %v4141_v54 }
  0x98   : > { %6309 = vst [vmem:[#allocation30_spill] sm:$0xff] %v4176_v59  ;;  %6310 = vst [vmem:[#allocation31_spill] sm:$0xff] %v4179_v45  ;;  %v4188_v23 = vmax.f32 %v705_v11, %v4143_v63  ;;  %v4191_v24 = vmax.f32 %v706_v57, %v4156_v16  ;;  %v729_v22 = vmin.f32 %v721_v40, %v4143_v63 }
  0x99   : > { %v730_v43 = vmin.f32 %v722_v13, %v4156_v16  ;;  %v4196_v15 = vsub.f32 %v4146_v0, %v723_v17  ;;  %v4199_v51 = vsub.f32 %v4165_v41, %v724_v44  ;;  %v4202_v2 = vsub.f32 %v4168_v6, %v725_v46 }
  0x9a   : > { %6311 = vst [vmem:[#allocation32_spill] sm:$0xff] %v4188_v23  ;;  %6312 = vst [vmem:[#allocation33_spill] sm:$0xff] %v4191_v24  ;;  %v4205_v12 = vsub.f32 %v4171_v28, %v726_v49  ;;  %v4208_v19 = vsub.f32 %v4176_v59, %v727_v50  ;;  %v4211_v52 = vsub.f32 %v4179_v45, %v728_v42 }
  0x9b   : > { %6313 = vst [vmem:[#allocation34_spill] sm:$0xff] %v4196_v15  ;;  %6314 = vst [vmem:[#allocation35_spill] sm:$0xff] %v4199_v51  ;;  %v4214_v53 = vsub.f32 %v4188_v23, %v729_v22  ;;  %v4217_v7 = vsub.f32 %v4191_v24, %v730_v43  ;;  %vm763_vm2 = vcmp.eq.f32.partialorder %v4196_v15, 0.0  ;;  %vm764_vm3 = vcmp.eq.f32.partialorder %v4199_v51, 0.0 }
  0x9c   : > { %6315 = vst [vmem:[#allocation36_spill] sm:$0xff] %v4202_v2  ;;  %6316 = vst [vmem:[#allocation37_spill] sm:$0xff] %v4205_v12  ;;  %vm765_vm4 = vcmp.eq.f32.partialorder %v4202_v2, 0.0  ;;  %vm766_vm5 = vcmp.eq.f32.partialorder %v4205_v12, 0.0  ;;  %vm767_vm6 = vcmp.eq.f32.partialorder %v4208_v19, 0.0  ;;  %vm768_vm7 = vcmp.eq.f32.partialorder %v4211_v52, 0.0 }
  0x9d   : > { %6317 = vst [vmem:[#allocation38_spill] sm:$0xff] %v4208_v19  ;;  %6318 = vst [vmem:[#allocation39_spill] sm:$0xff] %v4211_v52  ;;  %vm769_vm8 = vcmp.eq.f32.partialorder %v4214_v53, 0.0  ;;  %vm770_vm9 = vcmp.eq.f32.partialorder %v4217_v7, 0.0  ;;  %v4228_v30 = vsel %vm763_vm2, 1.0, %v4196_v15  ;;  %v4231_v20 = vsel %vm764_vm3, 1.0, %v4199_v51 }
  0x9e   : > { %6319 = vst [vmem:[#allocation40_spill] sm:$0xff] %v4214_v53  ;;  %6320 = vst [vmem:[#allocation41_spill] sm:$0xff] %v4217_v7  ;;  %v4235_v3 = vsub.f32 %v4146_v0, %v4075_v5  ;;  %v4238_v4 = vsel %vm765_vm4, 1.0, %v4202_v2  ;;  %v4241_v55 = vsel %vm766_vm5, 1.0, %v4205_v12  ;;  %v4244_v11 = vsel %vm767_vm6, 1.0, %v4208_v19 }
  0x9f   : > { %v4247_v57 = vsel %vm768_vm7, 1.0, %v4211_v52  ;;  %v4250_v10 = vsel %vm769_vm8, 1.0, %v4214_v53  ;;  %v4253_v37 = vsel %vm770_vm9, 1.0, %v4217_v7  ;;  %v4257_v38 = vsub.f32 %v4165_v41, %v4078_v21 }
  0xa0   : > { %v4261_v34 = vsub.f32 %v4168_v6, %v4081_v18  ;;  %v4265_v35 = vsub.f32 %v4171_v28, %v4084_v29  ;;  %v4269_v39 = vsub.f32 %v4176_v59, %v4087_v32  ;;  %v4273_v40 = vsub.f32 %v4179_v45, %v4090_v27 }
  0xa1   : > { %v4277_v13 = vsub.f32 %v4188_v23, %v4093_v36  ;;  %v4281_v17 = vsub.f32 %v4191_v24, %v4096_v33  ;;  %v4285_v44 = vsub.f32 %v4146_v0, %v4099_v56  ;;  %v4289_v46 = vsub.f32 %v4165_v41, %v4101_v60 }
  0xa2   : > { %v4293_v49 = vsub.f32 %v4168_v6, %v4103_v9  ;;  %v4297_v50 = vsub.f32 %v4171_v28, %v4105_v26  ;;  %v4301_v42 = vsub.f32 %v4176_v59, %v4107_v31  ;;  %v4305_v22 = vsub.f32 %v4179_v45, %v4109_v1 }
  0xa3   : > { %v4309_v43 = vsub.f32 %v4188_v23, %v4111_v47  ;;  %v4313_v8 = vsub.f32 %v4191_v24, %v4113_v14  ;;  %v4317_v7 = vsub.f32 %v4146_v0, %v4115_v25  ;;  %v4321_v53 = vsub.f32 %v4165_v41, %v4133_v58 }
  0xa4   : > { %v4325_v52 = vsub.f32 %v4168_v6, %v4135_v61  ;;  %v4329_v19 = vsub.f32 %v4171_v28, %v4137_v48  ;;  %v4333_v12 = vsub.f32 %v4176_v59, %v4139_v62  ;;  %v4337_v25 = vsub.f32 %v4179_v45, %v4141_v54 }
  0xa5   : > { %v4341_v58 = vsub.f32 %v4188_v23, %v4143_v63  ;;  %v4345_v61 = vsub.f32 %v4191_v24, %v4156_v16  ;;  %v803_v48 = vsub.f32 %v4317_v7, %v4285_v44  ;;  %v804_v2 = vsub.f32 %v4321_v53, %v4289_v46 }
  0xa6   : > { %3549 = vrcp.f32 %v4228_v30  ;;  %v827_v15 = vsub.f32 %v4235_v3, %v4317_v7  ;;  %v828_v54 = vsub.f32 %v4257_v38, %v4321_v53  ;;  %v829_v63 = vsub.f32 %v4261_v34, %v4325_v52 }
  0xa7   : > { %3551 = vrcp.f32 %v4231_v20  ;;  %v830_v62 = vsub.f32 %v4265_v35, %v4329_v19  ;;  %v831_v51 = vsub.f32 %v4269_v39, %v4333_v12  ;;  %v832_v16 = vsub.f32 %v4273_v40, %v4337_v25 }
  0xa8   : > { %3553 = vrcp.f32 %v4238_v4  ;;  %v835_v7 = vmul.f32 2.0, %v4228_v30  ;;  %v833_v53 = vsub.f32 %v4277_v13, %v4341_v58  ;;  %v836_v14 = vmul.f32 2.0, %v4231_v20 }
  0xa9   : > { %3555 = vrcp.f32 %v4241_v55  ;;  %v837_v47 = vmul.f32 2.0, %v4238_v4  ;;  %v834_v1 = vsub.f32 %v4281_v17, %v4345_v61  ;;  %v838_v31 = vmul.f32 2.0, %v4241_v55 }
  0xaa   : > { %3557 = vrcp.f32 %v4244_v11  ;;  %v839_v26 = vmul.f32 2.0, %v4244_v11  ;;  %v840_v60 = vmul.f32 2.0, %v4247_v57  ;;  %v841_v56 = vmul.f32 2.0, %v4250_v10 }
  0xab   : > { %3559 = vrcp.f32 %v4247_v57  ;;  %v842_v24 = vmul.f32 2.0, %v4253_v37  ;;  %v843_v33 = vadd.f32 %v835_v7, %v827_v15  ;;  %v844_v23 = vadd.f32 %v836_v14, %v828_v54 }
  0xac   : > { %3561 = vrcp.f32 %v4250_v10  ;;  %v845_v36 = vadd.f32 %v837_v47, %v829_v63  ;;  %v846_v45 = vadd.f32 %v838_v31, %v830_v62  ;;  %v847_v27 = vadd.f32 %v839_v26, %v831_v51 }
  0xad   : > { %3563 = vrcp.f32 %v4253_v37  ;;  %v848_v59 = vadd.f32 %v840_v60, %v832_v16  ;;  %v849_v32 = vadd.f32 %v841_v56, %v833_v53  ;;  %v850_v28 = vadd.f32 %v842_v24, %v834_v1 }
  0xae   : > { %v859_v29 = vsub.f32 %v4285_v44, %v4235_v3  ;;  %v860_v9 = vsub.f32 %v4289_v46, %v4257_v38  ;;  %v861_v6 = vsub.f32 %v4293_v49, %v4261_v34  ;;  %v862_v18 = vsub.f32 %v4297_v50, %v4265_v35 }
  0xaf   : > { %v863_v47 = vsub.f32 %v4301_v42, %v4269_v39  ;;  %v864_v60 = vsub.f32 %v4305_v22, %v4273_v40  ;;  %v865_v56 = vsub.f32 %v4309_v43, %v4277_v13  ;;  %v866_v26 = vsub.f32 %v4313_v8, %v4281_v17 }
  0xb0   : > { %v867_v31 = vmul.f32 4.0, %v4228_v30  ;;  %v868_v1 = vmul.f32 4.0, %v4231_v20  ;;  %v869_v14 = vmul.f32 4.0, %v4238_v4  ;;  %v870_v15 = vmul.f32 4.0, %v4241_v55 }
  0xb1   : > { %v871_v51 = vmul.f32 4.0, %v4244_v11  ;;  %v872_v3 = vmul.f32 4.0, %v4247_v57  ;;  %v873_v38 = vmul.f32 4.0, %v4250_v10  ;;  %v874_v40 = vmul.f32 4.0, %v4253_v37 }
  0xb2   : > { %v875_v30 = vadd.f32 %v867_v31, %v859_v29  ;;  %v876_v4 = vadd.f32 %v868_v1, %v860_v9  ;;  %v877_v44 = vadd.f32 %v869_v14, %v861_v6  ;;  %v6321_v55 = vsub.f32 %v4325_v52, %v4293_v49  ;;  %v6332_v14 = vld [vmem:[#allocation30_spill] sm:$0xff] }
  0xb3   : > { %v3550_v24 = vpop.eup %3549  ;;  %v878_v62 = vadd.f32 %v870_v15, %v862_v18  ;;  %v879_v10 = vadd.f32 %v871_v51, %v863_v47  ;;  %v880_v29 = vadd.f32 %v872_v3, %v864_v60  ;;  %v881_v63 = vadd.f32 %v873_v38, %v865_v56  ;;  %v6337_v15 = vld [vmem:[#allocation17_spill] sm:$0xff]  ;;  %v6339_v3 = vld [vmem:[#allocation18_spill] sm:$0xff]  ;;  %v6340_v38 = vld [vmem:[#allocation19_spill] sm:$0xff] }
  0xb4   : > { %v3552_v34 = vpop.eup %3551  ;;  %v4418_v35 = vmul.f32 %v3550_v24, %v803_v48  ;;  %v851_v39 = vmul.f32 %v3550_v24, %v843_v33  ;;  %v6322_v33 = vsub.f32 %v4329_v19, %v4297_v50  ;;  %v6323_v9 = vsub.f32 %v4333_v12, %v4301_v42  ;;  %v6338_v51 = vld [vmem:[#allocation33_spill] sm:$0xff] }
  0xb5   : > { %v3554_v13 = vpop.eup %3553  ;;  %v814_v20 = vmul.f32 %v3552_v34, %v804_v2  ;;  %v852_v17 = vmul.f32 %v3552_v34, %v844_v23  ;;  %v882_v16 = vadd.f32 %v874_v40, %v866_v26  ;;  %v883_v52 = vmul.f32 %v3550_v24, %v875_v30  ;;  %v6336_v24 = vld [vmem:[#allocation32_spill] sm:$0xff]  ;;  %v6342_v40 = vld [vmem:[#allocation21_spill] sm:$0xff]  ;;  %v6343_v30 = vld [vmem:[#allocation22_spill] sm:$0xff] }
  0xb6   : > { %v3556_v46 = vpop.eup %3555  ;;  %v816_v11 = vmul.f32 %v3554_v13, %v6321_v55  ;;  %v853_v57 = vmul.f32 %v3554_v13, %v845_v36  ;;  %v6324_v18 = vsub.f32 %v4337_v25, %v4305_v22  ;;  %v884_v53 = vmul.f32 %v3552_v34, %v876_v4  ;;  %v6330_v25 = vld [vmem:[#allocation29_spill] sm:$0xff]  ;;  %v6341_v34 = vld [vmem:[#allocation20_spill] sm:$0xff] }
  0xb7   : > { %v3558_v54 = vpop.eup %3557  ;;  %v818_v48 = vmul.f32 %v3556_v46, %v6322_v33  ;;  %v854_v37 = vmul.f32 %v3556_v46, %v846_v45  ;;  %v885_v19 = vmul.f32 %v3554_v13, %v877_v44  ;;  %v6325_v45 = vsub.f32 %v4341_v58, %v4309_v43  ;;  %v6328_v43 = vld [vmem:[#allocation28_spill] sm:$0xff]  ;;  %v6331_v58 = vld [vmem:[#allocation14_spill] sm:$0xff]  ;;  %v6344_v13 = vld [vmem:[#allocation23_spill] sm:$0xff] }
  0xb8   : > { %v3560_v2 = vpop.eup %3559  ;;  %v820_v6 = vmul.f32 %v3558_v54, %v6323_v9  ;;  %v855_v23 = vmul.f32 %v3558_v54, %v847_v27  ;;  %v886_v56 = vmul.f32 %v3556_v46, %v878_v62  ;;  %v887_v12 = vmul.f32 %v3558_v54, %v879_v10  ;;  %v6345_v4 = vld [vmem:[#allocation24_spill] sm:$0xff]  ;;  %v6346_v44 = vld [vmem:[#allocation25_spill] sm:$0xff] }
  0xb9   : > { %v3562_v49 = vpop.eup %3561  ;;  %v822_v36 = vmul.f32 %v3560_v2, %v6324_v18  ;;  %v856_v7 = vmul.f32 %v3560_v2, %v848_v59  ;;  %v6326_v27 = vsub.f32 %v4345_v61, %v4313_v8  ;;  %v888_v31 = vmul.f32 %v3560_v2, %v880_v29  ;;  %v6327_v59 = vld [vmem:[#allocation12_spill] sm:$0xff]  ;;  %v6333_v8 = vld [vmem:[#allocation15_spill] sm:$0xff] }
  0xba   : > { %v3564_v50 = vpop.eup %3563  ;;  %v824_v47 = vmul.f32 %v3562_v49, %v6325_v45  ;;  %v857_v60 = vmul.f32 %v3562_v49, %v849_v32  ;;  %v889_v1 = vmul.f32 %v3562_v49, %v881_v63  ;;  %vm891_vm10 = vcmp.eq.f32.partialorder %v4146_v0, %v4075_v5  ;;  %v6329_v32 = vld [vmem:[#allocation13_spill] sm:$0xff]  ;;  %v6335_v61 = vld [vmem:[#allocation16_spill] sm:$0xff] }
  0xbb   : > { %v826_v42 = vmul.f32 %v3564_v50, %v6326_v27  ;;  %v858_v26 = vmul.f32 %v3564_v50, %v850_v28  ;;  %v890_v22 = vmul.f32 %v3564_v50, %v882_v16  ;;  %vm892_vm11 = vcmp.eq.f32.partialorder %v4165_v41, %v4078_v21  ;;  %v6334_v28 = vld [vmem:[#allocation31_spill] sm:$0xff] }
  0xbc   : > { %vm893_vm12 = vcmp.eq.f32.partialorder %v6328_v43, %v6327_v59  ;;  %vm894_vm13 = vcmp.eq.f32.partialorder %v6330_v25, %v6329_v32  ;;  %vm895_vm14 = vcmp.eq.f32.partialorder %v6332_v14, %v6331_v58  ;;  %vm896_vm15 = vcmp.eq.f32.partialorder %v6334_v28, %v6333_v8 }
  0xbd   : > { %vm897_vm0 = vcmp.eq.f32.partialorder %v6336_v24, %v6335_v61  ;;  %vm898_vm1 = vcmp.eq.f32.partialorder %v6338_v51, %v6337_v15  ;;  %vm899_vm2 = vcmp.eq.f32.partialorder %v4146_v0, %v6339_v3  ;;  %vm900_vm3 = vcmp.eq.f32.partialorder %v4165_v41, %v6340_v38 }
  0xbe   : > { %vm901_vm4 = vcmp.eq.f32.partialorder %v6328_v43, %v6341_v34  ;;  %vm902_vm5 = vcmp.eq.f32.partialorder %v6330_v25, %v6342_v40  ;;  %vm903_vm6 = vcmp.eq.f32.partialorder %v6332_v14, %v6343_v30  ;;  %vm904_vm7 = vcmp.eq.f32.partialorder %v6334_v28, %v6344_v13 }
  0xbf   : > { %vm905_vm8 = vcmp.eq.f32.partialorder %v6336_v24, %v6345_v4  ;;  %vm906_vm9 = vcmp.eq.f32.partialorder %v6338_v51, %v6346_v44  ;;  %v907_v46 = vsel %vm899_vm2, %v851_v39, %v883_v52  ;;  %v908_v55 = vsel %vm900_vm3, %v852_v17, %v884_v53 }
  0xc0   : > { %v909_v62 = vsel %vm901_vm4, %v853_v57, %v885_v19  ;;  %v910_v10 = vsel %vm902_vm5, %v854_v37, %v886_v56  ;;  %v911_v54 = vsel %vm903_vm6, %v855_v23, %v887_v12  ;;  %v912_v33 = vsel %vm904_vm7, %v856_v7, %v888_v31 }
  0xc1   : > { %v913_v29 = vsel %vm905_vm8, %v857_v60, %v889_v1  ;;  %v914_v63 = vsel %vm906_vm9, %v858_v26, %v890_v22  ;;  %v915_v2 = vsel %vm891_vm10, %v4418_v35, %v907_v46  ;;  %v916_v9 = vsel %vm892_vm11, %v814_v20, %v908_v55 }
  0xc2   : > { %v917_v39 = vsel %vm893_vm12, %v816_v11, %v909_v62  ;;  %v918_v17 = vsel %vm894_vm13, %v818_v48, %v910_v10  ;;  %v919_v57 = vsel %vm895_vm14, %v820_v6, %v911_v54  ;;  %v920_v5 = vsel %vm896_vm15, %v822_v36, %v912_v33 }
  0xc3   : > { %v921_v21 = vsel %vm897_vm0, %v824_v47, %v913_v29  ;;  %v922_v35 = vsel %vm898_vm1, %v826_v42, %v914_v63  ;;  %v924_v20 = vmul.f32 0.16666667, %v915_v2  ;;  %v925_v11 = vmul.f32 0.16666667, %v916_v9 }
  0xc4   : > { %v926_v37 = vmul.f32 0.16666667, %v917_v39  ;;  %v4496_v48 = vmul.f32 0.16666667, %v918_v17  ;;  %v739_v7 = vadd.f32 1e-08, %v4146_v0 }
  0xc5   : > { %v932_v23 = vand.u32 2147483647, %v924_v20  ;;  %v942_v16 = vand.u32 2147483647, %v925_v11  ;;  %v4500_v53 = vmul.f32 0.16666667, %v919_v57 }
  0xc6   : > { %v952_v6 = vand.u32 2147483647, %v926_v37  ;;  %v962_v49 = vand.u32 2147483647, %v4496_v48  ;;  %v4502_v50 = vmul.f32 0.16666667, %v920_v5  ;;  %3565 = vrcp.f32 %v739_v7 }
  0xc7   : > { %v935_v52 = vfloor.f32 %v932_v23  ;;  %v945_v18 = vfloor.f32 %v942_v16  ;;  %v4504_v56 = vmul.f32 0.16666667, %v921_v21  ;;  %v940_v12 = vand.u32 2147483648, %v924_v20 }
  0xc8   : > { %v955_v36 = vfloor.f32 %v952_v6  ;;  %v965_v60 = vfloor.f32 %v962_v49  ;;  %v950_v27 = vand.u32 2147483648, %v925_v11  ;;  %v960_v26 = vand.u32 2147483648, %v926_v37 }
  0xc9   : > { %v936_v19 = vsub.f32 %v932_v23, %v935_v52  ;;  %v946_v45 = vsub.f32 %v942_v16, %v945_v18  ;;  %v972_v59 = vand.u32 2147483647, %v4500_v53  ;;  %v982_v61 = vand.u32 2147483647, %v4502_v50 }
  0xca   : > { %v956_v47 = vsub.f32 %v952_v6, %v955_v36  ;;  %v966_v8 = vsub.f32 %v962_v49, %v965_v60  ;;  %v740_v15 = vadd.f32 1e-08, %v4165_v41  ;;  %v992_v3 = vand.u32 2147483647, %v4504_v56 }
  0xcb   : > { %vm937_vm10 = vcmp.eq.f32.partialorder %v936_v19, 1.0  ;;  %vm947_vm11 = vcmp.eq.f32.partialorder %v946_v45, 1.0  ;;  %v741_v38 = vadd.f32 1e-08, %v6328_v43  ;;  %v4511_v40 = vmul.f32 0.16666667, %v922_v35 }
  0xcc   : > { %v938_v42 = vsel %vm937_vm10, 0.0, %v936_v19  ;;  %vm957_vm12 = vcmp.eq.f32.partialorder %v956_v47, 1.0  ;;  %v948_v1 = vsel %vm947_vm11, 0.0, %v946_v45  ;;  %vm967_vm13 = vcmp.eq.f32.partialorder %v966_v8, 1.0 }
  0xcd   : > { %v939_v31 = vand.u32 2147483647, %v938_v42  ;;  %v958_v22 = vsel %vm957_vm12, 0.0, %v956_v47  ;;  %v949_v32 = vand.u32 2147483647, %v948_v1  ;;  %v975_v4 = vfloor.f32 %v972_v59 }
  0xce   : > { %v959_v58 = vand.u32 2147483647, %v958_v22  ;;  %v985_v44 = vfloor.f32 %v982_v61  ;;  %3567 = vrcp.f32 %v740_v15  ;;  %v995_v46 = vfloor.f32 %v992_v3 }
  0xcf   : > { %v941_v34 = vor.u32 %v940_v12, %v939_v31  ;;  %v951_v30 = vor.u32 %v950_v27, %v949_v32  ;;  %3569 = vrcp.f32 %v741_v38  ;;  %v968_v55 = vsel %vm967_vm13, 0.0, %v966_v8 }
  0xd0   : > { %v961_v13 = vor.u32 %v960_v26, %v959_v58  ;;  %v1002_v62 = vand.u32 2147483647, %v4511_v40  ;;  %v976_v10 = vsub.f32 %v972_v59, %v975_v4  ;;  %v986_v54 = vsub.f32 %v982_v61, %v985_v44  ;;  %v6358_v44 = vld [vmem:[#allocation36_spill] sm:$0xff] }
  0xd1   : > { %vm1012_vm14 = vcmp.ne.f32.partialorder %v941_v34, 0.0  ;;  %vm1020_vm15 = vcmp.lt.f32.partialorder %v941_v34, 0.0  ;;  %vm1013_vm0 = vcmp.ne.f32.partialorder %v951_v30, 0.0  ;;  %vm1021_vm1 = vcmp.lt.f32.partialorder %v951_v30, 0.0 }
  0xd2   : > { %vm1014_vm2 = vcmp.ne.f32.partialorder %v961_v13, 0.0  ;;  %vm1022_vm3 = vcmp.lt.f32.partialorder %v961_v13, 0.0  ;;  %v996_v33 = vsub.f32 %v992_v3, %v995_v46  ;;  %vm4514_vm4 = vmand %vm1020_vm15, %vm1012_vm14  ;;  %v1036_v63 = vadd.f32 1.0, %v941_v34  ;;  %v6356_v3 = vld [vmem:[#allocation34_spill] sm:$0xff] }
  0xd3   : > { %v969_v2 = vand.u32 2147483647, %v968_v55  ;;  %v970_v9 = vand.u32 2147483648, %v4496_v48  ;;  %vm4519_vm5 = vmand %vm1021_vm1, %vm1013_vm0  ;;  %v1037_v17 = vadd.f32 1.0, %v951_v30  ;;  %v1038_v57 = vadd.f32 1.0, %v961_v13  ;;  %v3566_v7 = vpop.eup %3565 }
  0xd4   : > { %v742_v5 = vadd.f32 1e-08, %v6330_v25  ;;  %v1005_v21 = vfloor.f32 %v1002_v62  ;;  %vm4524_vm6 = vmand %vm1022_vm3, %vm1014_vm2  ;;  %v743_v20 = vadd.f32 1e-08, %v6332_v14  ;;  %vm977_vm7 = vcmp.eq.f32.partialorder %v976_v10, 1.0 }
  0xd5   : > { %vm987_vm8 = vcmp.eq.f32.partialorder %v986_v54, 1.0  ;;  %v1044_v11 = vsel %vm4514_vm4, %v1036_v63, %v941_v34  ;;  %v744_v37 = vadd.f32 1e-08, %v6334_v28  ;;  %vm997_vm9 = vcmp.eq.f32.partialorder %v996_v33, 1.0 }
  0xd6   : > { %v1045_v48 = vsel %vm4519_vm5, %v1037_v17, %v951_v30  ;;  %v745_v23 = vadd.f32 1e-08, %v6336_v24  ;;  %v971_v16 = vor.u32 %v970_v9, %v969_v2  ;;  %v1046_v6 = vsel %vm4524_vm6, %v1038_v57, %v961_v13  ;;  %v6357_v13 = vld [vmem:[#allocation35_spill] sm:$0xff] }
  0xd7   : > { %v1052_v52 = vmul.f32 6.2831855, %v1044_v11  ;;  %3571 = vrcp.f32 %v742_v5  ;;  %v978_v49 = vsel %vm977_vm7, 0.0, %v976_v10  ;;  %v988_v18 = vsel %vm987_vm8, 0.0, %v986_v54 }
  0xd8   : > { %v1006_v36 = vsub.f32 %v1002_v62, %v1005_v21  ;;  %v746_v19 = vadd.f32 1e-08, %v6338_v51  ;;  %3573 = vrcp.f32 %v743_v20  ;;  %v998_v45 = vsel %vm997_vm9, 0.0, %v996_v33 }
  0xd9   : > { %v1053_v47 = vmul.f32 6.2831855, %v1045_v48  ;;  %v980_v60 = vand.u32 2147483648, %v4500_v53  ;;  %v990_v12 = vand.u32 2147483648, %v4502_v50  ;;  %v1054_v27 = vmul.f32 6.2831855, %v1046_v6 }
  0xda   : > { %v4540_v42 = vmul.f32 6.2831855, %v1052_v52  ;;  %v979_v31 = vand.u32 2147483647, %v978_v49  ;;  %v989_v1 = vand.u32 2147483647, %v988_v18  ;;  %3575 = vrcp.f32 %v744_v37 }
  0xdb   : > { %v3568_v26 = vpop.eup %3567  ;;  %vm1015_vm10 = vcmp.ne.f32.partialorder %v971_v16, 0.0  ;;  %vm1023_vm11 = vcmp.lt.f32.partialorder %v971_v16, 0.0  ;;  %v999_v59 = vand.u32 2147483647, %v998_v45  ;;  %v1000_v32 = vand.u32 2147483648, %v4504_v56 }
  0xdc   : > { %6353 = vst [vmem:[#allocation12_spill] sm:$0xff] %v4540_v42  ;;  %v3570_v22 = vpop.eup %3569  ;;  %vm1007_vm12 = vcmp.eq.f32.partialorder %v1006_v36, 1.0  ;;  %3577 = vrcp.f32 %v745_v23  ;;  %v1039_v58 = vadd.f32 1.0, %v971_v16  ;;  %v4543_v8 = vmul.f32 6.2831855, %v1053_v47  ;;  %vm4546_vm13 = vmand %vm1023_vm11, %vm1015_vm10 }
  0xdd   : > { %v6224_v53 = vand.u32 2147483647, %v4540_v42  ;;  %3579 = vrcp.f32 %v746_v19  ;;  %v4550_v61 = vmul.f32 6.2831855, %v1054_v27  ;;  %v1071_v15 = vand.u32 2139095040, %v4540_v42 }
  0xde   : > { %v4554_v38 = vmul.f32 %v3566_v7, %v6356_v3  ;;  %v4556_v56 = vor.u32 %v980_v60, %v979_v31  ;;  %v4558_v34 = vor.u32 %v990_v12, %v989_v1  ;;  %v1008_v30 = vsel %vm1007_vm12, 0.0, %v1006_v36 }
  0xdf   : > { %v4561_v4 = vmul.f32 %v3568_v26, %v6357_v13  ;;  %v4564_v46 = vmul.f32 %v3570_v22, %v6358_v44  ;;  %v4566_v55 = vor.u32 %v1000_v32, %v999_v59  ;;  %v1072_v62 = vshrl.u32 %v1071_v15, 23 }
  0xe0   : > { %v1047_v10 = vsel %vm4546_vm13, %v1039_v58, %v971_v16  ;;  %v1075_v54 = vand.u32 8388607, %v6224_v53  ;;  %v6223_v33 = vand.u32 2147483647, %v4543_v8  ;;  %v1174_v29 = vand.u32 2139095040, %v4543_v8 }
  0xe1   : > { %v1009_v63 = vand.u32 2147483647, %v1008_v30  ;;  %v1010_v2 = vand.u32 2147483648, %v4511_v40  ;;  %v3128_v9 = vadd.s32 4294967169, %v1072_v62  ;;  %v1277_v39 = vand.u32 2139095040, %v4550_v61 }
  0xe2   : > { %v4577_v17 = vadd.f32 1.0, %v4556_v56  ;;  %v4580_v57 = vadd.f32 1.0, %v4558_v34  ;;  %v1175_v5 = vshrl.u32 %v1174_v29, 23  ;;  %v1178_v21 = vand.u32 8388607, %v6223_v33 }
  0xe3   : > { %v4585_v35 = vadd.f32 1.0, %v4566_v55  ;;  %v4587_v20 = vmul.f32 6.2831855, %v1047_v10  ;;  %v1078_v11 = vadd.s32 1, %v3128_v9  ;;  %v1076_v37 = vor.u32 8388608, %v1075_v54 }
  0xe4   : > { %v4589_v40 = vpop.eup %3571  ;;  %v3132_v48 = vadd.s32 4294967169, %v1175_v5  ;;  %v1179_v23 = vor.u32 8388608, %v1178_v21  ;;  %v1278_v16 = vshrl.u32 %v1277_v39, 23  ;;  %v4593_v52 = vor.u32 %v1010_v2, %v1009_v63 }
  0xe5   : > { %v4591_v6 = vpop.eup %3573  ;;  %vm1079_vm14 = vcmp.gt.s32.totalorder %v1078_v11, 0  ;;  %v6225_v19 = vand.u32 2147483647, %v4550_v61  ;;  %v4598_v47 = vshll.u32 %v1076_v37, 8  ;;  %v6234_v31 = vmov 683565275  }
  0xe6   : > { %v1080_v49 = vsel %vm1079_vm14, %v1078_v11, 0  ;;  %v1181_v18 = vadd.s32 1, %v3132_v48  ;;  %v4600_v60 = vshll.u32 %v1179_v23, 8  ;;  %v4602_v12 = vadd.s32 4294967169, %v1278_v16 }
  0xe7   : > { %v1081_v36 = vshrl.u32 %v1080_v49, 5  ;;  %v1082_v7 = vand.u32 31, %v1080_v49  ;;  %v4596_v45 = vpop.eup %3575  ;;  %v6226_v22 = vmov 2475754826   ;;  %v6228_v32 = vmov 2131351028  }
  0xe8   : > { %vm1182_vm15 = vcmp.gt.s32.totalorder %v1181_v18, 0  ;;  %v6231_v15 = vmov 2102212464   ;;  %v6252_v30 = vmov 920167782   ;;  %vm1016_vm4 = vcmp.ne.f32.partialorder %v4556_v56, 0.0 }
  0xe9   : > { %v4604_v27 = vpop.eup %3577  ;;  %v1083_v26 = vsub.s32 32, %v1082_v7  ;;  %v1085_v1 = vshll.u32 %v6234_v31, %v1082_v7  ;;  %v1088_v59 = vshll.u32 %v6226_v22, %v1082_v7  ;;  %v1091_v58 = vshll.u32 %v6228_v32, %v1082_v7 }
  0xea   : > { %v4609_v50 = vpop.eup %3579  ;;  %v1094_v3 = vshll.u32 %v6231_v15, %v1082_v7  ;;  %v1097_v13 = vshll.u32 %v6252_v30, %v1082_v7  ;;  %vm1100_vm0 = vcmp.lt.s32.totalorder %v1081_v36, 1  ;;  %vm1101_vm1 = vcmp.lt.s32.totalorder %v1081_v36, 2 }
  0xeb   : > { %v1084_v44 = vshrl.u32 %v6234_v31, %v1083_v26  ;;  %v1086_v62 = vshrl.u32 %v6226_v22, %v1083_v26  ;;  %v1089_v10 = vshrl.u32 %v6228_v32, %v1083_v26  ;;  %v1092_v54 = vshrl.u32 %v6231_v15, %v1083_v26 }
  0xec   : > { %v1095_v29 = vshrl.u32 %v6252_v30, %v1083_v26  ;;  %v6242_v63 = vmov 1326507024   ;;  %vm1102_vm2 = vcmp.lt.s32.totalorder %v1081_v36, 3  ;;  %vm1103_vm3 = vcmp.lt.s32.totalorder %v1081_v36, 4 }
  0xed   : > { %v1098_v2 = vshrl.u32 %v6242_v63, %v1083_v26  ;;  %v1087_v9 = vor.u32 %v1086_v62, %v1085_v1  ;;  %v1090_v39 = vor.u32 %v1089_v10, %v1088_v59  ;;  %v1093_v5 = vor.u32 %v1092_v54, %v1091_v58 }
  0xee   : > { %v1183_v21 = vsel %vm1182_vm15, %v1181_v18, 0  ;;  %v1096_v11 = vor.u32 %v1095_v29, %v1094_v3  ;;  %vm1024_vm5 = vcmp.lt.f32.partialorder %v4556_v56, 0.0  ;;  %vm1017_vm6 = vcmp.ne.f32.partialorder %v4558_v34, 0.0 }
  0xef   : > { %v1099_v37 = vor.u32 %v1098_v2, %v1097_v13  ;;  %v4620_v48 = vshrl.u32 %v1183_v21, 5  ;;  %v1185_v23 = vand.u32 31, %v1183_v21  ;;  %v1104_v16 = vsel %vm1100_vm0, %v1084_v44, %v1087_v9 }
  0xf0   : > { %v1105_v49 = vsel %vm1103_vm3, %v1093_v5, 2102212464  ;;  %v1108_v7 = vsel %vm1100_vm0, %v1087_v9, %v1090_v39  ;;  %v1112_v33 = vsel %vm1100_vm0, %v1090_v39, %v1093_v5  ;;  %v1109_v53 = vsel %vm1103_vm3, %v1096_v11, 920167782  ;;  %vm4681_vm0 = vmand %vm1024_vm5, %vm1016_vm4 }
  0xf1   : > { %v1106_v26 = vsel %vm1102_vm2, %v1090_v39, %v1105_v49  ;;  %v1113_v1 = vsel %vm1103_vm3, %v1099_v37, 1326507024  ;;  %v1186_v59 = vsub.s32 32, %v1185_v23  ;;  %v1110_v58 = vsel %vm1102_vm2, %v1093_v5, %v1109_v53 }
  0xf2   : > { %v1107_v18 = vsel %vm1101_vm1, %v1104_v16, %v1106_v26  ;;  %v1114_v3 = vsel %vm1102_vm2, %v1096_v11, %v1113_v1  ;;  %v1188_v13 = vshll.u32 %v6234_v31, %v1185_v23  ;;  %vm1025_vm7 = vcmp.lt.f32.partialorder %v4558_v34, 0.0 }
  0xf3   : > { %v1111_v44 = vsel %vm1101_vm1, %v1108_v7, %v1110_v58  ;;  %v1115_v62 = vsel %vm1101_vm1, %v1112_v33, %v1114_v3  ;;  %v1123_v10 = vmul.u32 %v4598_v47, %v1107_v18  ;;  %v1187_v54 = vshrl.u32 %v6234_v31, %v1186_v59  ;;  %vm4695_vm1 = vmand %vm1025_vm7, %vm1017_vm6 }
  0xf4   : > { %vm1018_vm8 = vcmp.ne.f32.partialorder %v4566_v55, 0.0  ;;  %vm1026_vm9 = vcmp.lt.f32.partialorder %v4566_v55, 0.0  ;;  %v4641_v53 = vmul.u32.u64.low %v4598_v47, %v1115_v62  ;;  %v4642_v29 = vmul.u32.u64.high %v4598_v47, %v1115_v62, %v4641_v53 }
  0xf5   : > { %v4645_v2 = vmul.u32.u64.low %v4598_v47, %v1111_v44  ;;  %v4646_v9 = vmul.u32.u64.high %v4598_v47, %v1111_v44, %v4645_v2  ;;  %v1189_v36 = vshrl.u32 %v6226_v22, %v1186_v59  ;;  %v1191_v33 = vshll.u32 %v6226_v22, %v1185_v23  ;;  %vm4712_vm2 = vmand %vm1026_vm9, %vm1018_vm8 }
  0xf6   : > { %v1192_v39 = vshrl.u32 %v6228_v32, %v1186_v59  ;;  %v1194_v5 = vshll.u32 %v6228_v32, %v1185_v23  ;;  %v1195_v21 = vshrl.u32 %v6231_v15, %v1186_v59  ;;  %v1197_v11 = vshll.u32 %v6231_v15, %v1185_v23 }
  0xf7   : > { %v1198_v37 = vshrl.u32 %v6252_v30, %v1186_v59  ;;  %v1200_v16 = vshll.u32 %v6252_v30, %v1185_v23  ;;  %v1190_v49 = vor.u32 %v1189_v36, %v1188_v13  ;;  %v1201_v7 = vshrl.u32 %v6242_v63, %v1186_v59 }
  0xf8   : > { %v1193_v47 = vor.u32 %v1192_v39, %v1191_v33  ;;  %vm1203_vm10 = vcmp.lt.s32.totalorder %v4620_v48, 1  ;;  %vm1125_vm11 = vc.u32 %v4642_v29, %v4645_v2  ;;  %v1126_v26 = vadd.s32 1, %v4646_v9 }
  0xf9   : > { %v1196_v1 = vor.u32 %v1195_v21, %v1194_v5  ;;  %v1284_v18 = vadd.s32 1, %v4602_v12  ;;  %v1199_v58 = vor.u32 %v1198_v37, %v1197_v11  ;;  %v1202_v3 = vor.u32 %v1201_v7, %v1200_v16 }
  0xfa   : > { %vm1204_vm12 = vcmp.lt.s32.totalorder %v4620_v48, 2  ;;  %vm1205_vm13 = vcmp.lt.s32.totalorder %v4620_v48, 3  ;;  %v1127_v23 = vsel %vm1125_vm11, %v1126_v26, %v4646_v9  ;;  %vm1206_vm14 = vcmp.lt.s32.totalorder %v4620_v48, 4 }
  0xfb   : > { %v1207_v59 = vsel %vm1203_vm10, %v1187_v54, %v1190_v49  ;;  %v1211_v13 = vsel %vm1203_vm10, %v1190_v49, %v1193_v47  ;;  %v1128_v44 = vadd.s32 %v1127_v23, %v1123_v10  ;;  %v1208_v62 = vsel %vm1206_vm14, %v1196_v1, 2102212464 }
  0xfc   : > { %v1212_v53 = vsel %vm1206_vm14, %v1199_v58, 920167782  ;;  %v1215_v12 = vsel %vm1203_vm10, %v1193_v47, %v1196_v1  ;;  %v1209_v36 = vsel %vm1205_vm13, %v1193_v47, %v1208_v62  ;;  %v1216_v33 = vsel %vm1206_vm14, %v1202_v3, 1326507024  ;;  %v6365_v3 = vld [vmem:[#allocation37_spill] sm:$0xff] }
  0xfd   : > { %v1213_v9 = vsel %vm1205_vm13, %v1196_v1, %v1212_v53  ;;  %vm1285_vm15 = vcmp.gt.s32.totalorder %v1284_v18, 0  ;;  %v1129_v10 = vadd.s32 536870912, %v1128_v44  ;;  %v1217_v5 = vsel %vm1205_vm13, %v1199_v58, %v1216_v33 }
  0xfe   : > { %v1214_v39 = vsel %vm1204_vm12, %v1211_v13, %v1213_v9  ;;  %v1281_v21 = vand.u32 8388607, %v6225_v19  ;;  %v1210_v37 = vsel %vm1204_vm12, %v1207_v59, %v1209_v36  ;;  %v1218_v16 = vsel %vm1204_vm12, %v1215_v12, %v1217_v5  ;;  %v6366_v59 = vld [vmem:[#allocation38_spill] sm:$0xff]  ;;  %v6367_v12 = vld [vmem:[#allocation39_spill] sm:$0xff] }
  0xff   : > { %v4704_v49 = vmul.u32.u64.low %v4600_v60, %v1214_v39  ;;  %v4705_v47 = vmul.u32.u64.high %v4600_v60, %v1214_v39, %v4704_v49  ;;  %v4716_v26 = vshrl.u32 %v1129_v10, 30  ;;  %v1286_v48 = vsel %vm1285_vm15, %v1284_v18, 0 }
 0x100   : > { %v4719_v1 = vmul.u32.u64.low %v4600_v60, %v1218_v16  ;;  %v4720_v58 = vmul.u32.u64.high %v4600_v60, %v1218_v16, %v4719_v1  ;;  %v4724_v23 = vmul.f32 %v4589_v40, %v6365_v3  ;;  %v4728_v13 = vmul.f32 %v4591_v6, %v6366_v59 }
 0x101   : > { %v4731_v62 = vmul.f32 6.2831855, %v4587_v20  ;;  %v1288_v53 = vand.u32 31, %v1286_v48  ;;  %v4735_v36 = vmul.f32 %v4596_v45, %v6367_v12  ;;  %v1048_v18 = vsel %vm4681_vm0, %v4577_v17, %v4556_v56 }
 0x102   : > { %v1131_v40 = vshll.u32 %v4716_v26, 30  ;;  %v1226_v9 = vmul.u32 %v4600_v60, %v1210_v37  ;;  %v1229_v45 = vadd.s32 1, %v4705_v47  ;;  %vm1019_vm3 = vcmp.ne.f32.partialorder %v4593_v52, 0.0 }
 0x103   : > { %6368 = vst [vmem:[#allocation13_spill] sm:$0xff] %v4735_v36  ;;  %v1289_v33 = vsub.s32 32, %v1288_v53  ;;  %vm1027_vm4 = vcmp.lt.f32.partialorder %v4593_v52, 0.0  ;;  %vm1228_vm5 = vc.u32 %v4720_v58, %v4704_v49  ;;  %v1282_v17 = vor.u32 8388608, %v1281_v21 }
 0x104   : > { %v4754_v56 = vsub.s32 %v1128_v44, %v1131_v40  ;;  %v4759_v60 = vadd.f32 1.0, %v4593_v52  ;;  %v1230_v54 = vsel %vm1228_vm5, %v1229_v45, %v4705_v47  ;;  %v1291_v10 = vshll.u32 %v6234_v31, %v1288_v53  ;;  %vm4791_vm11 = vmand %vm1027_vm4, %vm1019_vm3 }
 0x105   : > { %v1380_v39 = vand.u32 2139095040, %v4731_v62  ;;  %v1231_v37 = vadd.s32 %v1230_v54, %v1226_v9  ;;  %v1292_v16 = vshrl.u32 %v6226_v22, %v1289_v33  ;;  %v1294_v44 = vshll.u32 %v6226_v22, %v1288_v53 }
 0x106   : > { %v1134_v5 = vsub.s32 0, %v4754_v56  ;;  %v1295_v1 = vshrl.u32 %v6228_v32, %v1289_v33  ;;  %v1297_v21 = vshll.u32 %v6228_v32, %v1288_v53  ;;  %v1298_v3 = vshrl.u32 %v6231_v15, %v1289_v33 }
 0x107   : > { %v1300_v59 = vshll.u32 %v6231_v15, %v1288_v53  ;;  %v4771_v47 = vmul.f32 6.2831855, %v1048_v18  ;;  %v1287_v40 = vshrl.u32 %v1286_v48, 5  ;;  %v4774_v45 = vshll.u32 %v1282_v17, 8 }
 0x108   : > { %v3129_v12 = vmin.u32 %v1134_v5, %v4754_v56  ;;  %v1232_v9 = vadd.s32 536870912, %v1231_v37  ;;  %v1290_v54 = vshrl.u32 %v6234_v31, %v1289_v33  ;;  %v1301_v19 = vshrl.u32 %v6252_v30, %v1289_v33 }
 0x109   : > { %v1381_v22 = vshrl.u32 %v1380_v39, 23  ;;  %v1293_v20 = vor.u32 %v1292_v16, %v1291_v10  ;;  %v1303_v32 = vshll.u32 %v6252_v30, %v1288_v53  ;;  %v1304_v51 = vshrl.u32 %v6242_v63, %v1289_v33 }
 0x10a   : > { %v1136_v6 = vclz %v3129_v12  ;;  %v4780_v15 = vshrl.u32 %v1232_v9, 30  ;;  %v1296_v18 = vor.u32 %v1295_v1, %v1294_v44  ;;  %v1299_v24 = vor.u32 %v1298_v3, %v1297_v21 }
 0x10b   : > { %v1302_v5 = vor.u32 %v1301_v19, %v1300_v59  ;;  %v1124_v48 = vadd.s32 %v4645_v2, %v4642_v29  ;;  %vm1306_vm6 = vcmp.lt.s32.totalorder %v1287_v40, 1  ;;  %vm1309_vm7 = vcmp.lt.s32.totalorder %v1287_v40, 4 }
 0x10c   : > { %v3130_v17 = vadd.s32 4294967294, %v1136_v6  ;;  %v1234_v31 = vshll.u32 %v4780_v15, 30  ;;  %v1305_v39 = vor.u32 %v1304_v51, %v1303_v32  ;;  %v1311_v10 = vsel %vm1309_vm7, %v1299_v24, 2102212464 }
 0x10d   : > { %v3140_v16 = vadd.s32 4294967169, %v1381_v22  ;;  %vm1307_vm9 = vcmp.lt.s32.totalorder %v1287_v40, 2  ;;  %vm1308_vm10 = vcmp.lt.s32.totalorder %v1287_v40, 3  ;;  %v1315_v53 = vsel %vm1309_vm7, %v1302_v5, 920167782 }
 0x10e   : > { %vm3131_vm8 = vcmp.lt.s32.totalorder %v3130_v17, 0  ;;  %v4795_v2 = vsub.s32 %v1231_v37, %v1234_v31  ;;  %v1310_v51 = vsel %vm1306_vm6, %v1290_v54, %v1293_v20  ;;  %v1314_v22 = vsel %vm1306_vm6, %v1293_v20, %v1296_v18 }
 0x10f   : > { %v1139_v29 = vsel %vm3131_vm8, 0, %v3130_v17  ;;  %v1312_v44 = vsel %vm1308_vm10, %v1296_v18, %v1311_v10  ;;  %v1316_v21 = vsel %vm1308_vm10, %v1299_v24, %v1315_v53  ;;  %v1318_v3 = vsel %vm1306_vm6, %v1296_v18, %v1299_v24 }
 0x110   : > { %v1140_v32 = vsub.s32 32, %v1139_v29  ;;  %v1141_v6 = vshll.u32 %v4754_v56, %v1139_v29  ;;  %v1144_v33 = vsub.s32 4294967266, %v1139_v29  ;;  %v1237_v1 = vsub.s32 0, %v4795_v2 }
 0x111   : > { %v1319_v59 = vsel %vm1309_vm7, %v1305_v39, 1326507024  ;;  %v1051_v31 = vsel %vm4791_vm11, %v4759_v60, %v4593_v52  ;;  %v6371_v12 = vsel %vm4695_vm1, %v4580_v57, %v4558_v34  ;;  %v1317_v24 = vsel %vm1307_vm9, %v1314_v22, %v1316_v21 }
 0x112   : > { %v1142_v20 = vshrl.u32 %v1124_v48, %v1140_v32  ;;  %v1145_v37 = vadd.s32 127, %v1144_v33  ;;  %v1320_v56 = vsel %vm1308_vm10, %v1302_v5, %v1319_v59  ;;  %v1057_v9 = vmul.f32 6.2831855, %v6371_v12  ;;  %v6373_v32 = vld [vmem:[#allocation40_spill] sm:$0xff] }
 0x113   : > { %v3133_v54 = vmin.u32 %v1237_v1, %v4795_v2  ;;  %v6236_v18 = vand.u32 2147483647, %v4731_v62  ;;  %v1313_v52 = vsel %vm1307_vm9, %v1310_v51, %v1312_v44  ;;  %v1321_v60 = vsel %vm1307_vm9, %v1318_v3, %v1320_v56 }
 0x114   : > { %v1143_v17 = vor.u32 %v1142_v20, %v1141_v6  ;;  %v1146_v39 = vshll.u32 %v1145_v37, 23  ;;  %v4821_v5 = vmul.u32.u64.low %v4774_v45, %v1321_v60  ;;  %v4822_v11 = vmul.u32.u64.high %v4774_v45, %v1321_v60, %v4821_v5 }
 0x115   : > { %v1239_v48 = vclz %v3133_v54  ;;  %v1387_v10 = vadd.s32 1, %v3140_v16  ;;  %v4825_v53 = vmul.u32.u64.low %v4774_v45, %v1317_v24  ;;  %v4826_v19 = vmul.u32.u64.high %v4774_v45, %v1317_v24, %v4825_v53  ;;  %v6375_v24 = vld [vmem:[#allocation41_spill] sm:$0xff] }
 0x116   : > { %v1147_v34 = vor.u32 4788187, %v1146_v39  ;;  %v1150_v57 = vcvt.s32.f32 %v1143_v17  ;;  %v6372_v29 = vsel %vm4712_vm2, %v4585_v35, %v4566_v55  ;;  %v1059_v51 = vmul.f32 6.2831855, %v1051_v31 }
 0x117   : > { %v1058_v40 = vmul.f32 6.2831855, %v6372_v29  ;;  %v3134_v22 = vadd.s32 4294967294, %v1239_v48  ;;  %vm1388_vm12 = vcmp.gt.s32.totalorder %v1387_v10, 0  ;;  %v4836_v6 = vmul.f32 %v4604_v27, %v6373_v32 }
 0x118   : > { %v1148_v16 = vand.u32 2147483647, %v1147_v34  ;;  %v1384_v33 = vand.u32 8388607, %v6236_v18  ;;  %v1389_v44 = vsel %vm1388_vm12, %v1387_v10, 0  ;;  %v1227_v1 = vadd.s32 %v4704_v49, %v4720_v58 }
 0x119   : > { %6374 = vst [vmem:[#allocation14_spill] sm:$0xff] %v4836_v6  ;;  %vm3135_vm13 = vcmp.lt.s32.totalorder %v3134_v22, 0  ;;  %v1329_v7 = vmul.u32 %v4774_v45, %v1313_v52  ;;  %vm1331_vm14 = vc.u32 %v4822_v11, %v4825_v53  ;;  %v1332_v21 = vadd.s32 1, %v4826_v19 }
 0x11a   : > { %v1151_v55 = vmul.f32 %v1150_v57, %v1148_v16  ;;  %v1242_v35 = vsel %vm3135_vm13, 0, %v3134_v22  ;;  %v1391_v27 = vand.u32 31, %v1389_v44  ;;  %v4847_v3 = vmul.f32 6.2831855, %v4771_v47 }
 0x11b   : > { %v4849_v59 = vmul.f32 6.2831855, %v1057_v9  ;;  %v1243_v31 = vsub.s32 32, %v1242_v35  ;;  %v1247_v20 = vsub.s32 4294967266, %v1242_v35  ;;  %vm1070_vm15 = vcmp.lt.s32.totalorder %v4540_v42, 0 }
 0x11c   : > { %v1152_v49 = vxor.u32 2147483648, %v1151_v55  ;;  %v1333_v58 = vsel %vm1331_vm14, %v1332_v21, %v4826_v19  ;;  %v1392_v45 = vsub.s32 32, %v1391_v27  ;;  %v1244_v37 = vshll.u32 %v4795_v2, %v1242_v35 }
 0x11d   : > { %v1245_v56 = vshrl.u32 %v1227_v1, %v1243_v31  ;;  %v1248_v12 = vadd.s32 127, %v1247_v20  ;;  %v1334_v54 = vadd.s32 %v1333_v58, %v1329_v7  ;;  %v4856_v17 = vmul.f32 %v4609_v50, %v6375_v24 }
 0x11e   : > { %v4858_v47 = vmul.f32 6.2831855, %v1058_v40  ;;  %v6377_v9 = vand.u32 2147483647, %v4540_v42  ;;  %v1385_v52 = vor.u32 8388608, %v1384_v33  ;;  %v1390_v5 = vshrl.u32 %v1389_v44, 5 }
 0x11f   : > { %6376 = vst [vmem:[#allocation15_spill] sm:$0xff] %v4856_v17  ;;  %v1249_v60 = vshll.u32 %v1248_v12, 23  ;;  %v1335_v48 = vadd.s32 536870912, %v1334_v54  ;;  %v6380_v2 = vmov 683565275   ;;  %v1153_v34 = vsel %vm1070_vm15, %v1152_v49, %v1151_v55 }
 0x120   : > { %vm4862_vm0 = vcmp.le.f32.partialorder %v6377_v9, 0.7853982  ;;  %v1394_v10 = vshll.u32 %v6380_v2, %v1391_v27  ;;  %v6381_v57 = vmov 2475754826   ;;  %v6382_v29 = vmov 2131351028  }
 0x121   : > { %v1395_v50 = vshrl.u32 %v6381_v57, %v1392_v45  ;;  %v1397_v19 = vshll.u32 %v6381_v57, %v1391_v27  ;;  %v1398_v40 = vshrl.u32 %v6382_v29, %v1392_v45  ;;  %v1246_v22 = vor.u32 %v1245_v56, %v1244_v37 }
 0x122   : > { %v1250_v32 = vor.u32 4788187, %v1249_v60  ;;  %v4872_v16 = vshrl.u32 %v1335_v48, 30  ;;  %v1400_v33 = vshll.u32 %v6382_v29, %v1391_v27  ;;  %v6383_v1 = vmov 2102212464  }
 0x123   : > { %v1401_v7 = vshrl.u32 %v6383_v1, %v1392_v45  ;;  %v1403_v44 = vshll.u32 %v6383_v1, %v1391_v27  ;;  %v1404_v35 = vshrl.u32 %v6252_v30, %v1392_v45  ;;  %v1406_v55 = vshll.u32 %v6252_v30, %v1391_v27 }
 0x124   : > { %v4879_v21 = vmul.f32 6.2831855, %v1059_v51  ;;  %v1337_v31 = vshll.u32 %v4872_v16, 30  ;;  %v1407_v20 = vshrl.u32 %v6242_v63, %v1392_v45  ;;  %v4883_v49 = vshll.u32 %v1385_v52, 8 }
 0x125   : > { %v1156_v58 = vsel %vm4862_vm0, %v4540_v42, %v1153_v34  ;;  %v1396_v37 = vor.u32 %v1395_v50, %v1394_v10  ;;  %v1399_v56 = vor.u32 %v1398_v40, %v1397_v19  ;;  %v1405_v12 = vor.u32 %v1404_v35, %v1403_v44 }
 0x126   : > { %v4888_v24 = vsub.s32 %v1334_v54, %v1337_v31  ;;  %v1402_v9 = vor.u32 %v1401_v7, %v1400_v33  ;;  %v1408_v60 = vor.u32 %v1407_v20, %v1406_v55  ;;  %vm1409_vm1 = vcmp.lt.s32.totalorder %v1390_v5, 1 }
 0x127   : > { %v1251_v51 = vand.u32 2147483647, %v1250_v32  ;;  %v1253_v27 = vcvt.s32.f32 %v1246_v22  ;;  %v1393_v48 = vshrl.u32 %v6380_v2, %v1392_v45  ;;  %vm1412_vm2 = vcmp.lt.s32.totalorder %v1390_v5, 4 }
 0x128   : > { %3581 = vcosq.f32 %v1156_v58  ;;  %v1340_v52 = vsub.s32 0, %v4888_v24  ;;  %vm1411_vm3 = vcmp.lt.s32.totalorder %v1390_v5, 3  ;;  %v1414_v18 = vsel %vm1412_vm2, %v1402_v9, 2102212464 }
 0x129   : > { %vm1410_vm4 = vcmp.lt.s32.totalorder %v1390_v5, 2  ;;  %v1417_v10 = vsel %vm1409_vm1, %v1396_v37, %v1399_v56  ;;  %v1418_v34 = vsel %vm1412_vm2, %v1405_v12, 920167782  ;;  %v1422_v50 = vsel %vm1412_vm2, %v1408_v60, 1326507024 }
 0x12a   : > { %3583 = vsinq.f32 %v1156_v58  ;;  %v3137_v54 = vmin.u32 %v1340_v52, %v4888_v24  ;;  %v1421_v19 = vsel %vm1409_vm1, %v1399_v56, %v1402_v9  ;;  %v1483_v40 = vand.u32 2139095040, %v4847_v3 }
 0x12b   : > { %v1254_v22 = vmul.f32 %v1253_v27, %v1251_v51  ;;  %v1413_v45 = vsel %vm1409_vm1, %v1393_v48, %v1396_v37  ;;  %v1415_v32 = vsel %vm1411_vm3, %v1399_v56, %v1414_v18  ;;  %v1419_v33 = vsel %vm1411_vm3, %v1402_v9, %v1418_v34 }
 0x12c   : > { %vm1173_vm5 = vcmp.lt.s32.totalorder %v4543_v8, 0  ;;  %v1342_v7 = vclz %v3137_v54  ;;  %v1420_v44 = vsel %vm1410_vm4, %v1417_v10, %v1419_v33  ;;  %v1423_v35 = vsel %vm1411_vm3, %v1405_v12, %v1422_v50 }
 0x12d   : > { %v1154_v55 = vsub.s32 4, %v4716_v26  ;;  %v1424_v31 = vsel %vm1410_vm4, %v1421_v19, %v1423_v35  ;;  %v4905_v20 = vmul.u32.u64.low %v4883_v49, %v1420_v44  ;;  %v4906_v58 = vmul.u32.u64.high %v4883_v49, %v1420_v44, %v4905_v20 }
 0x12e   : > { %v3138_v37 = vadd.s32 4294967294, %v1342_v7  ;;  %v1416_v18 = vsel %vm1410_vm4, %v1413_v45, %v1415_v32  ;;  %v4910_v56 = vmul.u32.u64.low %v4883_v49, %v1424_v31  ;;  %v4911_v9 = vmul.u32.u64.high %v4883_v49, %v1424_v31, %v4910_v56 }
 0x12f   : > { %v6384_v60 = vand.u32 2147483647, %v4543_v8  ;;  %v1255_v12 = vxor.u32 2147483648, %v1254_v22  ;;  %vm1276_vm7 = vcmp.lt.s32.totalorder %v4550_v61, 0  ;;  %v1484_v27 = vshrl.u32 %v1483_v40, 23 }
 0x130   : > { %v1257_v48 = vsub.s32 4, %v4780_v15  ;;  %v1330_v5 = vadd.s32 %v4825_v53, %v4822_v11  ;;  %vm3139_vm8 = vcmp.lt.s32.totalorder %v3138_v37, 0  ;;  %v6237_v52 = vand.u32 2147483647, %v4847_v3 }
 0x131   : > { %vm4915_vm6 = vcmp.le.f32.partialorder %v6384_v60, 0.7853982  ;;  %v1345_v10 = vsel %vm3139_vm8, 0, %v3138_v37  ;;  %v1432_v34 = vmul.u32 %v4883_v49, %v1416_v18  ;;  %v1435_v50 = vadd.s32 1, %v4906_v58 }
 0x132   : > { %v3144_v54 = vadd.s32 4294967169, %v1484_v27  ;;  %v1155_v19 = vsel %vm1070_vm15, %v1154_v55, %v4716_v26  ;;  %v1346_v45 = vsub.s32 32, %v1345_v10  ;;  %v1347_v40 = vshll.u32 %v4888_v24, %v1345_v10 }
 0x133   : > { %v1350_v32 = vsub.s32 4294967266, %v1345_v10  ;;  %v1256_v11 = vsel %vm1173_vm5, %v1255_v12, %v1254_v22  ;;  %v1360_v53 = vsub.s32 4, %v4872_v16  ;;  %vm1434_vm9 = vc.u32 %v4911_v9, %v4905_v20 }
 0x134   : > { %v1490_v33 = vadd.s32 1, %v3144_v54  ;;  %v6387_v49 = vand.u32 2147483647, %v4550_v61  ;;  %v1348_v44 = vshrl.u32 %v1330_v5, %v1346_v45  ;;  %v1436_v35 = vsel %vm1434_vm9, %v1435_v50, %v4906_v58 }
 0x135   : > { %v1351_v26 = vadd.s32 127, %v1350_v32  ;;  %v4941_v24 = vpop.eup %3581  ;;  %v4945_v22 = vsel %vm4862_vm0, 0, %v1155_v19  ;;  %v1258_v55 = vsel %vm1173_vm5, %v1257_v48, %v4780_v15  ;;  %v1437_v31 = vadd.s32 %v1436_v35, %v1432_v34 }
 0x136   : > { %vm4936_vm10 = vcmp.le.f32.partialorder %v6387_v49, 0.7853982  ;;  %vm1491_vm11 = vcmp.gt.s32.totalorder %v1490_v33, 0  ;;  %v1259_v37 = vsel %vm4915_vm6, %v4543_v8, %v1256_v11  ;;  %v1349_v18 = vor.u32 %v1348_v44, %v1347_v40 }
 0x137   : > { %v1352_v56 = vshll.u32 %v1351_v26, 23  ;;  %v1492_v60 = vsel %vm1491_vm11, %v1490_v33, 0  ;;  %v4953_v58 = vpop.eup %3583  ;;  %v1361_v39 = vsel %vm1276_vm7, %v1360_v53, %v4872_v16  ;;  %v1438_v12 = vadd.s32 536870912, %v1437_v31 }
 0x138   : > { %v1487_v27 = vand.u32 8388607, %v6237_v52  ;;  %v1494_v15 = vand.u32 31, %v1492_v60  ;;  %v4961_v48 = vand.u32 3, %v4945_v22  ;;  %v4965_v5 = vsel %vm4915_vm6, 0, %v1258_v55 }
 0x139   : > { %v1353_v10 = vor.u32 4788187, %v1352_v56  ;;  %v1356_v34 = vcvt.s32.f32 %v1349_v18  ;;  %3585 = vcosq.f32 %v1259_v37  ;;  %v4968_v50 = vand.u32 3, %v4965_v5 }
 0x13a   : > { %v4970_v54 = vshrl.u32 %v1438_v12, 30  ;;  %v1495_v16 = vsub.s32 32, %v1494_v15  ;;  %3587 = vsinq.f32 %v1259_v37  ;;  %v4975_v40 = vsel %vm4936_vm10, 0, %v1361_v39 }
 0x13b   : > { %v1354_v45 = vand.u32 2147483647, %v1353_v10  ;;  %v1488_v11 = vor.u32 8388608, %v1487_v27  ;;  %v1586_v53 = vand.u32 2139095040, %v4849_v59  ;;  %v4981_v49 = vadd.s32 %v4905_v20, %v4911_v9 }
 0x13c   : > { %v1440_v32 = vshll.u32 %v4970_v54, 30  ;;  %v1497_v44 = vshll.u32 %v6380_v2, %v1494_v15  ;;  %v1498_v55 = vshrl.u32 %v6381_v57, %v1495_v16  ;;  %v1500_v37 = vshll.u32 %v6381_v57, %v1494_v15 }
 0x13d   : > { %v1357_v33 = vmul.f32 %v1356_v34, %v1354_v45  ;;  %v1501_v18 = vshrl.u32 %v6382_v29, %v1495_v16  ;;  %v1503_v39 = vshll.u32 %v6382_v29, %v1494_v15  ;;  %v1504_v12 = vshrl.u32 %v6383_v1, %v1495_v16 }
 0x13e   : > { %v4985_v35 = vsub.s32 %v1437_v31, %v1440_v32  ;;  %v1506_v20 = vshll.u32 %v6383_v1, %v1494_v15  ;;  %v1493_v27 = vshrl.u32 %v1492_v60, 5  ;;  %v4994_v10 = vshll.u32 %v1488_v11, 8 }
 0x13f   : > { %v1358_v56 = vxor.u32 2147483648, %v1357_v33  ;;  %v1587_v31 = vshrl.u32 %v1586_v53, 23  ;;  %vm1166_vm12 = vcmp.eq.s32.totalorder %v4961_v48, 2  ;;  %v1496_v45 = vshrl.u32 %v6380_v2, %v1495_v16 }
 0x140   : > { %v1443_v9 = vsub.s32 0, %v4985_v35  ;;  %v1507_v32 = vshrl.u32 %v6252_v30, %v1495_v16  ;;  %v1509_v52 = vshll.u32 %v6252_v30, %v1494_v15  ;;  %vm1163_vm13 = vcmp.eq.s32.totalorder %v4961_v48, 0 }
 0x141   : > { %v1359_v34 = vsel %vm1276_vm7, %v1358_v56, %v1357_v33  ;;  %v1499_v53 = vor.u32 %v1498_v55, %v1497_v44  ;;  %v1502_v51 = vor.u32 %v1501_v18, %v1500_v37  ;;  %v1463_v19 = vsub.s32 4, %v4970_v54 }
 0x142   : > { %v1362_v60 = vsel %vm4936_vm10, %v4550_v61, %v1359_v34  ;;  %v3141_v11 = vmin.u32 %v1443_v9, %v4985_v35  ;;  %v1505_v26 = vor.u32 %v1504_v12, %v1503_v39  ;;  %v1508_v33 = vor.u32 %v1507_v32, %v1506_v20 }
 0x143   : > { %v1510_v56 = vshrl.u32 %v6242_v63, %v1495_v16  ;;  %3589 = vcosq.f32 %v1362_v60  ;;  %vm1512_vm14 = vcmp.lt.s32.totalorder %v1493_v27, 1  ;;  %vm1513_vm15 = vcmp.lt.s32.totalorder %v1493_v27, 2 }
 0x144   : > { %v1445_v28 = vclz %v3141_v11  ;;  %vm1379_vm0 = vcmp.lt.s32.totalorder %v4731_v62, 0  ;;  %vm1514_vm1 = vcmp.lt.s32.totalorder %v1493_v27, 3  ;;  %vm1515_vm2 = vcmp.lt.s32.totalorder %v1493_v27, 4 }
 0x145   : > { %v1511_v15 = vor.u32 %v1510_v56, %v1509_v52  ;;  %v1516_v7 = vsel %vm1512_vm14, %v1496_v45, %v1499_v53  ;;  %v1517_v44 = vsel %vm1515_vm2, %v1505_v26, 2102212464  ;;  %v1520_v55 = vsel %vm1512_vm14, %v1499_v53, %v1502_v51 }
 0x146   : > { %v3142_v9 = vadd.s32 4294967294, %v1445_v28  ;;  %v1521_v37 = vsel %vm1515_vm2, %v1508_v33, 920167782  ;;  %v5012_v18 = vpop.eup %3585  ;;  %vm1162_vm3 = vcmp.lt.s32.totalorder %v4961_v48, 2  ;;  %vm1269_vm4 = vcmp.eq.s32.totalorder %v4968_v50, 2 }
 0x147   : > { %v1518_v16 = vsel %vm1514_vm1, %v1502_v51, %v1517_v44  ;;  %v1522_v39 = vsel %vm1514_vm1, %v1505_v26, %v1521_v37  ;;  %v1524_v52 = vsel %vm1512_vm14, %v1502_v51, %v1505_v26  ;;  %v1525_v12 = vsel %vm1515_vm2, %v1511_v15, 1326507024  ;;  %v5019_v20 = vpop.eup %3587 }
 0x148   : > { %vm1266_vm5 = vcmp.eq.s32.totalorder %v4968_v50, 0  ;;  %3591 = vsinq.f32 %v1362_v60  ;;  %vm3143_vm6 = vcmp.lt.s32.totalorder %v3142_v9, 0  ;;  %v1523_v28 = vsel %vm1513_vm15, %v1520_v55, %v1522_v39 }
 0x149   : > { %v1526_v34 = vsel %vm1514_vm1, %v1508_v33, %v1525_v12  ;;  %v1448_v45 = vsel %vm3143_vm6, 0, %v3142_v9  ;;  %v5026_v11 = vmul.u32.u64.low %v4994_v10, %v1523_v28  ;;  %v5027_v53 = vmul.u32.u64.high %v4994_v10, %v1523_v28, %v5026_v11 }
 0x14a   : > { %v1527_v32 = vsel %vm1513_vm15, %v1524_v52, %v1526_v34  ;;  %v6390_v51 = vand.u32 2147483647, %v4731_v62  ;;  %v1449_v56 = vsub.s32 32, %v1448_v45  ;;  %v1450_v60 = vshll.u32 %v4985_v35, %v1448_v45 }
 0x14b   : > { %v1453_v15 = vsub.s32 4294967266, %v1448_v45  ;;  %v1519_v44 = vsel %vm1513_vm15, %v1516_v7, %v1518_v16  ;;  %v5038_v33 = vmul.u32.u64.low %v4994_v10, %v1527_v32  ;;  %v5039_v9 = vmul.u32.u64.high %v4994_v10, %v1527_v32, %v5038_v33 }
 0x14c   : > { %vm5031_vm7 = vcmp.le.f32.partialorder %v6390_v51, 0.7853982  ;;  %v3148_v55 = vadd.s32 4294967169, %v1587_v31  ;;  %v6393_v37 = vand.u32 2147483647, %v4849_v59  ;;  %v6394_v52 = vxor.u32 2147483648, %v4941_v24 }
 0x14d   : > { %v5049_v28 = vand.u32 3, %v4975_v40  ;;  %v1451_v35 = vshrl.u32 %v4981_v49, %v1449_v56  ;;  %v1454_v27 = vadd.s32 127, %v1453_v15  ;;  %v6395_v7 = vxor.u32 2147483648, %v4953_v58 }
 0x14e   : > { %v1590_v39 = vand.u32 8388607, %v6393_v37  ;;  %v1168_v12 = vsel %vm1166_vm12, %v6394_v52, %v4953_v58  ;;  %v1535_v16 = vmul.u32 %v4994_v10, %v1519_v44  ;;  %v1538_v34 = vadd.s32 1, %v5027_v53 }
 0x14f   : > { %v1165_v31 = vsel %vm1163_vm13, %v4941_v24, %v6395_v7  ;;  %v1593_v45 = vadd.s32 1, %v3148_v55  ;;  %v6239_v32 = vxor.u32 2147483648, %v5012_v18  ;;  %v1452_v51 = vor.u32 %v1451_v35, %v1450_v60 }
 0x150   : > { %v1455_v33 = vshll.u32 %v1454_v27, 23  ;;  %v1464_v49 = vsel %vm1379_vm0, %v1463_v19, %v4970_v54  ;;  %vm1537_vm8 = vc.u32 %v5039_v9, %v5026_v11  ;;  %v1591_v56 = vor.u32 8388608, %v1590_v39  ;;  %v5066_v55 = vpop.eup %3589 }
 0x151   : > { %vm1594_vm9 = vcmp.gt.s32.totalorder %v1593_v45, 0  ;;  %v6241_v15 = vand.u32 2147483647, %v4858_v47  ;;  %v1459_v52 = vcvt.s32.f32 %v1452_v51  ;;  %v1539_v10 = vsel %vm1537_vm8, %v1538_v34, %v5027_v53  ;;  %6396 = vst [vmem:[#allocation16_spill] sm:$0xff] %v5066_v55 }
 0x152   : > { %v1456_v37 = vor.u32 4788187, %v1455_v33  ;;  %v1595_v44 = vsel %vm1594_vm9, %v1593_v45, 0  ;;  %v6240_v60 = vxor.u32 2147483648, %v5019_v20  ;;  %v1540_v35 = vadd.s32 %v1539_v10, %v1535_v16 }
 0x153   : > { %v1597_v27 = vand.u32 31, %v1595_v44  ;;  %v1689_v7 = vand.u32 2139095040, %v4858_v47  ;;  %v5072_v54 = vsel %vm1162_vm3, %v1165_v31, %v1168_v12  ;;  %v5079_v19 = vsel %vm1269_vm4, %v6239_v32, %v5019_v20 }
 0x154   : > { %vm1372_vm10 = vcmp.eq.s32.totalorder %v5049_v28, 2  ;;  %v1457_v53 = vand.u32 2147483647, %v1456_v37  ;;  %v5087_v39 = vsel %vm1266_vm5, %v5012_v18, %v6240_v60  ;;  %v5091_v48 = vsel %vm5031_vm7, 0, %v1464_v49 }
 0x155   : > { %v1541_v12 = vadd.s32 536870912, %v1540_v35  ;;  %v1598_v31 = vsub.s32 32, %v1597_v27  ;;  %v5094_v34 = vadd.s32 %v5026_v11, %v5039_v9  ;;  %v5096_v45 = vshll.u32 %v1591_v56, 8  ;;  %v5102_v33 = vpop.eup %3591 }
 0x156   : > { %v1460_v16 = vmul.f32 %v1459_v52, %v1457_v53  ;;  %v5100_v51 = vand.u32 8388607, %v6241_v15  ;;  %6397 = vst [vmem:[#allocation17_spill] sm:$0xff] %v5102_v33  ;;  %v1600_v10 = vshll.u32 %v6380_v2, %v1597_v27  ;;  %v1690_v32 = vshrl.u32 %v1689_v7, 23 }
 0x157   : > { %v5104_v37 = vshrl.u32 %v1541_v12, 30  ;;  %v1601_v49 = vshrl.u32 %v6381_v57, %v1598_v31  ;;  %v1596_v52 = vshrl.u32 %v1595_v44, 5  ;;  %v1603_v11 = vshll.u32 %v6381_v57, %v1597_v27 }
 0x158   : > { %v1461_v60 = vxor.u32 2147483648, %v1460_v16  ;;  %v1604_v9 = vshrl.u32 %v6382_v29, %v1598_v31  ;;  %vm1369_vm11 = vcmp.eq.s32.totalorder %v5049_v28, 0  ;;  %v1606_v53 = vshll.u32 %v6382_v29, %v1597_v27 }
 0x159   : > { %v1543_v56 = vshll.u32 %v5104_v37, 30  ;;  %v1607_v12 = vshrl.u32 %v6383_v1, %v1598_v31  ;;  %v1609_v15 = vshll.u32 %v6383_v1, %v1597_v27  ;;  %v1610_v14 = vshrl.u32 %v6252_v30, %v1598_v31 }
 0x15a   : > { %v1462_v44 = vsel %vm1379_vm0, %v1461_v60, %v1460_v16  ;;  %v1599_v43 = vshrl.u32 %v6380_v2, %v1598_v31  ;;  %v1602_v41 = vor.u32 %v1601_v49, %v1600_v10  ;;  %v1612_v0 = vshll.u32 %v6252_v30, %v1597_v27 }
 0x15b   : > { %v5120_v25 = vsub.s32 %v1540_v35, %v1543_v56  ;;  %v1465_v17 = vsel %vm5031_vm7, %v4731_v62, %v1462_v44  ;;  %v1605_v6 = vor.u32 %v1604_v9, %v1603_v11  ;;  %v1611_v63 = vor.u32 %v1610_v14, %v1609_v15 }
 0x15c   : > { %v6398_v36 = vmov 1326507024   ;;  %vm1482_vm12 = vcmp.lt.s32.totalorder %v4847_v3, 0  ;;  %v1608_v16 = vor.u32 %v1607_v12, %v1606_v53  ;;  %vm1615_vm13 = vcmp.lt.s32.totalorder %v1596_v52, 1 }
 0x15d   : > { %v1613_v7 = vshrl.u32 %v6398_v36, %v1598_v31  ;;  %v1546_v60 = vsub.s32 0, %v5120_v25  ;;  %v3152_v35 = vadd.s32 4294967169, %v1690_v32  ;;  %vm1265_vm14 = vcmp.lt.s32.totalorder %v4968_v50, 2 }
 0x15e   : > { %v6399_v27 = vxor.u32 2147483648, %v5066_v55  ;;  %vm1617_vm15 = vcmp.lt.s32.totalorder %v1596_v52, 3  ;;  %vm1618_vm0 = vcmp.lt.s32.totalorder %v1596_v52, 4  ;;  %vm1160_vm1 = vweird.f32 %v4540_v42 }
 0x15f   : > { %v1614_v10 = vor.u32 %v1613_v7, %v1612_v0  ;;  %vm1368_vm2 = vcmp.lt.s32.totalorder %v5049_v28, 2  ;;  %3593 = vcosq.f32 %v1465_v17  ;;  %v3145_v14 = vmin.u32 %v1546_v60, %v5120_v25 }
 0x160   : > { %v1374_v26 = vsel %vm1372_vm10, %v6399_v27, %v5102_v33  ;;  %v1566_v32 = vsub.s32 4, %v5104_v37  ;;  %vm1616_vm3 = vcmp.lt.s32.totalorder %v1596_v52, 2  ;;  %v1619_v15 = vsel %vm1615_vm13, %v1599_v43, %v1602_v41 }
 0x161   : > { %v1620_v31 = vsel %vm1618_vm0, %v1608_v16, 2102212464  ;;  %v1623_v49 = vsel %vm1615_vm13, %v1602_v41, %v1605_v6  ;;  %v1624_v0 = vsel %vm1618_vm0, %v1611_v63, 920167782  ;;  %v1548_v11 = vclz %v3145_v14 }
 0x162   : > { %v1621_v9 = vsel %vm1617_vm15, %v1605_v6, %v1620_v31  ;;  %v1625_v56 = vsel %vm1617_vm15, %v1608_v16, %v1624_v0  ;;  %v1627_v53 = vsel %vm1615_vm13, %v1605_v6, %v1608_v16  ;;  %v1628_v44 = vsel %vm1618_vm0, %v1614_v10, 1326507024 }
 0x163   : > { %v1622_v12 = vsel %vm1616_vm3, %v1619_v15, %v1621_v9  ;;  %v1626_v7 = vsel %vm1616_vm3, %v1623_v49, %v1625_v56  ;;  %v1696_v43 = vadd.s32 1, %v3152_v35  ;;  %v3146_v60 = vadd.s32 4294967294, %v1548_v11 }
 0x164   : > { %v1629_v27 = vsel %vm1617_vm15, %v1611_v63, %v1628_v44  ;;  %v5152_v41 = vmul.u32.u64.low %v5096_v45, %v1626_v7  ;;  %v5153_v30 = vmul.u32.u64.high %v5096_v45, %v1626_v7, %v5152_v41  ;;  %v6400_v14 = vxor.u32 2147483648, %v5102_v33 }
 0x165   : > { %3595 = vsinq.f32 %v1465_v17  ;;  %v1630_v16 = vsel %vm1616_vm3, %v1627_v53, %v1629_v27  ;;  %vm1697_vm4 = vcmp.gt.s32.totalorder %v1696_v43, 0  ;;  %vm3147_vm5 = vcmp.lt.s32.totalorder %v3146_v60, 0 }
 0x166   : > { %v1371_v6 = vsel %vm1369_vm11, %v5066_v55, %v6400_v14  ;;  %v5163_v35 = vmul.u32.u64.low %v5096_v45, %v1630_v16  ;;  %v5164_v10 = vmul.u32.u64.high %v5096_v45, %v1630_v16, %v5163_v35  ;;  %v1698_v63 = vsel %vm1697_vm4, %v1696_v43, 0 }
 0x167   : > { %v1551_v15 = vsel %vm3147_vm5, 0, %v3146_v60  ;;  %v1567_v31 = vsel %vm1482_vm12, %v1566_v32, %v5104_v37  ;;  %v1638_v49 = vmul.u32 %v5096_v45, %v1622_v12  ;;  %v1700_v0 = vand.u32 31, %v1698_v63 }
 0x168   : > { %v1552_v11 = vsub.s32 32, %v1551_v15  ;;  %v1553_v17 = vshll.u32 %v5120_v25, %v1551_v15  ;;  %v1556_v52 = vsub.s32 4294967266, %v1551_v15  ;;  %v1641_v9 = vadd.s32 1, %v5153_v30 }
 0x169   : > { %v5175_v56 = vsel %vm1160_vm1, nan, %v5072_v54  ;;  %v5178_v53 = vand.u32 3, %v5091_v48  ;;  %v6401_v7 = vand.u32 2147483647, %v4847_v3  ;;  %v1701_v45 = vsub.s32 32, %v1700_v0 }
 0x16a   : > { %v5190_v25 = vsel %vm1265_vm14, %v5087_v39, %v5079_v19  ;;  %v1554_v32 = vshrl.u32 %v5094_v34, %v1552_v11  ;;  %v1557_v54 = vadd.s32 127, %v1556_v52  ;;  %vm1640_vm7 = vc.u32 %v5164_v10, %v5152_v41 }
 0x16b   : > { %vm5182_vm6 = vcmp.le.f32.partialorder %v6401_v7, 0.7853982  ;;  %v5197_v12 = vsel %vm1368_vm2, %v1371_v6, %v1374_v26  ;;  %v1642_v43 = vsel %vm1640_vm7, %v1641_v9, %v5153_v30  ;;  %v1694_v50 = vor.u32 8388608, %v5100_v51 }
 0x16c   : > { %v5201_v44 = vsel %vm5182_vm6, 0, %v1567_v31  ;;  %v1555_v19 = vor.u32 %v1554_v32, %v1553_v17  ;;  %v1558_v39 = vshll.u32 %v1557_v54, 23  ;;  %v1643_v60 = vadd.s32 %v1642_v43, %v1638_v49  ;;  %v5206_v27 = vpop.eup %3593 }
 0x16d   : > { %v1703_v34 = vshll.u32 %v6380_v2, %v1700_v0  ;;  %vm1472_vm8 = vcmp.eq.s32.totalorder %v5178_v53, 0  ;;  %vm1475_vm9 = vcmp.eq.s32.totalorder %v5178_v53, 2  ;;  %v1704_v28 = vshrl.u32 %v6381_v57, %v1701_v45 }
 0x16e   : > { %v1706_v26 = vshll.u32 %v6381_v57, %v1700_v0  ;;  %v1707_v14 = vshrl.u32 %v6382_v29, %v1701_v45  ;;  %v1709_v30 = vshll.u32 %v6382_v29, %v1700_v0  ;;  %v1559_v51 = vor.u32 4788187, %v1558_v39 }
 0x16f   : > { %v1562_v6 = vcvt.s32.f32 %v1555_v19  ;;  %v1644_v16 = vadd.s32 536870912, %v1643_v60  ;;  %v1710_v35 = vshrl.u32 %v6383_v1, %v1701_v45  ;;  %v5216_v15 = vand.u32 3, %v5201_v44 }
 0x170   : > { %v1699_v31 = vshrl.u32 %v1698_v63, 5  ;;  %v1712_v49 = vshll.u32 %v6383_v1, %v1700_v0  ;;  %v5219_v11 = vshll.u32 %v1694_v50, 8  ;;  %v1560_v17 = vand.u32 2147483647, %v1559_v51 }
 0x171   : > { %v5221_v52 = vshrl.u32 %v1644_v16, 30  ;;  %v1702_v9 = vshrl.u32 %v6380_v2, %v1701_v45  ;;  %v6404_v7 = vmov 920167782   ;;  %v1705_v54 = vor.u32 %v1704_v28, %v1703_v34 }
 0x172   : > { %v1713_v32 = vshrl.u32 %v6404_v7, %v1701_v45  ;;  %v1708_v43 = vor.u32 %v1707_v14, %v1706_v26  ;;  %v1715_v19 = vshll.u32 %v6404_v7, %v1700_v0  ;;  %v1716_v39 = vshrl.u32 %v6398_v36, %v1701_v45  ;;  %v5227_v42 = vpop.eup %3595 }
 0x173   : > { %vm1471_vm10 = vcmp.lt.s32.totalorder %v5178_v53, 2  ;;  %v1563_v63 = vmul.f32 %v1562_v6, %v1560_v17  ;;  %v1646_v50 = vshll.u32 %v5221_v52, 30  ;;  %v1711_v51 = vor.u32 %v1710_v35, %v1709_v30 }
 0x174   : > { %v1714_v16 = vor.u32 %v1713_v32, %v1712_v49  ;;  %vm1263_vm11 = vweird.f32 %v4543_v8  ;;  %v6261_v55 = vxor.u32 2147483648, %v5206_v27  ;;  %v1717_v33 = vor.u32 %v1716_v39, %v1715_v19 }
 0x175   : > { %vm1718_vm13 = vcmp.lt.s32.totalorder %v1699_v31, 1  ;;  %vm1721_vm14 = vcmp.lt.s32.totalorder %v1699_v31, 4  ;;  %vm1366_vm15 = vweird.f32 %v4550_v61  ;;  %v1564_v0 = vxor.u32 2147483648, %v1563_v63 }
 0x176   : > { %v5234_v45 = vsub.s32 %v1643_v60, %v1646_v50  ;;  %vm1720_vm0 = vcmp.lt.s32.totalorder %v1699_v31, 3  ;;  %v1723_v34 = vsel %vm1721_vm14, %v1711_v51, 2102212464  ;;  %v1473_v28 = vxor.u32 2147483648, %v5227_v42 }
 0x177   : > { %vm1719_vm2 = vcmp.lt.s32.totalorder %v1699_v31, 2  ;;  %v1722_v26 = vsel %vm1718_vm13, %v1702_v9, %v1705_v54  ;;  %v1727_v14 = vsel %vm1721_vm14, %v1714_v16, 920167782  ;;  %v1565_v30 = vsel %vm1482_vm12, %v1564_v0, %v1563_v63 }
 0x178   : > { %vm1585_vm3 = vcmp.lt.s32.totalorder %v4849_v59, 0  ;;  %v1649_v6 = vsub.s32 0, %v5234_v45  ;;  %v1724_v60 = vsel %vm1720_vm0, %v1708_v43, %v1723_v34  ;;  %v1726_v35 = vsel %vm1718_vm13, %v1705_v54, %v1708_v43 }
 0x179   : > { %v1568_v49 = vsel %vm5182_vm6, %v4847_v3, %v1565_v30  ;;  %v1728_v17 = vsel %vm1720_vm0, %v1711_v51, %v1727_v14  ;;  %v1730_v9 = vsel %vm1718_vm13, %v1708_v43, %v1711_v51  ;;  %v1731_v32 = vsel %vm1721_vm14, %v1717_v33, 1326507024 }
 0x17a   : > { %vm1469_vm12 = vweird.f32 %v4731_v62  ;;  %v1474_v19 = vsel %vm1472_vm8, %v5206_v27, %v1473_v28  ;;  %v1477_v37 = vsel %vm1475_vm9, %v6261_v55, %v5227_v42  ;;  %3597 = vcosq.f32 %v1568_v49 }
 0x17b   : > { %v3149_v54 = vmin.u32 %v1649_v6, %v5234_v45  ;;  %3599 = vsinq.f32 %v1568_v49  ;;  %v1725_v33 = vsel %vm1719_vm2, %v1722_v26, %v1724_v60  ;;  %v1729_v43 = vsel %vm1719_vm2, %v1726_v35, %v1728_v17 }
 0x17c   : > { %v1732_v39 = vsel %vm1720_vm0, %v1714_v16, %v1731_v32  ;;  %v5269_v51 = vmul.u32.u64.low %v5219_v11, %v1729_v43  ;;  %v5270_v0 = vmul.u32.u64.high %v5219_v11, %v1729_v43, %v5269_v51  ;;  %v1669_v34 = vsub.s32 4, %v5221_v52 }
 0x17d   : > { %v1651_v63 = vclz %v3149_v54  ;;  %v1733_v50 = vsel %vm1719_vm2, %v1730_v9, %v1732_v39  ;;  %v1789_v6 = vand.u32 2147483647, %v4879_v21  ;;  %v1273_v26 = vsel %vm1263_vm11, nan, %v5190_v25 }
 0x17e   : > { %v5274_v14 = vmul.u32.u64.low %v5219_v11, %v1733_v50  ;;  %v5275_v30 = vmul.u32.u64.high %v5219_v11, %v1733_v50, %v5274_v14  ;;  %v6405_v16 = vand.u32 2147483647, %v4849_v59  ;;  %v1792_v35 = vand.u32 2139095040, %v4879_v21 }
 0x17f   : > { %v3150_v60 = vadd.s32 4294967294, %v1651_v63  ;;  %v1376_v49 = vsel %vm1366_vm15, nan, %v5197_v12  ;;  %v1478_v17 = vsel %vm1471_vm10, %v1474_v19, %v1477_v37  ;;  %v1639_v9 = vadd.s32 %v5152_v41, %v5164_v10 }
 0x180   : > { %vm5283_vm4 = vcmp.le.f32.partialorder %v6405_v16, 0.7853982  ;;  %v1741_v25 = vmul.u32 %v5219_v11, %v1725_v33  ;;  %v1744_v32 = vadd.s32 1, %v5270_v0  ;;  %v1793_v54 = vshrl.u32 %v1792_v35, 23 }
 0x181   : > { %vm3151_vm5 = vcmp.lt.s32.totalorder %v3150_v60, 0  ;;  %v1796_v43 = vand.u32 8388607, %v1789_v6  ;;  %vm1575_vm6 = vcmp.eq.s32.totalorder %v5216_v15, 0  ;;  %v1670_v53 = vsel %vm1585_vm3, %v1669_v34, %v5221_v52 }
 0x182   : > { %v1654_v39 = vsel %vm3151_vm5, 0, %v3150_v60  ;;  %vm1743_vm7 = vc.u32 %v5275_v30, %v5269_v51  ;;  %v1479_v19 = vsel %vm1469_vm12, nan, %v1478_v17  ;;  %vm1578_vm8 = vcmp.eq.s32.totalorder %v5216_v15, 2 }
 0x183   : > { %v1655_v12 = vsub.s32 32, %v1654_v39  ;;  %v1656_v41 = vshll.u32 %v5234_v45, %v1654_v39  ;;  %v1659_v10 = vsub.s32 4294967266, %v1654_v39  ;;  %v1745_v11 = vsel %vm1743_vm7, %v1744_v32, %v5270_v0 }
 0x184   : > { %v1746_v37 = vadd.s32 %v1745_v11, %v1741_v25  ;;  %v3156_v33 = vadd.s32 4294967169, %v1793_v54  ;;  %vm1574_vm9 = vcmp.lt.s32.totalorder %v5216_v15, 2  ;;  %v5312_v52 = vsel %vm5283_vm4, 0, %v1670_v53 }
 0x185   : > { %v1657_v63 = vshrl.u32 %v1639_v9, %v1655_v12  ;;  %v1660_v50 = vadd.s32 127, %v1659_v10  ;;  %v1797_v34 = vor.u32 8388608, %v1796_v43  ;;  %vm1688_vm10 = vcmp.lt.s32.totalorder %v4858_v47, 0 }
 0x186   : > { %v1747_v45 = vadd.s32 536870912, %v1746_v37  ;;  %v1799_v0 = vadd.s32 1, %v3156_v33  ;;  %v1892_v14 = vmul.f32 %v5175_v56, %v4554_v38  ;;  %v1893_v16 = vmul.f32 %v1273_v26, %v4561_v4 }
 0x187   : > { %v1658_v60 = vor.u32 %v1657_v63, %v1656_v41  ;;  %v1661_v35 = vshll.u32 %v1660_v50, 23  ;;  %v5319_v17 = vand.u32 3, %v5312_v52  ;;  %v1894_v9 = vmul.f32 %v1376_v49, %v4564_v46  ;;  %v5322_v25 = vpop.eup %3597 }
 0x188   : > { %v5325_v32 = vadd.s32 %v5269_v51, %v5275_v30  ;;  %v1748_v54 = vshrl.u32 %v1747_v45, 30  ;;  %vm1800_vm13 = vcmp.gt.s32.totalorder %v1799_v0, 0  ;;  %v1895_v43 = vmul.f32 %v1479_v19, %v4724_v23  ;;  %v5328_v39 = vpop.eup %3599 }
 0x189   : > { %v1662_v56 = vor.u32 4788187, %v1661_v35  ;;  %v1665_v26 = vcvt.s32.f32 %v1658_v60  ;;  %v1801_v53 = vsel %vm1800_vm13, %v1799_v0, 0  ;;  %v5330_v12 = vshll.u32 %v1797_v34, 8 }
 0x18a   : > { %v6259_v41 = vxor.u32 2147483648, %v5322_v25  ;;  %v1749_v10 = vshll.u32 %v1748_v54, 30  ;;  %v1900_v49 = vadd.f32 1.0, %v1892_v14  ;;  %v5333_v11 = vadd.f32 1.0, %v1893_v16 }
 0x18b   : > { %v6260_v51 = vxor.u32 2147483648, %v5328_v39  ;;  %v1663_v30 = vand.u32 2147483647, %v1662_v56  ;;  %v1772_v33 = vsub.s32 4, %v1748_v54  ;;  %v1803_v63 = vand.u32 31, %v1801_v53 }
 0x18c   : > { %v5336_v50 = vsub.s32 %v1746_v37, %v1749_v10  ;;  %v5338_v19 = vshrl.u32 %v1801_v53, 5  ;;  %v5340_v45 = vadd.f32 1.0, %v1894_v9  ;;  %v5342_v0 = vadd.f32 1.0, %v1895_v43 }
 0x18d   : > { %v1577_v34 = vsel %vm1575_vm6, %v5322_v25, %v6260_v51  ;;  %v1580_v14 = vsel %vm1578_vm8, %v6259_v41, %v5328_v39  ;;  %v1666_v37 = vmul.f32 %v1665_v26, %v1663_v30  ;;  %v1804_v16 = vsub.s32 32, %v1803_v63 }
 0x18e   : > { %v1752_v60 = vsub.s32 0, %v5336_v50  ;;  %v1806_v35 = vshll.u32 %v6380_v2, %v1803_v63  ;;  %v5356_v9 = vmul.f32 0.5, %v1900_v49  ;;  %v5359_v43 = vadd.s32 3, %v4945_v22 }
 0x18f   : > { %vm6262_vm14 = vweird.f32 %v4847_v3  ;;  %v1667_v56 = vxor.u32 2147483648, %v1666_v37  ;;  %v1773_v53 = vsel %vm1688_vm10, %v1772_v33, %v1748_v54  ;;  %v1807_v10 = vshrl.u32 %v6381_v57, %v1804_v16 }
 0x190   : > { %v1809_v26 = vshll.u32 %v6381_v57, %v1803_v63  ;;  %v1581_v30 = vsel %vm1574_vm9, %v1577_v34, %v1580_v14  ;;  %v3153_v41 = vmin.u32 %v1752_v60, %v5336_v50  ;;  %v1805_v49 = vshrl.u32 %v6380_v2, %v1804_v16 }
 0x191   : > { %vm1821_vm0 = vcmp.lt.s32.totalorder %v5338_v19, 1  ;;  %v1668_v22 = vsel %vm1585_vm3, %v1667_v56, %v1666_v37  ;;  %v1808_v51 = vor.u32 %v1807_v10, %v1806_v35  ;;  %v1810_v55 = vshrl.u32 %v6382_v29, %v1804_v16 }
 0x192   : > { %v1812_v54 = vshll.u32 %v6382_v29, %v1803_v63  ;;  %v1671_v57 = vsel %vm5283_vm4, %v4849_v59, %v1668_v22  ;;  %v1754_v15 = vclz %v3153_v41  ;;  %v1813_v33 = vshrl.u32 %v6383_v1, %v1804_v16 }
 0x193   : > { %v1815_v34 = vshll.u32 %v6383_v1, %v1803_v63  ;;  %3601 = vcosq.f32 %v1671_v57  ;;  %v1811_v2 = vor.u32 %v1810_v55, %v1809_v26  ;;  %v1816_v14 = vshrl.u32 %v6404_v7, %v1804_v16 }
 0x194   : > { %v1818_v37 = vshll.u32 %v6404_v7, %v1803_v63  ;;  %3603 = vsinq.f32 %v1671_v57  ;;  %v6408_v60 = vand.u32 2147483647, %v4858_v47  ;;  %v3154_v31 = vadd.s32 4294967294, %v1754_v15 }
 0x195   : > { %v1814_v35 = vor.u32 %v1813_v33, %v1812_v54  ;;  %v1819_v41 = vshrl.u32 %v6398_v36, %v1804_v16  ;;  %v1817_v56 = vor.u32 %v1816_v14, %v1815_v34  ;;  %vm1822_vm3 = vcmp.lt.s32.totalorder %v5338_v19, 2 }
 0x196   : > { %vm5384_vm2 = vcmp.le.f32.partialorder %v6408_v60, 0.7853982  ;;  %vm1823_vm4 = vcmp.lt.s32.totalorder %v5338_v19, 3  ;;  %vm1824_vm5 = vcmp.lt.s32.totalorder %v5338_v19, 4  ;;  %vm3155_vm6 = vcmp.lt.s32.totalorder %v3154_v31, 0 }
 0x197   : > { %v1820_v1 = vor.u32 %v1819_v41, %v1818_v37  ;;  %v1825_v55 = vsel %vm1821_vm0, %v1805_v49, %v1808_v51  ;;  %v1826_v7 = vsel %vm1824_vm5, %v1814_v35, 2102212464  ;;  %v1757_v63 = vsel %vm3155_vm6, 0, %v3154_v31 }
 0x198   : > { %v1827_v10 = vsel %vm1823_vm4, %v1811_v2, %v1826_v7  ;;  %v1829_v36 = vsel %vm1821_vm0, %v1808_v51, %v1811_v2  ;;  %v1830_v16 = vsel %vm1824_vm5, %v1817_v56, 920167782  ;;  %v1582_v26 = vsel %vm6262_vm14, nan, %v1581_v30 }
 0x199   : > { %vm1681_vm7 = vcmp.eq.s32.totalorder %v5319_v17, 2  ;;  %v1758_v22 = vsub.s32 32, %v1757_v63  ;;  %v1759_v49 = vshll.u32 %v5336_v50, %v1757_v63  ;;  %v1762_v54 = vsub.s32 4294967266, %v1757_v63 }
 0x19a   : > { %vm1678_vm8 = vcmp.eq.s32.totalorder %v5319_v17, 0  ;;  %v5409_v57 = vsel %vm1822_vm3, %v1825_v55, %v1827_v10  ;;  %v1831_v51 = vsel %vm1823_vm4, %v1814_v35, %v1830_v16  ;;  %v1833_v15 = vsel %vm1821_vm0, %v1811_v2, %v1814_v35 }
 0x19b   : > { %v1834_v30 = vsel %vm1824_vm5, %v1820_v1, 1326507024  ;;  %vm1677_vm9 = vcmp.lt.s32.totalorder %v5319_v17, 2  ;;  %v1760_v50 = vshrl.u32 %v5325_v32, %v1758_v22  ;;  %v1763_v33 = vadd.s32 127, %v1762_v54 }
 0x19c   : > { %v1832_v34 = vsel %vm1822_vm3, %v1829_v36, %v1831_v51  ;;  %v1835_v14 = vsel %vm1823_vm4, %v1817_v56, %v1834_v30  ;;  %v1896_v31 = vmul.f32 %v1582_v26, %v4728_v13  ;;  %vm1675_vm13 = vweird.f32 %v4849_v59 }
 0x19d   : > { %v1836_v37 = vsel %vm1822_vm3, %v1833_v15, %v1835_v14  ;;  %v5426_v2 = vmul.u32.u64.low %v5330_v12, %v1832_v34  ;;  %v5427_v60 = vmul.u32.u64.high %v5330_v12, %v1832_v34, %v5426_v2  ;;  %v1761_v32 = vor.u32 %v1760_v50, %v1759_v49 }
 0x19e   : > { %v1764_v35 = vshll.u32 %v1763_v33, 23  ;;  %v5432_v41 = vmul.u32.u64.low %v5330_v12, %v1836_v37  ;;  %v5433_v1 = vmul.u32.u64.high %v5330_v12, %v1836_v37, %v5432_v41  ;;  %v5438_v19 = vsel %vm5384_vm2, 0, %v1773_v53 }
 0x19f   : > { %v5441_v56 = vmul.f32 0.5, %v5333_v11  ;;  %v5444_v55 = vmul.f32 0.5, %v5340_v45  ;;  %v2114_v7 = vadd.s32 3, %v4965_v5  ;;  %v1768_v10 = vcvt.s32.f32 %v1761_v32 }
 0x1a0   : > { %v1765_v63 = vor.u32 4788187, %v1764_v35  ;;  %v1844_v36 = vmul.u32 %v5330_v12, %v5409_v57  ;;  %v5450_v16 = vand.u32 3, %v5359_v43  ;;  %v5455_v53 = vand.u32 3, %v5438_v19  ;;  %v5461_v26 = vpop.eup %3601 }
 0x1a1   : > { %v1847_v11 = vadd.s32 1, %v5427_v60  ;;  %v1904_v45 = vadd.f32 1.0, %v1896_v31  ;;  %v5459_v5 = vmul.f32 0.5, %v5342_v0  ;;  %vm1846_vm0 = vc.u32 %v5433_v1, %v5426_v2  ;;  %v5478_v0 = vpop.eup %3603 }
 0x1a2   : > { %v1766_v22 = vand.u32 2147483647, %v1765_v63  ;;  %v2218_v12 = vadd.s32 3, %v4975_v40  ;;  %v5467_v43 = vadd.s32 3, %v5091_v48  ;;  %v1682_v49 = vxor.u32 2147483648, %v5461_v26 }
 0x1a3   : > { %v1848_v40 = vsel %vm1846_vm0, %v1847_v11, %v5427_v60  ;;  %v5482_v54 = vand.u32 3, %v2114_v7  ;;  %v5485_v48 = vadd.s32 3, %v5201_v44 }
 0x1a4   : > { %3654 = shalt.err (!%p3651_p6)
}
 0x1a5   : > { %s3655_s18 = scalar_lea.hbm %s5474_s5, 128  ;;  %s3659_s26 = scalar_lea.hbm %s6179_s1, 256 }
 0x1a6   : > { %p3656_p4 = scmp.ne.s32.totalorder %s5474_s5, %s3655_s18  ;;  %p3660_p13 = scmp.lt.s32.totalorder %s5474_s5, %s6179_s1 }
 0x1a7   : > { %p3661_p2 = scmp.lt.s32.totalorder %s3659_s26, %s3655_s18 }
 0x1a8   : > { %p3657_p7 = pnand %p3656_p4, %p3831_p9 }
 0x1a9   : > { %p3662_p8 = por %p3661_p2, %p3660_p13 }
 0x1aa   : > { %p3658_p10 = pneg %p3657_p7 }
 0x1ac   : > { %p3663_p12 = pnand %p3662_p8, %p3658_p10 }
 0x1ae   : > { %3666 = shalt.err (!%p3663_p12)
}
 0x1af   : > { %3463 = dma.vmem_to_hbm [thread:$0]  (%p3831_p9), %s5476_s30, 128, %s5474_s5, %s2952_s6   ;;  %v1679_v44 = vxor.u32 2147483648, %v5478_v0  ;;  %v1769_v57 = vmul.f32 %v1768_v10, %v1766_v22  ;;  %vm1791_vm3 = vcmp.lt.s32.totalorder %v4879_v21, 0  ;;  %v1849_v51 = vadd.s32 %v1848_v40, %v1844_v36  ;;  %v6417_v40 = vld [vmem:[#allocation13_spill] sm:$0xff] }
 0x1b0   : > { %vm2013_vm4 = vcmp.eq.s32.totalorder %v5450_v16, 0  ;;  %v1683_v15 = vsel %vm1681_vm7, %v1682_v49, %v5478_v0  ;;  %v5516_v30 = vmul.f32 0.5, %v1904_v45  ;;  %vm2012_vm5 = vcmp.lt.s32.totalorder %v5450_v16, 2  ;;  %s192_s30 = scalar_lea.vmem [#allocation6], %s3114_s21  ;;  %s2987_s6 = scalar_lea.hbm %s6180_s2, %s3216_s29 }
 0x1b1   : > { %vm2016_vm6 = vcmp.eq.s32.totalorder %v5450_v16, 2  ;;  %v1680_v50 = vsel %vm1678_vm8, %v5461_v26, %v1679_v44  ;;  %v1770_v33 = vxor.u32 2147483648, %v1769_v57  ;;  %v1850_v34 = vadd.s32 536870912, %v1849_v51  ;;  %s2989_s3 = sshll.u32 %s192_s30, 4  ;;  %s2957_s7 = scalar_lea.sflag [#allocation7], %s3864_s20  ;;  %s2990_s3 = int_to_ptr.vmem [resolvable:$true] %s2989_s3 }
 0x1b2   : > { %vm2117_vm0 = vcmp.eq.s32.totalorder %v5482_v54, 0  ;;  %v1684_v14 = vsel %vm1677_vm9, %v1680_v50, %v1683_v15  ;;  %vm5530_vm7 = vcmp.le.f32.partialorder %v1789_v6, 0.7853982  ;;  %v6413_v60 = vxor.u32 2147483648, %v4953_v58  ;;  %v6420_v50 = vld [vmem:[#allocation16_spill] sm:$0xff]  ;;  %s3667_s8 = scalar_lea.vmem %s2990_s3, 128 }
 0x1b3   : > { %vm2120_vm14 = vcmp.eq.s32.totalorder %v5482_v54, 2  ;;  %v2219_v32 = vand.u32 3, %v2218_v12  ;;  %v1685_v35 = vsel %vm1675_vm13, nan, %v1684_v14  ;;  %v1771_v17 = vsel %vm1688_vm10, %v1770_v33, %v1769_v57  ;;  %p3668_p0 = scmp.ne.s32.totalorder %s2990_s3, %s3667_s8  ;;  %s3764_s15 = smov [#allocation6]  }
 0x1b4   : > { %v2015_v31 = vsel %vm2013_vm4, %v4941_v24, %v6413_v60  ;;  %v1851_v41 = vshrl.u32 %v1850_v34, 30  ;;  %v6414_v6 = vxor.u32 2147483648, %v4941_v24  ;;  %v1774_v63 = vsel %vm5384_vm2, %v4858_v47, %v1771_v17  ;;  %s3671_s16 = sshll.u32 %s3764_s15, 4  ;;  %s3672_s16 = int_to_ptr.vmem [resolvable:$false] %s3671_s16 }
 0x1b5   : > { %vm2116_vm8 = vcmp.lt.s32.totalorder %v5482_v54, 2  ;;  %v6415_v10 = vxor.u32 2147483648, %v5019_v20  ;;  %v6416_v11 = vxor.u32 2147483648, %v5012_v18  ;;  %3605 = vcosq.f32 %v1774_v63  ;;  %p3669_p1 = pnand %p3668_p0, %p3831_p9  ;;  %s3673_s21 = scalar_lea.vmem %s3672_s16, 256 }
 0x1b6   : > { %v2018_v7 = vsel %vm2016_vm6, %v6414_v6, %v4953_v58  ;;  %v1852_v22 = vshll.u32 %v1851_v41, 30  ;;  %v1875_v12 = vsub.s32 4, %v1851_v41  ;;  %v1897_v24 = vmul.f32 %v1685_v35, %v6417_v40  ;;  %p3674_p5 = scmp.lt.s32.totalorder %s2990_s3, %s3672_s16  ;;  %p3675_p6 = scmp.lt.s32.totalorder %s3673_s21, %s3667_s8 }
 0x1b7   : > { %v2119_v36 = vsel %vm2117_vm0, %v5012_v18, %v6415_v10  ;;  %v2122_v45 = vsel %vm2120_vm14, %v6416_v11, %v5019_v20  ;;  %3607 = vsinq.f32 %v1774_v63  ;;  %v2019_v58 = vsel %vm2012_vm5, %v2015_v31, %v2018_v7  ;;  %v6418_v20 = vld [vmem:[#allocation17_spill] sm:$0xff]  ;;  %p3670_p3 = pneg %p3669_p1 }
 0x1b8   : > { %vm2221_vm10 = vcmp.eq.s32.totalorder %v2219_v32, 0  ;;  %vm2224_vm2 = vcmp.eq.s32.totalorder %v2219_v32, 2  ;;  %v5560_v29 = vadd.s32 %v5426_v2, %v5433_v1  ;;  %v5562_v54 = vsub.s32 %v1849_v51, %v1852_v22  ;;  %p3676_p4 = por %p3675_p6, %p3674_p5 }
 0x1b9   : > { %v2123_v57 = vsel %vm2116_vm8, %v2119_v36, %v2122_v45  ;;  %vm2220_vm9 = vcmp.lt.s32.totalorder %v2219_v32, 2  ;;  %v1876_v18 = vsel %vm1791_vm3, %v1875_v12, %v1851_v41  ;;  %v6419_v15 = vxor.u32 2147483648, %v6418_v20 }
 0x1ba   : > { %v6421_v16 = vxor.u32 2147483648, %v6420_v50  ;;  %v2323_v14 = vand.u32 3, %v5467_v43  ;;  %v1855_v2 = vsub.s32 0, %v5562_v54  ;;  %v1905_v1 = vadd.f32 1.0, %v1897_v24  ;;  %p3677_p7 = pnand %p3676_p4, %p3670_p3 }
 0x1bb   : > { %v2223_v33 = vsel %vm2221_vm10, %v6420_v50, %v6419_v15  ;;  %v2020_v60 = vsel %vm1160_vm1, nan, %v2019_v58  ;;  %v2427_v31 = vand.u32 3, %v5485_v48  ;;  %vm1784_vm14 = vcmp.eq.s32.totalorder %v5455_v53, 2 }
 0x1bc   : > { %v2226_v34 = vsel %vm2224_vm2, %v6421_v16, %v6418_v20  ;;  %vm2324_vm4 = vcmp.lt.s32.totalorder %v2323_v14, 2  ;;  %vm2325_vm5 = vcmp.eq.s32.totalorder %v2323_v14, 0  ;;  %vm2328_vm6 = vcmp.eq.s32.totalorder %v2323_v14, 2 }
 0x1bd   : > { %v2530_v35 = vadd.s32 3, %v5312_v52  ;;  %vm1781_vm0 = vcmp.eq.s32.totalorder %v5455_v53, 0  ;;  %v3157_v17 = vmin.u32 %v1855_v2, %v5562_v54  ;;  %v1878_v43 = vsel %vm5530_vm7, 0, %v1876_v18 }
 0x1be   : > { %v2124_v41 = vsel %vm1263_vm11, nan, %v2123_v57  ;;  %v2227_v6 = vsel %vm2220_vm9, %v2223_v33, %v2226_v34  ;;  %vm1780_vm1 = vcmp.lt.s32.totalorder %v5455_v53, 2  ;;  %v2327_v48 = vsel %vm2325_vm5, %v5206_v27, %v1473_v28 }
 0x1bf   : > { %v6423_v52 = vxor.u32 2147483648, %v5206_v27  ;;  %vm2428_vm8 = vcmp.lt.s32.totalorder %v2427_v31, 2  ;;  %vm2429_vm10 = vcmp.eq.s32.totalorder %v2427_v31, 0  ;;  %vm1778_vm2 = vweird.f32 %v4858_v47 }
 0x1c0   : > { %v1857_v63 = vclz %v3157_v17  ;;  %v6424_v32 = vxor.u32 2147483648, %v5328_v39  ;;  %vm2432_vm11 = vcmp.eq.s32.totalorder %v2427_v31, 2  ;;  %v5598_v36 = vmul.f32 0.5, %v1905_v1 }
 0x1c1   : > { %v2330_v7 = vsel %vm2328_vm6, %v6423_v52, %v5227_v42  ;;  %v6425_v28 = vxor.u32 2147483648, %v5322_v25  ;;  %v2531_v27 = vand.u32 3, %v2530_v35  ;;  %v2634_v42 = vadd.s32 3, %v5438_v19 }
 0x1c2   : > { %v2331_v8 = vsel %vm2324_vm4, %v2327_v48, %v2330_v7  ;;  %v2431_v10 = vsel %vm2429_vm10, %v5322_v25, %v6424_v32  ;;  %v3158_v45 = vadd.s32 4294967294, %v1857_v63  ;;  %v2228_v22 = vsel %vm1366_vm15, nan, %v2227_v6  ;;  %v3606_v61 = vpop.eup %3605  ;;  %v6427_v6 = vld [vmem:[#allocation14_spill] sm:$0xff] }
 0x1c3   : > { %v2434_v11 = vsel %vm2432_vm11, %v6425_v28, %v5328_v39  ;;  %v2332_v12 = vsel %vm1469_vm12, nan, %v2331_v8  ;;  %vm2532_vm9 = vcmp.lt.s32.totalorder %v2531_v27, 2  ;;  %vm2533_vm4 = vcmp.eq.s32.totalorder %v2531_v27, 0 }
 0x1c4   : > { %v2435_v24 = vsel %vm2428_vm8, %v2431_v10, %v2434_v11  ;;  %vm2536_vm5 = vcmp.eq.s32.totalorder %v2531_v27, 2  ;;  %v2738_v58 = vadd.s32 3, %v1878_v43  ;;  %vm3159_vm6 = vcmp.lt.s32.totalorder %v3158_v45, 0  ;;  %v3608_v15 = vpop.eup %3607 }
 0x1c5   : > { %v2535_v25 = vsel %vm2533_vm4, %v5461_v26, %v1679_v44  ;;  %v2538_v39 = vsel %vm2536_vm5, %v1682_v49, %v5478_v0  ;;  %v2635_v19 = vand.u32 3, %v2634_v42  ;;  %v1860_v57 = vsel %vm3159_vm6, 0, %v3158_v45 }
 0x1c6   : > { %vm6426_vm15 = vweird.f32 %v4847_v3  ;;  %v2539_v18 = vsel %vm2532_vm9, %v2535_v25, %v2538_v39  ;;  %v2749_v20 = vmul.f32 %v2020_v60, %v4554_v38  ;;  %v1785_v50 = vxor.u32 2147483648, %v3606_v61 }
 0x1c7   : > { %v2436_v62 = vsel %vm6426_vm15, nan, %v2435_v24  ;;  %v1861_v33 = vsub.s32 32, %v1860_v57  ;;  %v1862_v16 = vshll.u32 %v5562_v54, %v1860_v57  ;;  %v1865_v34 = vsub.s32 4294967266, %v1860_v57 }
 0x1c8   : > { %v1782_v44 = vxor.u32 2147483648, %v3608_v15  ;;  %vm2636_vm12 = vcmp.lt.s32.totalorder %v2635_v19, 2  ;;  %vm2637_vm8 = vcmp.eq.s32.totalorder %v2635_v19, 0  ;;  %v2750_v26 = vmul.f32 %v2124_v41, %v4561_v4 }
 0x1c9   : > { %v1786_v0 = vsel %vm1784_vm14, %v1785_v50, %v3608_v15  ;;  %v1863_v3 = vshrl.u32 %v5560_v29, %v1861_v33  ;;  %v1866_v49 = vadd.s32 127, %v1865_v34  ;;  %vm2640_vm10 = vcmp.eq.s32.totalorder %v2635_v19, 2 }
 0x1ca   : > { %v1783_v38 = vsel %vm1781_vm0, %v3606_v61, %v1782_v44  ;;  %v2540_v14 = vsel %vm1675_vm13, nan, %v2539_v18  ;;  %v2639_v54 = vsel %vm2637_vm8, %v3606_v61, %v1782_v44  ;;  %v2642_v2 = vsel %vm2640_vm10, %v1785_v50, %v3608_v15 }
 0x1cb   : > { %v1787_v1 = vsel %vm1780_vm1, %v1783_v38, %v1786_v0  ;;  %v1864_v51 = vor.u32 %v1863_v3, %v1862_v16  ;;  %v1867_v4 = vshll.u32 %v1866_v49, 23  ;;  %v2643_v60 = vsel %vm2636_vm12, %v2639_v54, %v2642_v2 }
 0x1cc   : > { %v1788_v31 = vsel %vm1778_vm2, nan, %v1787_v1  ;;  %v5630_v29 = vand.u32 3, %v1878_v43  ;;  %v2644_v35 = vsel %vm1778_vm2, nan, %v2643_v60  ;;  %v5634_v17 = vand.u32 3, %v2738_v58 }
 0x1cd   : > { %v1868_v59 = vor.u32 4788187, %v1867_v4  ;;  %v1871_v41 = vcvt.s32.f32 %v1864_v51  ;;  %v1898_v48 = vmul.f32 %v1788_v31, %v6427_v6  ;;  %v2751_v53 = vmul.f32 %v2228_v22, %v4564_v46 }
 0x1ce   : > { %v2752_v52 = vmul.f32 %v2332_v12, %v4724_v23  ;;  %v2753_v7 = vmul.f32 %v2436_v62, %v4728_v13  ;;  %v2754_v63 = vmul.f32 %v2540_v14, %v6417_v40  ;;  %v2755_v43 = vmul.f32 %v2644_v35, %v6427_v6 }
 0x1cf   : > { %v1869_v8 = vand.u32 2147483647, %v1868_v59  ;;  %v1906_v32 = vadd.f32 1.0, %v1898_v48  ;;  %v2757_v47 = vadd.f32 1.0, %v2749_v20  ;;  %v2758_v10 = vadd.f32 1.0, %v2750_v26 }
 0x1d0   : > { %v2759_v28 = vadd.f32 1.0, %v2751_v53  ;;  %v2760_v11 = vadd.f32 1.0, %v2752_v52  ;;  %v2761_v27 = vadd.f32 1.0, %v2753_v7  ;;  %v2762_v42 = vadd.f32 1.0, %v2754_v63 }
 0x1d1   : > { %v1872_v45 = vmul.f32 %v1871_v41, %v1869_v8  ;;  %v1915_v24 = vmul.f32 0.5, %v1906_v32  ;;  %v2763_v58 = vadd.f32 1.0, %v2755_v43  ;;  %v5642_v46 = vmul.f32 0.5, %v2757_v47 }
 0x1d2   : > { %v5644_v23 = vmul.f32 0.5, %v2758_v10  ;;  %v5646_v13 = vmul.f32 0.5, %v2759_v28  ;;  %v5648_v40 = vmul.f32 0.5, %v2760_v11  ;;  %v5650_v22 = vmul.f32 0.5, %v2761_v27 }
 0x1d3   : > { %v1873_v12 = vxor.u32 2147483648, %v1872_v45  ;;  %v5652_v25 = vmul.f32 0.5, %v2762_v42  ;;  %v5654_v39 = vmul.f32 0.5, %v2763_v58  ;;  %v2773_v19 = vmul.f32 9.0, %v5356_v9 }
 0x1d4   : > { %v2774_v61 = vmul.f32 9.0, %v5441_v56  ;;  %v2775_v57 = vmul.f32 9.0, %v5444_v55  ;;  %v2776_v62 = vmul.f32 9.0, %v5459_v5  ;;  %v2777_v18 = vmul.f32 9.0, %v5516_v30 }
 0x1d5   : > { %v1874_v20 = vsel %vm1791_vm3, %v1873_v12, %v1872_v45  ;;  %v2778_v15 = vmul.f32 9.0, %v5598_v36  ;;  %v2779_v50 = vmul.f32 9.0, %v1915_v24  ;;  %v5664_v33 = vadd.f32 1.0, %v2773_v19  ;;  %v6477_v24 = vld [vmem:[#allocation26_spill] sm:$0xff] }
 0x1d6   : > { %v1877_v9 = vsel %vm5530_vm7, %v4879_v21, %v1874_v20  ;;  %v5669_v16 = vadd.f32 1.0, %v2774_v61  ;;  %v5671_v56 = vadd.f32 1.0, %v2775_v57  ;;  %v5673_v55 = vadd.f32 1.0, %v2776_v62 }
 0x1d7   : > { %3609 = vcosq.f32 %v1877_v9  ;;  %v5675_v5 = vadd.f32 1.0, %v2777_v18  ;;  %v5677_v30 = vadd.f32 1.0, %v2778_v15  ;;  %v5679_v34 = vadd.f32 1.0, %v2779_v50 }
 0x1d8   : > { %6428 = vst [vmem:[#allocation18_spill] sm:$0xff] %v5671_v56  ;;  %6429 = vst [vmem:[#allocation19_spill] sm:$0xff] %v5673_v55  ;;  %3611 = vsinq.f32 %v1877_v9  ;;  %v3253_v36 = vand.u32 2147483647, %v5664_v33  ;;  %v3255_v44 = vcvt.f32.s32 %v5664_v33  ;;  %v3258_v37 = vand.u32 2147483648, %v5664_v33 }
 0x1d9   : > { %6430 = vst [vmem:[#allocation20_spill] sm:$0xff] %v5675_v5  ;;  %6431 = vst [vmem:[#allocation21_spill] sm:$0xff] %v5677_v30  ;;  %v3261_v26 = vand.u32 2147483647, %v5669_v16  ;;  %v3263_v0 = vcvt.f32.s32 %v5669_v16  ;;  %v3266_v3 = vand.u32 2147483648, %v5669_v16  ;;  %v3271_v54 = vcvt.f32.s32 %v5671_v56 }
 0x1da   : > { %6432 = vst [vmem:[#allocation22_spill] sm:$0xff] %v5679_v34  ;;  %v3269_v49 = vand.u32 2147483647, %v5671_v56  ;;  %vm5688_vm13 = vcmp.lt.f32.partialorder %v3253_v36, 8388608.0  ;;  %v3256_v14 = vcvt.s32.f32 %v3255_v44  ;;  %v3274_v2 = vand.u32 2147483648, %v5671_v56 }
 0x1db   : > { %vm5694_vm3 = vcmp.lt.f32.partialorder %v3261_v26, 8388608.0  ;;  %v3264_v51 = vcvt.s32.f32 %v3263_v0  ;;  %v6437_v4 = vmov 0  ;;  %v3277_v60 = vand.u32 2147483647, %v5673_v55 }
 0x1dc   : > { %vm5698_vm7 = vcmp.lt.f32.partialorder %v3269_v49, 8388608.0  ;;  %vm1887_vm14 = vcmp.eq.s32.totalorder %v5630_v29, 2  ;;  %vm2744_vm0 = vcmp.eq.s32.totalorder %v5634_v17, 2  ;;  %v3257_v31 = vand.u32 2147483647, %v3256_v14 }
 0x1dd   : > { %v6438_v4 = vsel %vm5698_vm7, 4294967295, %v6437_v4  ;;  %v3272_v35 = vcvt.s32.f32 %v3271_v54  ;;  %v3279_v59 = vcvt.f32.s32 %v5673_v55  ;;  %v3282_v41 = vand.u32 2147483648, %v5673_v55 }
 0x1de   : > { %vm1884_vm1 = vcmp.eq.s32.totalorder %v5630_v29, 0  ;;  %vm2741_vm2 = vcmp.eq.s32.totalorder %v5634_v17, 0  ;;  %v3265_v6 = vand.u32 2147483647, %v3264_v51  ;;  %vm5709_vm11 = vcmp.lt.f32.partialorder %v3277_v60, 8388608.0 }
 0x1df   : > { %v6439_v48 = vmov 0  ;;  %v3285_v53 = vand.u32 2147483647, %v5675_v5  ;;  %v3287_v52 = vcvt.f32.s32 %v5675_v5  ;;  %vm1883_vm9 = vcmp.lt.s32.totalorder %v5630_v29, 2  ;;  %v6517_v38 = vld [vmem:[#allocation19_spill] sm:$0xff] }
 0x1e0   : > { %v6440_v48 = vsel %vm5709_vm11, 4294967295, %v6439_v48  ;;  %vm2740_vm4 = vcmp.lt.s32.totalorder %v5634_v17, 2  ;;  %v5717_v7 = vor.u32 %v3258_v37, %v3257_v31  ;;  %v3273_v63 = vand.u32 2147483647, %v3272_v35  ;;  %v6522_v1 = vld [vmem:[#allocation20_spill] sm:$0xff] }
 0x1e1   : > { %6441 = vst [vmem:[#allocation23_spill] sm:$0xff] %v6440_v48  ;;  %v3280_v43 = vcvt.s32.f32 %v3279_v59  ;;  %v3290_v8 = vand.u32 2147483648, %v5675_v5  ;;  %vm1881_vm5 = vweird.f32 %v4879_v21  ;;  %v5721_v32 = vor.u32 %v3266_v3, %v3265_v6 }
 0x1e2   : > { %vm5723_vm6 = vcmp.lt.f32.partialorder %v3285_v53, 8388608.0  ;;  %v6442_v47 = vmov 0  ;;  %v3288_v10 = vcvt.s32.f32 %v3287_v52  ;;  %v3293_v28 = vand.u32 2147483647, %v5677_v30 }
 0x1e3   : > { %v6443_v47 = vsel %vm5723_vm6, 4294967295, %v6442_v47  ;;  %v5732_v27 = vor.u32 %v3274_v2, %v3273_v63  ;;  %v3281_v42 = vand.u32 2147483647, %v3280_v43  ;;  %v3295_v45 = vcvt.f32.s32 %v5677_v30 }
 0x1e4   : > { %6444 = vst [vmem:[#allocation24_spill] sm:$0xff] %v6443_v47  ;;  %v3289_v58 = vand.u32 2147483647, %v3288_v10  ;;  %vm5739_vm15 = vcmp.lt.f32.partialorder %v3293_v28, 8388608.0  ;;  %v6445_v12 = vmov 0  ;;  %v3298_v19 = vand.u32 2147483648, %v5677_v30  ;;  %v3610_v36 = vpop.eup %3609 }
 0x1e5   : > { %v6446_v12 = vsel %vm5739_vm15, 4294967295, %v6445_v12  ;;  %v5748_v57 = vor.u32 %v3282_v41, %v3281_v42  ;;  %v3296_v62 = vcvt.s32.f32 %v3295_v45  ;;  %v3301_v18 = vand.u32 2147483647, %v5679_v34  ;;  %v3612_v3 = vpop.eup %3611 }
 0x1e6   : > { %6447 = vst [vmem:[#allocation25_spill] sm:$0xff] %v6446_v12  ;;  %v5751_v20 = vor.u32 %v3290_v8, %v3289_v58  ;;  %v3303_v15 = vcvt.f32.s32 %v5679_v34  ;;  %v3306_v50 = vand.u32 2147483648, %v5679_v34  ;;  %v2797_v9 = vmul.f32 9.0, %v5642_v46 }
 0x1e7   : > { %6448 = vst [vmem:[#allocation34_spill] sm:$0xff] %v5748_v57  ;;  %v3297_v37 = vand.u32 2147483647, %v3296_v62  ;;  %vm5760_vm12 = vcmp.lt.f32.partialorder %v3301_v18, 8388608.0  ;;  %v6450_v26 = vmov 0  ;;  %v2798_v0 = vmul.f32 9.0, %v5644_v23 }
 0x1e8   : > { %6449 = vst [vmem:[#allocation35_spill] sm:$0xff] %v5751_v20  ;;  %v6451_v26 = vsel %vm5760_vm12, 4294967295, %v6450_v26  ;;  %v1888_v49 = vxor.u32 2147483648, %v3610_v36  ;;  %v3304_v14 = vcvt.s32.f32 %v3303_v15  ;;  %v2799_v54 = vmul.f32 9.0, %v5646_v13 }
 0x1e9   : > { %6452 = vst [vmem:[#allocation36_spill] sm:$0xff] %v6451_v26  ;;  %v1885_v2 = vxor.u32 2147483648, %v3612_v3  ;;  %v5770_v51 = vor.u32 %v3298_v19, %v3297_v37  ;;  %v2800_v60 = vmul.f32 9.0, %v5648_v40  ;;  %v2801_v31 = vmul.f32 9.0, %v5650_v22 }
 0x1ea   : > { %v1889_v23 = vsel %vm1887_vm14, %v1888_v49, %v3612_v3  ;;  %v2746_v35 = vsel %vm2744_vm0, %v1888_v49, %v3612_v3  ;;  %v3305_v59 = vand.u32 2147483647, %v3304_v14  ;;  %v2802_v41 = vmul.f32 9.0, %v5652_v25 }
 0x1eb   : > { %6453 = vst [vmem:[#allocation37_spill] sm:$0xff] %v5770_v51  ;;  %v1886_v6 = vsel %vm1884_vm1, %v3610_v36, %v1885_v2  ;;  %v2743_v13 = vsel %vm2741_vm2, %v3610_v36, %v1885_v2  ;;  %v2803_v22 = vmul.f32 9.0, %v5654_v39  ;;  %v5794_v63 = vadd.f32 1.0, %v2797_v9  ;;  %v6455_v39 = vld [vmem:[#allocation15_spill] sm:$0xff] }
 0x1ec   : > { %v1890_v53 = vsel %vm1883_vm9, %v1886_v6, %v1889_v23  ;;  %v2747_v52 = vsel %vm2740_vm4, %v2743_v13, %v2746_v35  ;;  %v5792_v25 = vor.u32 %v3306_v50, %v3305_v59  ;;  %v5800_v10 = vadd.f32 1.0, %v2798_v0 }
 0x1ed   : > { %v1891_v43 = vsel %vm1881_vm5, nan, %v1890_v53  ;;  %v2748_v8 = vsel %vm1881_vm5, nan, %v2747_v52  ;;  %v5802_v28 = vadd.f32 1.0, %v2799_v54  ;;  %v5810_v45 = vadd.f32 1.0, %v2800_v60 }
 0x1ee   : > { %6454 = vst [vmem:[#allocation38_spill] sm:$0xff] %v5792_v25  ;;  %v1899_v29 = vmul.f32 %v1891_v43, %v6455_v39  ;;  %v2756_v42 = vmul.f32 %v2748_v8, %v6455_v39  ;;  %v5812_v58 = vadd.f32 1.0, %v2801_v31  ;;  %v5814_v19 = vadd.f32 1.0, %v2802_v41 }
 0x1ef   : > { %v5816_v21 = vadd.f32 1.0, %v2803_v22  ;;  %v3317_v62 = vand.u32 2147483647, %v5794_v63  ;;  %v3319_v50 = vcvt.f32.s32 %v5794_v63  ;;  %v3322_v9 = vand.u32 2147483648, %v5794_v63 }
 0x1f0   : > { %v1907_v18 = vadd.f32 1.0, %v1899_v29  ;;  %v2764_v15 = vadd.f32 1.0, %v2756_v42  ;;  %v3325_v37 = vand.u32 2147483647, %v5800_v10  ;;  %v3327_v0 = vcvt.f32.s32 %v5800_v10 }
 0x1f1   : > { %vm5821_vm8 = vcmp.lt.f32.partialorder %v3317_v62, 8388608.0  ;;  %v3330_v3 = vand.u32 2147483648, %v5800_v10  ;;  %v3320_v54 = vcvt.s32.f32 %v3319_v50  ;;  %v3333_v2 = vand.u32 2147483647, %v5802_v28 }
 0x1f2   : > { %v1916_v49 = vmul.f32 0.5, %v1907_v18  ;;  %v2772_v14 = vmul.f32 0.5, %v2764_v15  ;;  %vm5829_vm10 = vcmp.lt.f32.partialorder %v3325_v37, 8388608.0  ;;  %v3328_v31 = vcvt.s32.f32 %v3327_v0 }
 0x1f3   : > { %v3335_v23 = vcvt.f32.s32 %v5802_v28  ;;  %v3338_v35 = vand.u32 2147483648, %v5802_v28  ;;  %v3321_v6 = vand.u32 2147483647, %v3320_v54  ;;  %vm5835_vm14 = vcmp.lt.f32.partialorder %v3333_v2, 8388608.0 }
 0x1f4   : > { %v2780_v59 = vmul.f32 9.0, %v1916_v49  ;;  %v2804_v41 = vmul.f32 9.0, %v2772_v14  ;;  %v3329_v22 = vand.u32 2147483647, %v3328_v31  ;;  %v3341_v52 = vand.u32 2147483647, %v5810_v45 }
 0x1f5   : > { %v3336_v53 = vcvt.s32.f32 %v3335_v23  ;;  %v3343_v43 = vcvt.f32.s32 %v5810_v45  ;;  %v5845_v29 = vor.u32 %v3322_v9, %v3321_v6  ;;  %v3346_v42 = vand.u32 2147483648, %v5810_v45 }
 0x1f6   : > { %v5841_v8 = vadd.f32 1.0, %v2780_v59  ;;  %v5843_v39 = vadd.f32 1.0, %v2804_v41  ;;  %v5848_v62 = vor.u32 %v3330_v3, %v3329_v22  ;;  %vm5850_vm0 = vcmp.lt.f32.partialorder %v3341_v52, 8388608.0 }
 0x1f7   : > { %v3337_v18 = vand.u32 2147483647, %v3336_v53  ;;  %v3344_v50 = vcvt.s32.f32 %v3343_v43  ;;  %v3349_v2 = vand.u32 2147483647, %v5812_v58  ;;  %v6465_v31 = vmov 0 }
 0x1f8   : > { %6462 = vst [vmem:[#allocation39_spill] sm:$0xff] %v5841_v8  ;;  %v3309_v37 = vand.u32 2147483647, %v5841_v8  ;;  %v3311_v0 = vcvt.f32.s32 %v5841_v8  ;;  %v3314_v49 = vand.u32 2147483648, %v5841_v8  ;;  %v3351_v59 = vcvt.f32.s32 %v5812_v58  ;;  %v6481_v8 = vld [vmem:[#allocation30_spill] sm:$0xff] }
 0x1f9   : > { %v5865_v14 = vor.u32 %v3338_v35, %v3337_v18  ;;  %v3345_v54 = vand.u32 2147483647, %v3344_v50  ;;  %v3354_v41 = vand.u32 2147483648, %v5812_v58  ;;  %vm5880_vm2 = vcmp.lt.f32.partialorder %v3349_v2, 8388608.0 }
 0x1fa   : > { %vm5868_vm1 = vcmp.lt.f32.partialorder %v3309_v37, 8388608.0  ;;  %v3312_v23 = vcvt.s32.f32 %v3311_v0  ;;  %v3357_v53 = vand.u32 2147483647, %v5814_v19  ;;  %v3352_v43 = vcvt.s32.f32 %v3351_v59 }
 0x1fb   : > { %v6466_v31 = vsel %vm5868_vm1, 4294967295, %v6465_v31  ;;  %v5878_v22 = vor.u32 %v3346_v42, %v3345_v54  ;;  %v3359_v18 = vcvt.f32.s32 %v5814_v19  ;;  %v3362_v50 = vand.u32 2147483648, %v5814_v19 }
 0x1fc   : > { %6467 = vst [vmem:[#allocation40_spill] sm:$0xff] %v6466_v31  ;;  %v3313_v52 = vand.u32 2147483647, %v3312_v23  ;;  %vm5891_vm9 = vcmp.lt.f32.partialorder %v3357_v53, 8388608.0  ;;  %v3365_v0 = vand.u32 2147483647, %v5816_v21  ;;  %v3367_v54 = vcvt.f32.s32 %v5816_v21 }
 0x1fd   : > { %v3353_v23 = vand.u32 2147483647, %v3352_v43  ;;  %v3360_v59 = vcvt.s32.f32 %v3359_v18  ;;  %v3370_v17 = vand.u32 2147483648, %v5816_v21  ;;  %v3373_v53 = vand.u32 2147483647, %v5843_v39  ;;  %v6484_v31 = vld [vmem:[#allocation33_spill] sm:$0xff] }
 0x1fe   : > { %v5897_v2 = vor.u32 %v3314_v49, %v3313_v52  ;;  %vm5900_vm4 = vcmp.lt.f32.partialorder %v3365_v0, 8388608.0  ;;  %v3368_v46 = vcvt.s32.f32 %v3367_v54  ;;  %v3375_v44 = vcvt.f32.s32 %v5843_v39 }
 0x1ff   : > { %v5910_v49 = vor.u32 %v3354_v41, %v3353_v23  ;;  %v3361_v52 = vand.u32 2147483647, %v3360_v59  ;;  %v3378_v43 = vand.u32 2147483648, %v5843_v39  ;;  %vm5913_vm5 = vcmp.lt.f32.partialorder %v3373_v53, 8388608.0  ;;  %v6478_v41 = vld [vmem:[#allocation27_spill] sm:$0xff]  ;;  %v6479_v59 = vld [vmem:[#allocation28_spill] sm:$0xff] }
 0x200   : > { %6472 = vst [vmem:[#allocation41_spill] sm:$0xff] %v5897_v2  ;;  %v3369_v18 = vand.u32 2147483647, %v3368_v46  ;;  %v3376_v54 = vcvt.s32.f32 %v3375_v44  ;;  %v2821_v11 = vmul.f32 9.0, %v6477_v24  ;;  %v2822_v23 = vmul.f32 9.0, %v6478_v41  ;;  %v6480_v53 = vld [vmem:[#allocation29_spill] sm:$0xff] }
 0x201   : > { %v5922_v6 = vor.u32 %v3362_v50, %v3361_v52  ;;  %v2823_v61 = vmul.f32 9.0, %v6479_v59  ;;  %v2824_v9 = vmul.f32 9.0, %v6480_v53  ;;  %v2825_v44 = vmul.f32 9.0, %v6481_v8  ;;  %v6482_v2 = vld [vmem:[#allocation31_spill] sm:$0xff]  ;;  %v6483_v50 = vld [vmem:[#allocation32_spill] sm:$0xff] }
 0x202   : > { %v5926_v3 = vor.u32 %v3370_v17, %v3369_v18  ;;  %v3377_v46 = vand.u32 2147483647, %v3376_v54  ;;  %v2826_v37 = vmul.f32 9.0, %v6482_v2  ;;  %v2827_v52 = vmul.f32 9.0, %v6483_v50 }
 0x203   : > { %v2828_v41 = vmul.f32 9.0, %v6484_v31  ;;  %v5943_v54 = vadd.f32 1.0, %v2821_v11  ;;  %v5945_v8 = vadd.f32 1.0, %v2822_v23  ;;  %v5947_v59 = vadd.f32 1.0, %v2823_v61 }
 0x204   : > { %v5941_v18 = vor.u32 %v3378_v43, %v3377_v46  ;;  %v5949_v53 = vadd.f32 1.0, %v2824_v9  ;;  %v5951_v2 = vadd.f32 1.0, %v2825_v44  ;;  %v5953_v50 = vadd.f32 1.0, %v2826_v37 }
 0x205   : > { %v5959_v17 = vadd.f32 1.0, %v2827_v52  ;;  %v5961_v43 = vadd.f32 1.0, %v2828_v41  ;;  %v3381_v11 = vand.u32 2147483647, %v5943_v54  ;;  %v3383_v61 = vcvt.f32.s32 %v5943_v54 }
 0x206   : > { %v3386_v9 = vand.u32 2147483648, %v5943_v54  ;;  %v3389_v23 = vand.u32 2147483647, %v5945_v8  ;;  %v3391_v37 = vcvt.f32.s32 %v5945_v8  ;;  %v3394_v44 = vand.u32 2147483648, %v5945_v8 }
 0x207   : > { %vm5968_vm1 = vcmp.lt.f32.partialorder %v3381_v11, 8388608.0  ;;  %v3397_v52 = vand.u32 2147483647, %v5947_v59  ;;  %v3399_v41 = vcvt.f32.s32 %v5947_v59  ;;  %v3384_v31 = vcvt.s32.f32 %v3383_v61 }
 0x208   : > { %vm5975_vm12 = vcmp.lt.f32.partialorder %v3389_v23, 8388608.0  ;;  %v3392_v34 = vcvt.s32.f32 %v3391_v37  ;;  %v3402_v25 = vand.u32 2147483648, %v5947_v59  ;;  %v3405_v30 = vand.u32 2147483647, %v5949_v53 }
 0x209   : > { %vm5980_vm15 = vcmp.lt.f32.partialorder %v3397_v52, 8388608.0  ;;  %v3400_v11 = vcvt.s32.f32 %v3399_v41  ;;  %v3407_v51 = vcvt.f32.s32 %v5949_v53  ;;  %v3385_v12 = vand.u32 2147483647, %v3384_v31 }
 0x20a   : > { %v3393_v5 = vand.u32 2147483647, %v3392_v34  ;;  %v3410_v61 = vand.u32 2147483648, %v5949_v53  ;;  %v3415_v23 = vcvt.f32.s32 %v5951_v2  ;;  %vm5988_vm6 = vcmp.lt.f32.partialorder %v3405_v30, 8388608.0 }
 0x20b   : > { %v3401_v20 = vand.u32 2147483647, %v3400_v11  ;;  %v3408_v52 = vcvt.s32.f32 %v3407_v51  ;;  %v3413_v47 = vand.u32 2147483647, %v5951_v2  ;;  %v5993_v55 = vor.u32 %v3386_v9, %v3385_v12 }
 0x20c   : > { %v5995_v41 = vor.u32 %v3394_v44, %v3393_v5  ;;  %v3416_v57 = vcvt.s32.f32 %v3415_v23  ;;  %v3418_v31 = vand.u32 2147483648, %v5951_v2  ;;  %v3421_v30 = vand.u32 2147483647, %v5953_v50 }
 0x20d   : > { %v3403_v34 = vor.u32 %v3402_v25, %v3401_v20  ;;  %v3409_v48 = vand.u32 2147483647, %v3408_v52  ;;  %vm5998_vm11 = vcmp.lt.f32.partialorder %v3413_v47, 8388608.0  ;;  %v3388_v51 = vsel %vm5968_vm1, %v5993_v55, %v5943_v54  ;;  %v6532_v52 = vld [vmem:[#allocation22_spill] sm:$0xff] }
 0x20e   : > { %v3396_v5 = vsel %vm5975_vm12, %v5995_v41, %v5945_v8  ;;  %v3417_v12 = vand.u32 2147483647, %v3416_v57  ;;  %v3423_v20 = vcvt.f32.s32 %v5953_v50  ;;  %vm6015_vm7 = vcmp.lt.f32.partialorder %v3421_v30, 8388608.0 }
 0x20f   : > { %v3404_v47 = vsel %vm5980_vm15, %v3403_v34, %v5947_v59  ;;  %v3411_v25 = vor.u32 %v3410_v61, %v3409_v48  ;;  %v3426_v46 = vand.u32 2147483648, %v5953_v50  ;;  %v3429_v44 = vand.u32 2147483647, %v5959_v17 }
 0x210   : > { %v3419_v55 = vor.u32 %v3418_v31, %v3417_v12  ;;  %v3424_v54 = vcvt.s32.f32 %v3423_v20  ;;  %v3431_v24 = vcvt.f32.s32 %v5959_v17  ;;  %v3434_v26 = vand.u32 2147483648, %v5959_v17 }
 0x211   : > { %v3412_v57 = vsel %vm5988_vm6, %v3411_v25, %v5949_v53  ;;  %v3437_v48 = vand.u32 2147483647, %v5961_v43  ;;  %v3439_v8 = vcvt.f32.s32 %v5961_v43  ;;  %vm6031_vm15 = vcmp.lt.f32.partialorder %v3429_v44, 8388608.0  ;;  %v6516_v44 = vld [vmem:[#allocation34_spill] sm:$0xff] }
 0x212   : > { %v3420_v59 = vsel %vm5998_vm11, %v3419_v55, %v5951_v2  ;;  %v3425_v11 = vand.u32 2147483647, %v3424_v54  ;;  %v3432_v23 = vcvt.s32.f32 %v3431_v24  ;;  %v3442_v37 = vand.u32 2147483648, %v5961_v43  ;;  %v6514_v54 = vld [vmem:[#allocation23_spill] sm:$0xff] }
 0x213   : > { %vm6035_vm12 = vcmp.lt.f32.partialorder %v3437_v48, 8388608.0  ;;  %v3440_v53 = vcvt.s32.f32 %v3439_v8  ;;  %v6501_v41 = vsel %vm5821_vm8, %v5845_v29, %v5794_v63  ;;  %v6502_v34 = vsel %vm5829_vm10, %v5848_v62, %v5800_v10 }
 0x214   : > { %v3192_v56 = vadd.f32 -1.0, %v6501_v41  ;;  %v3427_v2 = vor.u32 %v3426_v46, %v3425_v11  ;;  %v3433_v31 = vand.u32 2147483647, %v3432_v23  ;;  %v3193_v30 = vadd.f32 -1.0, %v6502_v34  ;;  %v6512_v46 = vld [vmem:[#allocation18_spill] sm:$0xff]  ;;  %v6534_v41 = vld [vmem:[#allocation40_spill] sm:$0xff] }
 0x215   : > { %v6503_v12 = vsel %vm5835_vm14, %v5865_v14, %v5802_v28  ;;  %v3441_v25 = vand.u32 2147483647, %v3440_v53  ;;  %v6504_v63 = vsel %vm5850_vm0, %v5878_v22, %v5810_v45  ;;  %v6505_v60 = vsel %vm5880_vm2, %v5910_v49, %v5812_v58  ;;  %v6531_v23 = vld [vmem:[#allocation38_spill] sm:$0xff] }
 0x216   : > { %v3194_v20 = vadd.f32 -1.0, %v6503_v12  ;;  %v3195_v36 = vadd.f32 -1.0, %v6504_v63  ;;  %v3196_v10 = vadd.f32 -1.0, %v6505_v60  ;;  %v6506_v13 = vsel %vm5891_vm9, %v5922_v6, %v5814_v19 }
 0x217   : > { %v3197_v28 = vadd.f32 -1.0, %v6506_v13  ;;  %v3428_v29 = vsel %vm6015_vm7, %v3427_v2, %v5953_v50  ;;  %v3435_v62 = vor.u32 %v3434_v26, %v3433_v31  ;;  %v6507_v45 = vsel %vm5900_vm4, %v5926_v3, %v5816_v21  ;;  %v6537_v2 = vld [vmem:[#allocation39_spill] sm:$0xff] }
 0x218   : > { %v3198_v15 = vadd.f32 -1.0, %v6507_v45  ;;  %v6508_v58 = vsel %vm5913_vm5, %v5941_v18, %v5843_v39  ;;  %v3443_v22 = vor.u32 %v3442_v37, %v3441_v25  ;;  %v2853_v19 = vmul.f32 10.0, %v3192_v56  ;;  %v6536_v56 = vld [vmem:[#allocation41_spill] sm:$0xff] }
 0x219   : > { %v3199_v14 = vadd.f32 -1.0, %v6508_v58  ;;  %v2854_v6 = vmul.f32 10.0, %v3193_v30  ;;  %v2855_v35 = vmul.f32 10.0, %v3194_v20  ;;  %v3436_v42 = vsel %vm6031_vm15, %v3435_v62, %v5959_v17 }
 0x21a   : > { %v2856_v49 = vmul.f32 10.0, %v3195_v36  ;;  %v2857_v40 = vmul.f32 10.0, %v3196_v10  ;;  %v2858_v50 = vmul.f32 10.0, %v3197_v28  ;;  %v3444_v21 = vsel %vm6035_vm12, %v3443_v22, %v5961_v43 }
 0x21b   : > { %v2859_v3 = vmul.f32 10.0, %v3198_v15  ;;  %v2860_v0 = vmul.f32 10.0, %v3199_v14  ;;  %v6509_v39 = vsel %vm5688_vm13, %v5717_v7, %v5664_v33  ;;  %v6510_v17 = vsel %vm5694_vm3, %v5721_v32, %v5669_v16  ;;  %v6519_v33 = vld [vmem:[#allocation24_spill] sm:$0xff]  ;;  %v6521_v7 = vld [vmem:[#allocation35_spill] sm:$0xff]  ;;  %v6524_v16 = vld [vmem:[#allocation25_spill] sm:$0xff] }
 0x21c   : > { %v2861_v18 = vadd.f32 %v6509_v39, %v2853_v19  ;;  %v2862_v9 = vadd.f32 %v6510_v17, %v2854_v6  ;;  %vm6511_vm7 = vnez %v6438_v4  ;;  %vm6515_vm11 = vnez %v6514_v54  ;;  %v6526_v32 = vld [vmem:[#allocation37_spill] sm:$0xff] }
 0x21d   : > { %v6513_v55 = vsel %vm6511_vm7, %v5732_v27, %v6512_v46  ;;  %v6518_v24 = vsel %vm6515_vm11, %v6516_v44, %v6517_v38  ;;  %vm6520_vm13 = vnez %v6519_v33  ;;  %vm6525_vm3 = vnez %v6524_v16  ;;  %v6527_v4 = vld [vmem:[#allocation21_spill] sm:$0xff]  ;;  %v6529_v27 = vld [vmem:[#allocation36_spill] sm:$0xff]  ;;  %v6539_v33 = vld [vmem:[#allocation11_spill] sm:$0xff] }
 0x21e   : > { %v2863_v43 = vadd.f32 %v6513_v55, %v2855_v35  ;;  %v2864_v26 = vadd.f32 %v6518_v24, %v2856_v49  ;;  %v6523_v48 = vsel %vm6520_vm13, %v6521_v7, %v6522_v1  ;;  %v6528_v11 = vsel %vm6525_vm3, %v6526_v32, %v6527_v4 }
 0x21f   : > { %v2865_v8 = vadd.f32 %v6523_v48, %v2857_v40  ;;  %v2866_v61 = vadd.f32 %v6528_v11, %v2858_v50  ;;  %vm6530_vm6 = vnez %v6529_v27  ;;  %vm6535_vm8 = vnez %v6534_v41 }
 0x220   : > { %v6533_v53 = vsel %vm6530_vm6, %v6531_v23, %v6532_v52  ;;  %v6538_v31 = vsel %vm6535_vm8, %v6536_v56, %v6537_v2  ;;  %v3200_v30 = vadd.f32 -1.0, %v3388_v51  ;;  %v3201_v12 = vadd.f32 -1.0, %v3396_v5 }
 0x221   : > { %v2867_v37 = vadd.f32 %v6533_v53, %v2859_v3  ;;  %v2868_v34 = vadd.f32 %v6538_v31, %v2860_v0  ;;  %v3202_v20 = vadd.f32 -1.0, %v3404_v47  ;;  %v3203_v25 = vadd.f32 -1.0, %v3412_v57 }
 0x222   : > { %v3204_v63 = vadd.f32 -1.0, %v3420_v59  ;;  %v3205_v36 = vadd.f32 -1.0, %v3428_v29  ;;  %v3206_v60 = vadd.f32 -1.0, %v3436_v42  ;;  %v3207_v10 = vadd.f32 -1.0, %v3444_v21 }
 0x223   : > { %v2877_v13 = vmul.f32 100.0, %v3200_v30  ;;  %v2878_v28 = vmul.f32 100.0, %v3201_v12  ;;  %v2879_v62 = vmul.f32 100.0, %v3202_v20  ;;  %v2880_v45 = vmul.f32 100.0, %v3203_v25 }
 0x224   : > { %v2881_v15 = vmul.f32 100.0, %v3204_v63  ;;  %v2882_v58 = vmul.f32 100.0, %v3205_v36  ;;  %v2883_v14 = vmul.f32 100.0, %v3206_v60  ;;  %v2884_v22 = vmul.f32 100.0, %v3207_v10 }
 0x225   : > { %v2885_v19 = vadd.f32 %v2877_v13, %v2861_v18  ;;  %v2886_v6 = vadd.f32 %v2878_v28, %v2862_v9  ;;  %v2887_v35 = vadd.f32 %v2879_v62, %v2863_v43  ;;  %v2888_v49 = vadd.f32 %v2880_v45, %v2864_v26 }
 0x226   : > { %v2889_v51 = vadd.f32 %v2881_v15, %v2865_v8  ;;  %v2890_v5 = vadd.f32 %v2882_v58, %v2866_v61  ;;  %v2891_v47 = vadd.f32 %v2883_v14, %v2867_v37  ;;  %v2892_v57 = vadd.f32 %v2884_v22, %v2868_v34 }
 0x227   : > { %v3445_v59 = vtrunc.f32 %v2885_v19  ;;  %v3447_v29 = vtrunc.f32 %v2886_v6  ;;  %v3449_v42 = vtrunc.f32 %v2887_v35  ;;  %v3451_v40 = vtrunc.f32 %v2888_v49 }
 0x228   : > { %v3453_v50 = vtrunc.f32 %v2889_v51  ;;  %v3455_v3 = vtrunc.f32 %v2890_v5  ;;  %v3457_v0 = vtrunc.f32 %v2891_v47  ;;  %v3459_v39 = vtrunc.f32 %v2892_v57 }
 0x229   : > { %v3446_v21 = vcvt.f32.s32 %v3445_v59  ;;  %v3448_v17 = vcvt.f32.s32 %v3447_v29  ;;  %v3450_v46 = vcvt.f32.s32 %v3449_v42  ;;  %v3452_v55 = vcvt.f32.s32 %v3451_v40 }
 0x22a   : > { %v3454_v18 = vcvt.f32.s32 %v3453_v50  ;;  %v3456_v9 = vcvt.f32.s32 %v3455_v3  ;;  %v3458_v43 = vcvt.f32.s32 %v3457_v0  ;;  %v3460_v54 = vcvt.f32.s32 %v3459_v39 }
 0x22b   : > { %v2901_v44 = vcombine.low %v3446_v21, %v3448_v17  ;;  %v2902_v38 = vcombine.low %v3450_v46, %v3452_v55 }
 0x22c   : > { %v2903_v24 = vcombine.low %v3454_v18, %v3456_v9  ;;  %v2904_v26 = vcombine.low %v3458_v43, %v3460_v54 }
 0x22d   : > { %v2911_v7 = vrot.slane %v2901_v44, %v6539_v33  ;;  %v2918_v1 = vrot.slane %v2902_v38, %v6539_v33 }
 0x22e   : > { %v2925_v48 = vrot.slane %v2903_v24, %v6539_v33  ;;  %v2932_v8 = vrot.slane %v2904_v26, %v6539_v33 }
 0x22f   : > { %v2933_v16 = vcombine.low %v2911_v7, %v2918_v1 }
 0x230   : > { %v2934_v32 = vcombine.low %v2925_v48, %v2932_v8 }
 0x231   : > { %v2941_v4 = vrot.slane %v2933_v16, %v6539_v33 }
 0x232   : > { %v2948_v11 = vrot.slane %v2934_v32, %v6539_v33 }
 0x234   : > { %v2949_v61 = vcombine.low %v2941_v4, %v2948_v11 }
 0x236   : > { %2950 = vst [vmem:[%s192_s30] sm:$0xff] %v2949_v61 }
 0x237   : > { %3680 = shalt.err (!%p3677_p7)
}
 0x238   : > { %s3681_s12 = scalar_lea.hbm %s2987_s6, 128  ;;  %s3685_s18 = scalar_lea.hbm %s6180_s2, 256 }
 0x239   : > { %p3682_p10 = scmp.ne.s32.totalorder %s2987_s6, %s3681_s12  ;;  %p3686_p8 = scmp.lt.s32.totalorder %s2987_s6, %s6180_s2 }
 0x23a   : > { %p3687_p12 = scmp.lt.s32.totalorder %s3685_s18, %s3681_s12 }
 0x23b   : > { %p3683_p13 = pnand %p3682_p10, %p3831_p9 }
 0x23c   : > { %p3688_p0 = por %p3687_p12, %p3686_p8 }
 0x23d   : > { %p3684_p2 = pneg %p3683_p13 }
 0x23f   : > { %p3689_p1 = pnand %p3688_p0, %p3684_p2 }
 0x241   : > { %3692 = shalt.err (!%p3689_p1)
}
 0x242   : > { %3464 = dma.vmem_to_hbm [thread:$0]  (%p3831_p9), %s2990_s3, 128, %s2987_s6, %s2957_s7  }
 0x243 PF: > { %s3001_s26 = sand.u32 1, %s3731_s9   ;;  %p6540_p3 = scmp.ge.s32.totalorder %s3751_s14, 2 }
 0x244   : > { %s3002_s27 = scalar_lea.sflag [#allocation4], %s3001_s26 }
 0x245   : > { %p3472_p5 = pnand %p6540_p3, %p3838_p11 }
 0x247   : > { %p3473_p6 = pneg %p3472_p5 }
 0x249   : > { %3722 = dma.done.wait (%p3473_p6), %s3002_s27, 128  }
 0x24a   : > { %3724 = vsyncadd (%p3473_p6), %s3002_s27, 4294967168  ;;  %s3011_s28 = scalar_lea.sflag [#allocation7], %s3001_s26 }
 0x24b   : > { %3726 = dma.done.wait (%p3473_p6), %s3011_s28, 128  }
 0x24c   : > { %3728 = vsyncadd (%p3473_p6), %s3011_s28, 4294967168  ;;  %s22_s14 = sadd.s32 1, %s3751_s14   ;;  %s6541_s9 = smov %s3735_s10 }
 0x24d   : > { %p19_p4 = scmp.ge.s32.totalorder %s22_s14, 4   ;;  %s6542_s10 = smov %s3739_s11 }
 0x24e   : > { %s6543_s11 = smov %s3836_s23  ;;  %s6544_s12 = smov %s3747_s13 }
 0x24f   : > { %s6545_s13 = smov %s6547_s17  ;;  %21 = sbr.rel (!%p19_p4) target bundleno = 8 (0x8), region = 86 }
 0x254   :  { %3016 = vsyncpa [#allocation3], 1 }
 0x255   :  { %3018 = vsyncpa [#allocation3 + $0x1], 1 }
 0x256   :  { %3019 = vsyncpa [#allocation4], 1 }
 0x257   :  { %3021 = vsyncpa [#allocation4 + $0x1], 1 }
 0x258   :  { %3022 = vsyncpa [#allocation7], 1 }
 0x259   :  { %3024 = vsyncpa [#allocation7 + $0x1], 1 }

</bundles_post_ra>
